<compile_context>
chip_gen: v6e
topology: v6e:2x2x1
jax: 0.10.0
libtpu: 0.0.40
codegen_flags: <defaults>
</compile_context>

<pallas_src>
import numpy as np
import jax
import jax.numpy as jnp
from jax.experimental import pallas as pl
from jax.experimental.pallas import tpu as pltpu

# ----------------------------- config (scaled-down) --------------------------
BATCH = 2
SEQ = 8
BS = BATCH * SEQ
HIDDEN = 128
NUM_HEADS = 2
HEAD_DIM = HIDDEN // NUM_HEADS          # 64
HEAD_PAD = 128                          # per-head lane-padded width
QKV_PAD = 3 * NUM_HEADS * HEAD_PAD      # 768 (padded fused QKV width)
INTERMEDIATE = 256
NUM_LAYERS = 2
VOCAB = 1000
VOCAB_PAD = 1024                        # padded vocab for in-kernel one-hot gather
MAX_POS = 32
TYPE_VOCAB = 2
CLS_HID = 64                            # classifier hidden width
N_ACTION = 4
N_COMP = 5
OUT_ROWS = 8                            # sublane-padded output rows (full vreg store)
OUT_PAD = 128                           # lane-dense padded logits width
LN_EPS = 1e-12                          # BERT LayerNorm eps
HEAD_LN_EPS = 1e-5                      # nn.LayerNorm default eps

# static block-diagonal (same-batch) pattern for the batched [16,16] attention
_SAME_BATCH = np.kron(np.eye(BATCH, dtype=np.bool_),
                      np.ones((SEQ, SEQ), dtype=np.bool_))


# ----------------------------- in-kernel helpers -----------------------------
def _layer_norm(x, g, b, eps):
    mean = jnp.mean(x, axis=-1, keepdims=True)
    xc = x - mean
    var = jnp.mean(xc * xc, axis=-1, keepdims=True)
    return xc * jax.lax.rsqrt(var + eps) * g + b


def _mm(x_bf16, w_bf16):
    # bf16 MXU matmul with f32 accumulation (operands already bf16).
    return jnp.dot(x_bf16, w_bf16, preferred_element_type=jnp.float32)


# ----------------------------- the single fused kernel -----------------------
def _fused_kernel(ids_ref, pos_type_ref, attn_bias_ref, mask_col_ref,
                  word_ref, eg_ref, eb_ref,
                  qkv_w_ref, qkv_b_ref, ao_w_ref, ao_b_ref,
                  ln1_g_ref, ln1_b_ref, ff_w_ref, ff_b_ref,
                  fo_w_ref, fo_b_ref, ln2_g_ref, ln2_b_ref,
                  pool_w_ref, pool_b_ref,
                  attn_w_ref, attn_b_ref,
                  sw_wc_ref, sw_wx_ref, sw_b_ref,
                  w1_ref, lnh_g_ref, lnh_b_ref, w2_ref,
                  out_ref, h_scr):
    scale = 1.0 / (HEAD_DIM ** 0.5)

    # ---- embedding gather (one-hot matmul) + pos/type add + LayerNorm ----
    lane_ids = jax.lax.broadcasted_iota(jnp.int32, (BS, VOCAB_PAD), 1)
    one_hot = (lane_ids == ids_ref[...]).astype(jnp.bfloat16)           # [BS, Vp]
    word = _mm(one_hot, word_ref[...])                                  # [BS, H]
    h = _layer_norm(word + pos_type_ref[...], eg_ref[...], eb_ref[...], LN_EPS)

    attn_bias = attn_bias_ref[...]                                      # [BS, BS]

    # ---- 2-layer encoder (static unroll; weights stay in VMEM) ----
    for l in range(NUM_LAYERS):
        h_bf = h.astype(jnp.bfloat16)                                   # cast once / layer
        qkv = _mm(h_bf, qkv_w_ref[l]) + qkv_b_ref[l]                    # [BS, 768]
        qkv_bf = qkv.astype(jnp.bfloat16)

        # per-head batched attention over all 16 rows; 128-lane-aligned slices
        ctx = None
        for hd in range(NUM_HEADS):
            q0 = hd * HEAD_PAD
            k0 = NUM_HEADS * HEAD_PAD + hd * HEAD_PAD
            v0 = 2 * NUM_HEADS * HEAD_PAD + hd * HEAD_PAD
            q = qkv_bf[:, q0:q0 + HEAD_PAD]                             # [BS, 128]
            k = qkv_bf[:, k0:k0 + HEAD_PAD]
            v = qkv_bf[:, v0:v0 + HEAD_PAD]                             # V pre-placed at its
                                                                        # merged lane offset
            s = jax.lax.dot_general(q, k, (((1,), (1,)), ((), ())),
                                    preferred_element_type=jnp.float32) * scale
            s = s + attn_bias                                           # block-diag + padding
            m = jnp.max(s, axis=-1, keepdims=True)
            p = jnp.exp(s - m)
            p = p * pl.reciprocal(jnp.sum(p, axis=-1, keepdims=True), approx=True)
            c = _mm(p.astype(jnp.bfloat16), v)                          # [BS, 128]
            ctx = c if ctx is None else ctx + c                         # heads merge by add

        attn_out = _mm(ctx.astype(jnp.bfloat16), ao_w_ref[l]) + ao_b_ref[l]
        h1 = _layer_norm(attn_out + h, ln1_g_ref[l], ln1_b_ref[l], LN_EPS)

        ff = _mm(h1.astype(jnp.bfloat16), ff_w_ref[l]) + ff_b_ref[l]
        # TODO(synk): BERT's GELU is the exact erf form; tanh approximation is
        # used here for portable Mosaic lowering.
        ff = jax.nn.gelu(ff, approximate=True)
        ff_out = _mm(ff.astype(jnp.bfloat16), fo_w_ref[l]) + fo_b_ref[l]
        h = _layer_norm(ff_out + h1, ln2_g_ref[l], ln2_b_ref[l], LN_EPS)

    # ---- BERT pooler: CLS rows via one strided sublane load ----
    h_scr[...] = h
    cls = h_scr[pl.ds(0, BATCH, stride=SEQ), :]                         # [B, H]
    ctx_pool = jnp.tanh(_mm(cls.astype(jnp.bfloat16), pool_w_ref[...]) + pool_b_ref[...])

    # ---- a/c attention scores on the VPU (mul + lane reduce), not the MXU ----
    x = h
    mask_col = mask_col_ref[...]                                        # [BS, 1]
    sa = jnp.sum(x * attn_w_ref[0:1, :], axis=-1, keepdims=True) + attn_b_ref[0:1, :] + mask_col
    sc = jnp.sum(x * attn_w_ref[1:2, :], axis=-1, keepdims=True) + attn_b_ref[1:2, :] + mask_col

    # softmax over the sequence dim (per batch), then mean over the FULL padded
    # sequence (matches torch .softmax(dim=1) followed by .mean(dim=1)).
    inv_s = 1.0 / SEQ
    a_rows, c_rows = [], []
    for b in range(BATCH):
        r0 = b * SEQ
        emb_b = x[r0:r0 + SEQ, :]                                       # [S, H]
        for scores, rows in ((sa, a_rows), (sc, c_rows)):
            seg = scores[r0:r0 + SEQ, :]                                # [S, 1]
            m = jnp.max(seg, axis=0, keepdims=True)
            pe = jnp.exp(seg - m)
            w = pe * pl.reciprocal(jnp.sum(pe, axis=0, keepdims=True), approx=True)
            rows.append(jnp.sum(emb_b * w, axis=0, keepdims=True) * inv_s)
    a_vec = jnp.concatenate(a_rows, axis=0)                             # [B, H]
    c_vec = jnp.concatenate(c_rows, axis=0)                             # [B, H]

    # ---- sigmoid switches: gate = sigmoid([ctx, pooled] @ w + b) ----
    a_logit = jnp.sum(ctx_pool * sw_wc_ref[0:1, :] + a_vec * sw_wx_ref[0:1, :],
                      axis=-1, keepdims=True) + sw_b_ref[0:1, :]
    c_logit = jnp.sum(ctx_pool * sw_wc_ref[1:2, :] + c_vec * sw_wx_ref[1:2, :],
                      axis=-1, keepdims=True) + sw_b_ref[1:2, :]
    a_gate = 1.0 / (1.0 + jnp.exp(-a_logit))
    c_gate = 1.0 / (1.0 + jnp.exp(-c_logit))
    a_fin = a_gate * a_vec + (1.0 - a_gate) * ctx_pool                  # [B, H]
    c_fin = c_gate * c_vec + (1.0 - c_gate) * ctx_pool                  # [B, H]

    # ---- classifier MLPs packed side-by-side; 8-row slab for full-vreg store
    xin = jnp.concatenate([a_fin, c_fin, a_fin, c_fin], axis=0).astype(jnp.bfloat16)  # [8, H]
    hid = _mm(xin, w1_ref[...])                                         # [8, 2*CLS_HID]
    hid = jnp.where(hid > 0, hid, jnp.exp(jnp.minimum(hid, 0.0)) - 1.0)  # ELU
    ln_a = _layer_norm(hid[0:BATCH, 0:CLS_HID],
                       lnh_g_ref[0:1, 0:CLS_HID], lnh_b_ref[0:1, 0:CLS_HID],
                       HEAD_LN_EPS)
    ln_c = _layer_norm(hid[BATCH:2 * BATCH, CLS_HID:2 * CLS_HID],
                       lnh_g_ref[0:1, CLS_HID:2 * CLS_HID],
                       lnh_b_ref[0:1, CLS_HID:2 * CLS_HID], HEAD_LN_EPS)
    x2 = jnp.concatenate([ln_a, ln_c, ln_a, ln_c], axis=0).astype(jnp.bfloat16)       # [8, 64]
    out_ref[...] = _mm(x2, w2_ref[...]).astype(out_ref.dtype)           # [8, 128] unmasked store


# ----------------------------- model forward (glue) ---------------------------
def mymodel3_forward(params, seq_ids, attn_masks):
    """seq_ids:[B,S] int32, attn_masks:[B,S] {0,1}.
    Returns [action_logits [B,4], comp_logits [B,5]] (eval mode, dropouts off)."""
    B, S = seq_ids.shape

    ids_col = seq_ids.reshape(B * S, 1).astype(jnp.int32)
    mask_add = (1.0 - attn_masks.astype(jnp.float32)) * -10000.0        # [B, S]
    mask_col = mask_add.reshape(B * S, 1)                               # [B*S, 1]
    # block-diagonal additive bias: per-token padding mask within a batch
    # block, -1e4 across batches -> one [16,16] softmax serves every head.
    attn_bias = jnp.where(_SAME_BATCH, mask_add.reshape(1, B * S), -10000.0)

    args = (ids_col, params["pos_type"], attn_bias, mask_col,
            params["word_emb"], params["emb_ln_g"], params["emb_ln_b"],
            params["qkv_w"], params["qkv_b"], params["ao_w"], params["ao_b"],
            params["ln1_g"], params["ln1_b"], params["ff_w"], params["ff_b"],
            params["fo_w"], params["fo_b"], params["ln2_g"], params["ln2_b"],
            params["pool_w"], params["pool_b"],
            params["attn_w"], params["attn_b"],
            params["sw_wc"], params["sw_wx"], params["sw_b"],
            params["w1_cat"], params["lnh_g"], params["lnh_b"], params["w2_pad"])

    logits = pl.pallas_call(
        _fused_kernel,
        out_shape=jax.ShapeDtypeStruct((OUT_ROWS, OUT_PAD), jnp.float32),
        in_specs=[pl.BlockSpec(memory_space=pltpu.MemorySpace.VMEM) for _ in args],
        out_specs=pl.BlockSpec(memory_space=pltpu.MemorySpace.VMEM),
        scratch_shapes=[pltpu.VMEM((B * S, HIDDEN), jnp.float32)],
    )(*args)

    action_logits = logits[:B, :N_ACTION]
    comp_logits = logits[B:2 * B, N_ACTION:N_ACTION + N_COMP]
    return [action_logits, comp_logits]


# ----------------------------- deterministic params --------------------------
def init_params(key):
    def nrm(k, shape, scale=0.02):
        return (scale * jax.random.normal(k, shape)).astype(jnp.float32)

    keys = iter(jax.random.split(key, 64))
    L, H, I, C = NUM_LAYERS, HIDDEN, INTERMEDIATE, CLS_HID

    # embeddings (vocab padded to 1024 rows for the in-kernel one-hot gather)
    word = nrm(next(keys), (VOCAB, H))
    word_pad = jnp.zeros((VOCAB_PAD, H), jnp.float32).at[:VOCAB].set(word)
    pos = nrm(next(keys), (MAX_POS, H))
    typ = nrm(next(keys), (TYPE_VOCAB, H))
    # position + token-type(=0) contribution, pre-broadcast to [B*S, H]
    pos_type = jnp.tile(pos[:SEQ] + typ[0:1], (BATCH, 1))

    # fused, head-padded QKV: each head's Q/K/V occupies its own 128-lane
    # group (real 64 lanes + zero pad); V is placed at its merged-context
    # lane offset so PV outputs add directly into the [BS, H] context.
    wq = nrm(next(keys), (L, H, H))
    wk = nrm(next(keys), (L, H, H))
    wv = nrm(next(keys), (L, H, H))
    qkv_w = jnp.zeros((L, H, QKV_PAD), jnp.float32)
    for hd in range(NUM_HEADS):
        s, e = hd * HEAD_DIM, (hd + 1) * HEAD_DIM
        q0 = hd * HEAD_PAD
        k0 = NUM_HEADS * HEAD_PAD + hd * HEAD_PAD
        v0 = 2 * NUM_HEADS * HEAD_PAD + hd * HEAD_PAD
        qkv_w = qkv_w.at[:, :, q0:q0 + HEAD_DIM].set(wq[:, :, s:e])
        qkv_w = qkv_w.at[:, :, k0:k0 + HEAD_DIM].set(wk[:, :, s:e])
        qkv_w = qkv_w.at[:, :, v0 + s:v0 + e].set(wv[:, :, s:e])

    w2a = nrm(next(keys), (C, N_ACTION))
    w2c = nrm(next(keys), (C, N_COMP))
    w2_pad = jnp.zeros((C, OUT_PAD), jnp.float32)
    w2_pad = w2_pad.at[:, :N_ACTION].set(w2a)
    w2_pad = w2_pad.at[:, N_ACTION:N_ACTION + N_COMP].set(w2c)

    return {
        "word_emb": word_pad.astype(jnp.bfloat16),
        "pos_type": pos_type,
        "emb_ln_g": jnp.ones((1, H), jnp.float32),
        "emb_ln_b": jnp.zeros((1, H), jnp.float32),
        # zero biases keep the padded Q/K/V lanes exactly zero
        "qkv_w": qkv_w.astype(jnp.bfloat16),
        "qkv_b": jnp.zeros((L, 1, QKV_PAD), jnp.float32),
        "ao_w": nrm(next(keys), (L, H, H)).astype(jnp.bfloat16),
        "ao_b": jnp.zeros((L, 1, H), jnp.float32),
        "ln1_g": jnp.ones((L, 1, H), jnp.float32),
        "ln1_b": jnp.zeros((L, 1, H), jnp.float32),
        "ff_w": nrm(next(keys), (L, H, I)).astype(jnp.bfloat16),
        "ff_b": jnp.zeros((L, 1, I), jnp.float32),
        "fo_w": nrm(next(keys), (L, I, H)).astype(jnp.bfloat16),
        "fo_b": jnp.zeros((L, 1, H), jnp.float32),
        "ln2_g": jnp.ones((L, 1, H), jnp.float32),
        "ln2_b": jnp.zeros((L, 1, H), jnp.float32),
        # BERT pooler
        "pool_w": nrm(next(keys), (H, H)).astype(jnp.bfloat16),
        "pool_b": jnp.zeros((1, H), jnp.float32),
        # a/c attention scorers: two Linear(H,1) as rows of a [2, H] (VPU path)
        "attn_w": nrm(next(keys), (2, H)),
        "attn_b": jnp.zeros((2, 1), jnp.float32),
        # sigmoid switches: Linear(2H,1) split into ctx-part / pooled-part rows
        "sw_wc": nrm(next(keys), (2, H)),
        "sw_wx": nrm(next(keys), (2, H)),
        "sw_b": jnp.zeros((2, 1), jnp.float32),
        # classifier MLPs: Linear(H,64,no-bias) packed side-by-side, LN(64),
        # Linear(64,4/5,no-bias) packed into 128 output lanes
        "w1_cat": nrm(next(keys), (H, 2 * C)).astype(jnp.bfloat16),
        "lnh_g": jnp.ones((1, 2 * C), jnp.float32),
        "lnh_b": jnp.zeros((1, 2 * C), jnp.float32),
        "w2_pad": w2_pad.astype(jnp.bfloat16),
    }


# ----------------------------- main -------------------------------------------
if __name__ == "__main__":
    root = jax.random.PRNGKey(0)
    k_param, k_ids = jax.random.split(root)

    params = init_params(k_param)

    seq_ids = jax.random.randint(k_ids, (BATCH, SEQ), 0, VOCAB, dtype=jnp.int32)
    attn_masks = jnp.ones((BATCH, SEQ), dtype=jnp.int32)
    attn_masks = attn_masks.at[1, SEQ - 2:].set(0)   # pad last 2 tokens of example 1

    fwd = jax.jit(mymodel3_forward)
    action_logits, comp_logits = fwd(params, seq_ids, attn_masks)
    jax.block_until_ready(action_logits)
    jax.block_until_ready(comp_logits)

    assert action_logits.shape == (BATCH, N_ACTION)
    assert comp_logits.shape == (BATCH, N_COMP)
    assert jnp.all(jnp.isfinite(action_logits)) and jnp.all(jnp.isfinite(comp_logits))
    print("KERNEL_OK")
</pallas_src>

<mosaic_0001>
module attributes {stable_mosaic.version = 11 : i64} {
  func.func @_fused_kernel(%arg0: memref<16x1xi32, #tpu.memory_space<vmem>>, %arg1: memref<16x128xf32, #tpu.memory_space<vmem>>, %arg2: memref<16x16xf32, #tpu.memory_space<vmem>>, %arg3: memref<16x1xf32, #tpu.memory_space<vmem>>, %arg4: memref<1024x128xbf16, #tpu.memory_space<vmem>>, %arg5: memref<1x128xf32, #tpu.memory_space<vmem>>, %arg6: memref<1x128xf32, #tpu.memory_space<vmem>>, %arg7: memref<2x128x768xbf16, #tpu.memory_space<vmem>>, %arg8: memref<2x1x768xf32, #tpu.memory_space<vmem>>, %arg9: memref<2x128x128xbf16, #tpu.memory_space<vmem>>, %arg10: memref<2x1x128xf32, #tpu.memory_space<vmem>>, %arg11: memref<2x1x128xf32, #tpu.memory_space<vmem>>, %arg12: memref<2x1x128xf32, #tpu.memory_space<vmem>>, %arg13: memref<2x128x256xbf16, #tpu.memory_space<vmem>>, %arg14: memref<2x1x256xf32, #tpu.memory_space<vmem>>, %arg15: memref<2x256x128xbf16, #tpu.memory_space<vmem>>, %arg16: memref<2x1x128xf32, #tpu.memory_space<vmem>>, %arg17: memref<2x1x128xf32, #tpu.memory_space<vmem>>, %arg18: memref<2x1x128xf32, #tpu.memory_space<vmem>>, %arg19: memref<128x128xbf16, #tpu.memory_space<vmem>>, %arg20: memref<1x128xf32, #tpu.memory_space<vmem>>, %arg21: memref<2x128xf32, #tpu.memory_space<vmem>>, %arg22: memref<2x1xf32, #tpu.memory_space<vmem>>, %arg23: memref<2x128xf32, #tpu.memory_space<vmem>>, %arg24: memref<2x128xf32, #tpu.memory_space<vmem>>, %arg25: memref<2x1xf32, #tpu.memory_space<vmem>>, %arg26: memref<128x128xbf16, #tpu.memory_space<vmem>>, %arg27: memref<1x128xf32, #tpu.memory_space<vmem>>, %arg28: memref<1x128xf32, #tpu.memory_space<vmem>>, %arg29: memref<64x128xbf16, #tpu.memory_space<vmem>>, %arg30: memref<8x128xf32, #tpu.memory_space<vmem>>, %arg31: memref<16x128xf32, #tpu.memory_space<vmem>>) attributes {dimension_semantics = [], scalar_prefetch = 0 : i64, scratch_operands = 1 : i64, tpu.core_type = #tpu.core_type<tc>} {
    %0 = tpu.iota {dimensions = array<i32: 1>} : vector<16x1024xi32>
    %c0 = arith.constant 0 : index
    %c0_0 = arith.constant 0 : index
    %1 = vector.load %arg0[%c0, %c0_0] : memref<16x1xi32, #tpu.memory_space<vmem>>, vector<16x1xi32>
    %2 = vector.broadcast %1 : vector<16x1xi32> to vector<16x1024xi32>
    %3 = arith.cmpi eq, %0, %2 : vector<16x1024xi32>
    %4 = arith.extui %3 : vector<16x1024xi1> to vector<16x1024xi32>
    %5 = arith.sitofp %4 : vector<16x1024xi32> to vector<16x1024xf32>
    %6 = arith.truncf %5 : vector<16x1024xf32> to vector<16x1024xbf16>
    %c0_1 = arith.constant 0 : index
    %c0_2 = arith.constant 0 : index
    %7 = vector.load %arg4[%c0_1, %c0_2] : memref<1024x128xbf16, #tpu.memory_space<vmem>>, vector<1024x128xbf16>
    %cst = arith.constant dense<0.000000e+00> : vector<16x128xf32>
    %8 = tpu.matmul %6, %7, %cst {dimension_numbers = #tpu.dot_dimension_numbers<[1], [0], [0], [1], [0, 0, 1, 1], [], []>} : vector<16x1024xbf16>, vector<1024x128xbf16>, vector<16x128xf32> -> vector<16x128xf32>
    %c0_3 = arith.constant 0 : index
    %c0_4 = arith.constant 0 : index
    %9 = vector.load %arg1[%c0_3, %c0_4] : memref<16x128xf32, #tpu.memory_space<vmem>>, vector<16x128xf32>
    %10 = arith.addf %8, %9 : vector<16x128xf32>
    %c0_5 = arith.constant 0 : index
    %c0_6 = arith.constant 0 : index
    %11 = vector.load %arg5[%c0_5, %c0_6] : memref<1x128xf32, #tpu.memory_space<vmem>>, vector<1x128xf32>
    %c0_7 = arith.constant 0 : index
    %c0_8 = arith.constant 0 : index
    %12 = vector.load %arg6[%c0_7, %c0_8] : memref<1x128xf32, #tpu.memory_space<vmem>>, vector<1x128xf32>
    %cst_9 = arith.constant dense<0.000000e+00> : vector<16xf32>
    %13 = vector.multi_reduction <add>, %10, %cst_9 [1] : vector<16x128xf32> to vector<16xf32>
    %14 = vector.shape_cast %13 : vector<16xf32> to vector<16x1xf32>
    %cst_10 = arith.constant 1.280000e+02 : f32
    %15 = vector.broadcast %cst_10 : f32 to vector<16x1xf32>
    %16 = arith.divf %14, %15 : vector<16x1xf32>
    %17 = vector.broadcast %16 : vector<16x1xf32> to vector<16x128xf32>
    %18 = arith.subf %10, %17 : vector<16x128xf32>
    %19 = arith.mulf %18, %18 : vector<16x128xf32>
    %cst_11 = arith.constant dense<0.000000e+00> : vector<16xf32>
    %20 = vector.multi_reduction <add>, %19, %cst_11 [1] : vector<16x128xf32> to vector<16xf32>
    %21 = vector.shape_cast %20 : vector<16xf32> to vector<16x1xf32>
    %cst_12 = arith.constant 1.280000e+02 : f32
    %22 = vector.broadcast %cst_12 : f32 to vector<16x1xf32>
    %23 = arith.divf %21, %22 : vector<16x1xf32>
    %cst_13 = arith.constant 9.99999996E-13 : f32
    %24 = vector.broadcast %cst_13 : f32 to vector<16x1xf32>
    %25 = arith.addf %23, %24 : vector<16x1xf32>
    %26 = math.rsqrt %25 : vector<16x1xf32>
    %27 = vector.broadcast %26 : vector<16x1xf32> to vector<16x128xf32>
    %28 = arith.mulf %18, %27 : vector<16x128xf32>
    %29 = vector.broadcast %11 : vector<1x128xf32> to vector<16x128xf32>
    %30 = arith.mulf %28, %29 : vector<16x128xf32>
    %31 = vector.broadcast %12 : vector<1x128xf32> to vector<16x128xf32>
    %32 = arith.addf %30, %31 : vector<16x128xf32>
    %c0_14 = arith.constant 0 : index
    %c0_15 = arith.constant 0 : index
    %33 = vector.load %arg2[%c0_14, %c0_15] : memref<16x16xf32, #tpu.memory_space<vmem>>, vector<16x16xf32>
    %34 = arith.truncf %32 : vector<16x128xf32> to vector<16x128xbf16>
    %c0_16 = arith.constant 0 : index
    %c0_17 = arith.constant 0 : index
    %c0_18 = arith.constant 0 : index
    %35 = vector.load %arg7[%c0_16, %c0_17, %c0_18] : memref<2x128x768xbf16, #tpu.memory_space<vmem>>, vector<1x128x768xbf16>
    %36 = vector.shape_cast %35 : vector<1x128x768xbf16> to vector<128x768xbf16>
    %cst_19 = arith.constant dense<0.000000e+00> : vector<16x768xf32>
    %37 = tpu.matmul %34, %36, %cst_19 {dimension_numbers = #tpu.dot_dimension_numbers<[1], [0], [0], [1], [0, 0, 1, 1], [], []>} : vector<16x128xbf16>, vector<128x768xbf16>, vector<16x768xf32> -> vector<16x768xf32>
    %c0_20 = arith.constant 0 : index
    %c0_21 = arith.constant 0 : index
    %c0_22 = arith.constant 0 : index
    %38 = vector.load %arg8[%c0_20, %c0_21, %c0_22] : memref<2x1x768xf32, #tpu.memory_space<vmem>>, vector<1x1x768xf32>
    %39 = vector.shape_cast %38 : vector<1x1x768xf32> to vector<1x768xf32>
    %40 = vector.broadcast %39 : vector<1x768xf32> to vector<16x768xf32>
    %41 = arith.addf %37, %40 : vector<16x768xf32>
    %42 = arith.truncf %41 : vector<16x768xf32> to vector<16x768xbf16>
    %43 = vector.extract_strided_slice %42 {offsets = [0, 0], sizes = [16, 128], strides = [1, 1]} : vector<16x768xbf16> to vector<16x128xbf16>
    %44 = vector.extract_strided_slice %42 {offsets = [0, 256], sizes = [16, 128], strides = [1, 1]} : vector<16x768xbf16> to vector<16x128xbf16>
    %45 = vector.extract_strided_slice %42 {offsets = [0, 512], sizes = [16, 128], strides = [1, 1]} : vector<16x768xbf16> to vector<16x128xbf16>
    %cst_23 = arith.constant dense<0.000000e+00> : vector<16x16xf32>
    %46 = tpu.matmul %43, %44, %cst_23 {dimension_numbers = #tpu.dot_dimension_numbers<[1], [1], [0], [0], [0, 0, 1, 0], [], []>} : vector<16x128xbf16>, vector<16x128xbf16>, vector<16x16xf32> -> vector<16x16xf32>
    %cst_24 = arith.constant 1.250000e-01 : f32
    %47 = vector.broadcast %cst_24 : f32 to vector<16x16xf32>
    %48 = arith.mulf %46, %47 : vector<16x16xf32>
    %49 = arith.addf %48, %33 : vector<16x16xf32>
    %cst_25 = arith.constant dense<0xFF800000> : vector<16xf32>
    %50 = vector.multi_reduction <maximumf>, %49, %cst_25 [1] : vector<16x16xf32> to vector<16xf32>
    %51 = vector.shape_cast %50 : vector<16xf32> to vector<16x1xf32>
    %52 = vector.broadcast %51 : vector<16x1xf32> to vector<16x16xf32>
    %53 = arith.subf %49, %52 : vector<16x16xf32>
    %54 = math.exp %53 : vector<16x16xf32>
    %cst_26 = arith.constant dense<0.000000e+00> : vector<16xf32>
    %55 = vector.multi_reduction <add>, %54, %cst_26 [1] : vector<16x16xf32> to vector<16xf32>
    %56 = vector.shape_cast %55 : vector<16xf32> to vector<16x1xf32>
    %57 = tpu.reciprocal %56 {approx = true} : vector<16x1xf32> -> vector<16x1xf32>
    %58 = vector.broadcast %57 : vector<16x1xf32> to vector<16x16xf32>
    %59 = arith.mulf %54, %58 : vector<16x16xf32>
    %60 = arith.truncf %59 : vector<16x16xf32> to vector<16x16xbf16>
    %cst_27 = arith.constant dense<0.000000e+00> : vector<16x128xf32>
    %61 = tpu.matmul %60, %45, %cst_27 {dimension_numbers = #tpu.dot_dimension_numbers<[1], [0], [0], [1], [0, 0, 1, 1], [], []>} : vector<16x16xbf16>, vector<16x128xbf16>, vector<16x128xf32> -> vector<16x128xf32>
    %62 = vector.extract_strided_slice %42 {offsets = [0, 128], sizes = [16, 128], strides = [1, 1]} : vector<16x768xbf16> to vector<16x128xbf16>
    %63 = vector.extract_strided_slice %42 {offsets = [0, 384], sizes = [16, 128], strides = [1, 1]} : vector<16x768xbf16> to vector<16x128xbf16>
    %64 = vector.extract_strided_slice %42 {offsets = [0, 640], sizes = [16, 128], strides = [1, 1]} : vector<16x768xbf16> to vector<16x128xbf16>
    %cst_28 = arith.constant dense<0.000000e+00> : vector<16x16xf32>
    %65 = tpu.matmul %62, %63, %cst_28 {dimension_numbers = #tpu.dot_dimension_numbers<[1], [1], [0], [0], [0, 0, 1, 0], [], []>} : vector<16x128xbf16>, vector<16x128xbf16>, vector<16x16xf32> -> vector<16x16xf32>
    %cst_29 = arith.constant 1.250000e-01 : f32
    %66 = vector.broadcast %cst_29 : f32 to vector<16x16xf32>
    %67 = arith.mulf %65, %66 : vector<16x16xf32>
    %68 = arith.addf %67, %33 : vector<16x16xf32>
    %cst_30 = arith.constant dense<0xFF800000> : vector<16xf32>
    %69 = vector.multi_reduction <maximumf>, %68, %cst_30 [1] : vector<16x16xf32> to vector<16xf32>
    %70 = vector.shape_cast %69 : vector<16xf32> to vector<16x1xf32>
    %71 = vector.broadcast %70 : vector<16x1xf32> to vector<16x16xf32>
    %72 = arith.subf %68, %71 : vector<16x16xf32>
    %73 = math.exp %72 : vector<16x16xf32>
    %cst_31 = arith.constant dense<0.000000e+00> : vector<16xf32>
    %74 = vector.multi_reduction <add>, %73, %cst_31 [1] : vector<16x16xf32> to vector<16xf32>
    %75 = vector.shape_cast %74 : vector<16xf32> to vector<16x1xf32>
    %76 = tpu.reciprocal %75 {approx = true} : vector<16x1xf32> -> vector<16x1xf32>
    %77 = vector.broadcast %76 : vector<16x1xf32> to vector<16x16xf32>
    %78 = arith.mulf %73, %77 : vector<16x16xf32>
    %79 = arith.truncf %78 : vector<16x16xf32> to vector<16x16xbf16>
    %cst_32 = arith.constant dense<0.000000e+00> : vector<16x128xf32>
    %80 = tpu.matmul %79, %64, %cst_32 {dimension_numbers = #tpu.dot_dimension_numbers<[1], [0], [0], [1], [0, 0, 1, 1], [], []>} : vector<16x16xbf16>, vector<16x128xbf16>, vector<16x128xf32> -> vector<16x128xf32>
    %81 = arith.addf %61, %80 : vector<16x128xf32>
    %82 = arith.truncf %81 : vector<16x128xf32> to vector<16x128xbf16>
    %c0_33 = arith.constant 0 : index
    %c0_34 = arith.constant 0 : index
    %c0_35 = arith.constant 0 : index
    %83 = vector.load %arg9[%c0_33, %c0_34, %c0_35] : memref<2x128x128xbf16, #tpu.memory_space<vmem>>, vector<1x128x128xbf16>
    %84 = vector.shape_cast %83 : vector<1x128x128xbf16> to vector<128x128xbf16>
    %cst_36 = arith.constant dense<0.000000e+00> : vector<16x128xf32>
    %85 = tpu.matmul %82, %84, %cst_36 {dimension_numbers = #tpu.dot_dimension_numbers<[1], [0], [0], [1], [0, 0, 1, 1], [], []>} : vector<16x128xbf16>, vector<128x128xbf16>, vector<16x128xf32> -> vector<16x128xf32>
    %c0_37 = arith.constant 0 : index
    %c0_38 = arith.constant 0 : index
    %c0_39 = arith.constant 0 : index
    %86 = vector.load %arg10[%c0_37, %c0_38, %c0_39] : memref<2x1x128xf32, #tpu.memory_space<vmem>>, vector<1x1x128xf32>
    %87 = vector.shape_cast %86 : vector<1x1x128xf32> to vector<1x128xf32>
    %88 = vector.broadcast %87 : vector<1x128xf32> to vector<16x128xf32>
    %89 = arith.addf %85, %88 : vector<16x128xf32>
    %90 = arith.addf %89, %32 : vector<16x128xf32>
    %c0_40 = arith.constant 0 : index
    %c0_41 = arith.constant 0 : index
    %c0_42 = arith.constant 0 : index
    %91 = vector.load %arg11[%c0_40, %c0_41, %c0_42] : memref<2x1x128xf32, #tpu.memory_space<vmem>>, vector<1x1x128xf32>
    %92 = vector.shape_cast %91 : vector<1x1x128xf32> to vector<1x128xf32>
    %c0_43 = arith.constant 0 : index
    %c0_44 = arith.constant 0 : index
    %c0_45 = arith.constant 0 : index
    %93 = vector.load %arg12[%c0_43, %c0_44, %c0_45] : memref<2x1x128xf32, #tpu.memory_space<vmem>>, vector<1x1x128xf32>
    %94 = vector.shape_cast %93 : vector<1x1x128xf32> to vector<1x128xf32>
    %cst_46 = arith.constant dense<0.000000e+00> : vector<16xf32>
    %95 = vector.multi_reduction <add>, %90, %cst_46 [1] : vector<16x128xf32> to vector<16xf32>
    %96 = vector.shape_cast %95 : vector<16xf32> to vector<16x1xf32>
    %cst_47 = arith.constant 1.280000e+02 : f32
    %97 = vector.broadcast %cst_47 : f32 to vector<16x1xf32>
    %98 = arith.divf %96, %97 : vector<16x1xf32>
    %99 = vector.broadcast %98 : vector<16x1xf32> to vector<16x128xf32>
    %100 = arith.subf %90, %99 : vector<16x128xf32>
    %101 = arith.mulf %100, %100 : vector<16x128xf32>
    %cst_48 = arith.constant dense<0.000000e+00> : vector<16xf32>
    %102 = vector.multi_reduction <add>, %101, %cst_48 [1] : vector<16x128xf32> to vector<16xf32>
    %103 = vector.shape_cast %102 : vector<16xf32> to vector<16x1xf32>
    %cst_49 = arith.constant 1.280000e+02 : f32
    %104 = vector.broadcast %cst_49 : f32 to vector<16x1xf32>
    %105 = arith.divf %103, %104 : vector<16x1xf32>
    %cst_50 = arith.constant 9.99999996E-13 : f32
    %106 = vector.broadcast %cst_50 : f32 to vector<16x1xf32>
    %107 = arith.addf %105, %106 : vector<16x1xf32>
    %108 = math.rsqrt %107 : vector<16x1xf32>
    %109 = vector.broadcast %108 : vector<16x1xf32> to vector<16x128xf32>
    %110 = arith.mulf %100, %109 : vector<16x128xf32>
    %111 = vector.broadcast %92 : vector<1x128xf32> to vector<16x128xf32>
    %112 = arith.mulf %110, %111 : vector<16x128xf32>
    %113 = vector.broadcast %94 : vector<1x128xf32> to vector<16x128xf32>
    %114 = arith.addf %112, %113 : vector<16x128xf32>
    %115 = arith.truncf %114 : vector<16x128xf32> to vector<16x128xbf16>
    %c0_51 = arith.constant 0 : index
    %c0_52 = arith.constant 0 : index
    %c0_53 = arith.constant 0 : index
    %116 = vector.load %arg13[%c0_51, %c0_52, %c0_53] : memref<2x128x256xbf16, #tpu.memory_space<vmem>>, vector<1x128x256xbf16>
    %117 = vector.shape_cast %116 : vector<1x128x256xbf16> to vector<128x256xbf16>
    %cst_54 = arith.constant dense<0.000000e+00> : vector<16x256xf32>
    %118 = tpu.matmul %115, %117, %cst_54 {dimension_numbers = #tpu.dot_dimension_numbers<[1], [0], [0], [1], [0, 0, 1, 1], [], []>} : vector<16x128xbf16>, vector<128x256xbf16>, vector<16x256xf32> -> vector<16x256xf32>
    %c0_55 = arith.constant 0 : index
    %c0_56 = arith.constant 0 : index
    %c0_57 = arith.constant 0 : index
    %119 = vector.load %arg14[%c0_55, %c0_56, %c0_57] : memref<2x1x256xf32, #tpu.memory_space<vmem>>, vector<1x1x256xf32>
    %120 = vector.shape_cast %119 : vector<1x1x256xf32> to vector<1x256xf32>
    %121 = vector.broadcast %120 : vector<1x256xf32> to vector<16x256xf32>
    %122 = arith.addf %118, %121 : vector<16x256xf32>
    %123 = arith.mulf %122, %122 : vector<16x256xf32>
    %124 = arith.mulf %122, %123 : vector<16x256xf32>
    %cst_58 = arith.constant 4.471500e-02 : f32
    %125 = vector.broadcast %cst_58 : f32 to vector<16x256xf32>
    %126 = arith.mulf %125, %124 : vector<16x256xf32>
    %127 = arith.addf %122, %126 : vector<16x256xf32>
    %cst_59 = arith.constant 0.797884583 : f32
    %128 = vector.broadcast %cst_59 : f32 to vector<16x256xf32>
    %129 = arith.mulf %128, %127 : vector<16x256xf32>
    %130 = math.tanh %129 : vector<16x256xf32>
    %cst_60 = arith.constant 1.000000e+00 : f32
    %131 = vector.broadcast %cst_60 : f32 to vector<16x256xf32>
    %132 = arith.addf %131, %130 : vector<16x256xf32>
    %cst_61 = arith.constant 5.000000e-01 : f32
    %133 = vector.broadcast %cst_61 : f32 to vector<16x256xf32>
    %134 = arith.mulf %133, %132 : vector<16x256xf32>
    %135 = arith.mulf %122, %134 : vector<16x256xf32>
    %136 = arith.truncf %135 : vector<16x256xf32> to vector<16x256xbf16>
    %c0_62 = arith.constant 0 : index
    %c0_63 = arith.constant 0 : index
    %c0_64 = arith.constant 0 : index
    %137 = vector.load %arg15[%c0_62, %c0_63, %c0_64] : memref<2x256x128xbf16, #tpu.memory_space<vmem>>, vector<1x256x128xbf16>
    %138 = vector.shape_cast %137 : vector<1x256x128xbf16> to vector<256x128xbf16>
    %cst_65 = arith.constant dense<0.000000e+00> : vector<16x128xf32>
    %139 = tpu.matmul %136, %138, %cst_65 {dimension_numbers = #tpu.dot_dimension_numbers<[1], [0], [0], [1], [0, 0, 1, 1], [], []>} : vector<16x256xbf16>, vector<256x128xbf16>, vector<16x128xf32> -> vector<16x128xf32>
    %c0_66 = arith.constant 0 : index
    %c0_67 = arith.constant 0 : index
    %c0_68 = arith.constant 0 : index
    %140 = vector.load %arg16[%c0_66, %c0_67, %c0_68] : memref<2x1x128xf32, #tpu.memory_space<vmem>>, vector<1x1x128xf32>
    %141 = vector.shape_cast %140 : vector<1x1x128xf32> to vector<1x128xf32>
    %142 = vector.broadcast %141 : vector<1x128xf32> to vector<16x128xf32>
    %143 = arith.addf %139, %142 : vector<16x128xf32>
    %144 = arith.addf %143, %114 : vector<16x128xf32>
    %c0_69 = arith.constant 0 : index
    %c0_70 = arith.constant 0 : index
    %c0_71 = arith.constant 0 : index
    %145 = vector.load %arg17[%c0_69, %c0_70, %c0_71] : memref<2x1x128xf32, #tpu.memory_space<vmem>>, vector<1x1x128xf32>
    %146 = vector.shape_cast %145 : vector<1x1x128xf32> to vector<1x128xf32>
    %c0_72 = arith.constant 0 : index
    %c0_73 = arith.constant 0 : index
    %c0_74 = arith.constant 0 : index
    %147 = vector.load %arg18[%c0_72, %c0_73, %c0_74] : memref<2x1x128xf32, #tpu.memory_space<vmem>>, vector<1x1x128xf32>
    %148 = vector.shape_cast %147 : vector<1x1x128xf32> to vector<1x128xf32>
    %cst_75 = arith.constant dense<0.000000e+00> : vector<16xf32>
    %149 = vector.multi_reduction <add>, %144, %cst_75 [1] : vector<16x128xf32> to vector<16xf32>
    %150 = vector.shape_cast %149 : vector<16xf32> to vector<16x1xf32>
    %cst_76 = arith.constant 1.280000e+02 : f32
    %151 = vector.broadcast %cst_76 : f32 to vector<16x1xf32>
    %152 = arith.divf %150, %151 : vector<16x1xf32>
    %153 = vector.broadcast %152 : vector<16x1xf32> to vector<16x128xf32>
    %154 = arith.subf %144, %153 : vector<16x128xf32>
    %155 = arith.mulf %154, %154 : vector<16x128xf32>
    %cst_77 = arith.constant dense<0.000000e+00> : vector<16xf32>
    %156 = vector.multi_reduction <add>, %155, %cst_77 [1] : vector<16x128xf32> to vector<16xf32>
    %157 = vector.shape_cast %156 : vector<16xf32> to vector<16x1xf32>
    %cst_78 = arith.constant 1.280000e+02 : f32
    %158 = vector.broadcast %cst_78 : f32 to vector<16x1xf32>
    %159 = arith.divf %157, %158 : vector<16x1xf32>
    %cst_79 = arith.constant 9.99999996E-13 : f32
    %160 = vector.broadcast %cst_79 : f32 to vector<16x1xf32>
    %161 = arith.addf %159, %160 : vector<16x1xf32>
    %162 = math.rsqrt %161 : vector<16x1xf32>
    %163 = vector.broadcast %162 : vector<16x1xf32> to vector<16x128xf32>
    %164 = arith.mulf %154, %163 : vector<16x128xf32>
    %165 = vector.broadcast %146 : vector<1x128xf32> to vector<16x128xf32>
    %166 = arith.mulf %164, %165 : vector<16x128xf32>
    %167 = vector.broadcast %148 : vector<1x128xf32> to vector<16x128xf32>
    %168 = arith.addf %166, %167 : vector<16x128xf32>
    %169 = arith.truncf %168 : vector<16x128xf32> to vector<16x128xbf16>
    %c1 = arith.constant 1 : index
    %c0_80 = arith.constant 0 : index
    %c0_81 = arith.constant 0 : index
    %170 = vector.load %arg7[%c1, %c0_80, %c0_81] : memref<2x128x768xbf16, #tpu.memory_space<vmem>>, vector<1x128x768xbf16>
    %171 = vector.shape_cast %170 : vector<1x128x768xbf16> to vector<128x768xbf16>
    %cst_82 = arith.constant dense<0.000000e+00> : vector<16x768xf32>
    %172 = tpu.matmul %169, %171, %cst_82 {dimension_numbers = #tpu.dot_dimension_numbers<[1], [0], [0], [1], [0, 0, 1, 1], [], []>} : vector<16x128xbf16>, vector<128x768xbf16>, vector<16x768xf32> -> vector<16x768xf32>
    %c1_83 = arith.constant 1 : index
    %c0_84 = arith.constant 0 : index
    %c0_85 = arith.constant 0 : index
    %173 = vector.load %arg8[%c1_83, %c0_84, %c0_85] : memref<2x1x768xf32, #tpu.memory_space<vmem>>, vector<1x1x768xf32>
    %174 = vector.shape_cast %173 : vector<1x1x768xf32> to vector<1x768xf32>
    %175 = vector.broadcast %174 : vector<1x768xf32> to vector<16x768xf32>
    %176 = arith.addf %172, %175 : vector<16x768xf32>
    %177 = arith.truncf %176 : vector<16x768xf32> to vector<16x768xbf16>
    %178 = vector.extract_strided_slice %177 {offsets = [0, 0], sizes = [16, 128], strides = [1, 1]} : vector<16x768xbf16> to vector<16x128xbf16>
    %179 = vector.extract_strided_slice %177 {offsets = [0, 256], sizes = [16, 128], strides = [1, 1]} : vector<16x768xbf16> to vector<16x128xbf16>
    %180 = vector.extract_strided_slice %177 {offsets = [0, 512], sizes = [16, 128], strides = [1, 1]} : vector<16x768xbf16> to vector<16x128xbf16>
    %cst_86 = arith.constant dense<0.000000e+00> : vector<16x16xf32>
    %181 = tpu.matmul %178, %179, %cst_86 {dimension_numbers = #tpu.dot_dimension_numbers<[1], [1], [0], [0], [0, 0, 1, 0], [], []>} : vector<16x128xbf16>, vector<16x128xbf16>, vector<16x16xf32> -> vector<16x16xf32>
    %cst_87 = arith.constant 1.250000e-01 : f32
    %182 = vector.broadcast %cst_87 : f32 to vector<16x16xf32>
    %183 = arith.mulf %181, %182 : vector<16x16xf32>
    %184 = arith.addf %183, %33 : vector<16x16xf32>
    %cst_88 = arith.constant dense<0xFF800000> : vector<16xf32>
    %185 = vector.multi_reduction <maximumf>, %184, %cst_88 [1] : vector<16x16xf32> to vector<16xf32>
    %186 = vector.shape_cast %185 : vector<16xf32> to vector<16x1xf32>
    %187 = vector.broadcast %186 : vector<16x1xf32> to vector<16x16xf32>
    %188 = arith.subf %184, %187 : vector<16x16xf32>
    %189 = math.exp %188 : vector<16x16xf32>
    %cst_89 = arith.constant dense<0.000000e+00> : vector<16xf32>
    %190 = vector.multi_reduction <add>, %189, %cst_89 [1] : vector<16x16xf32> to vector<16xf32>
    %191 = vector.shape_cast %190 : vector<16xf32> to vector<16x1xf32>
    %192 = tpu.reciprocal %191 {approx = true} : vector<16x1xf32> -> vector<16x1xf32>
    %193 = vector.broadcast %192 : vector<16x1xf32> to vector<16x16xf32>
    %194 = arith.mulf %189, %193 : vector<16x16xf32>
    %195 = arith.truncf %194 : vector<16x16xf32> to vector<16x16xbf16>
    %cst_90 = arith.constant dense<0.000000e+00> : vector<16x128xf32>
    %196 = tpu.matmul %195, %180, %cst_90 {dimension_numbers = #tpu.dot_dimension_numbers<[1], [0], [0], [1], [0, 0, 1, 1], [], []>} : vector<16x16xbf16>, vector<16x128xbf16>, vector<16x128xf32> -> vector<16x128xf32>
    %197 = vector.extract_strided_slice %177 {offsets = [0, 128], sizes = [16, 128], strides = [1, 1]} : vector<16x768xbf16> to vector<16x128xbf16>
    %198 = vector.extract_strided_slice %177 {offsets = [0, 384], sizes = [16, 128], strides = [1, 1]} : vector<16x768xbf16> to vector<16x128xbf16>
    %199 = vector.extract_strided_slice %177 {offsets = [0, 640], sizes = [16, 128], strides = [1, 1]} : vector<16x768xbf16> to vector<16x128xbf16>
    %cst_91 = arith.constant dense<0.000000e+00> : vector<16x16xf32>
    %200 = tpu.matmul %197, %198, %cst_91 {dimension_numbers = #tpu.dot_dimension_numbers<[1], [1], [0], [0], [0, 0, 1, 0], [], []>} : vector<16x128xbf16>, vector<16x128xbf16>, vector<16x16xf32> -> vector<16x16xf32>
    %cst_92 = arith.constant 1.250000e-01 : f32
    %201 = vector.broadcast %cst_92 : f32 to vector<16x16xf32>
    %202 = arith.mulf %200, %201 : vector<16x16xf32>
    %203 = arith.addf %202, %33 : vector<16x16xf32>
    %cst_93 = arith.constant dense<0xFF800000> : vector<16xf32>
    %204 = vector.multi_reduction <maximumf>, %203, %cst_93 [1] : vector<16x16xf32> to vector<16xf32>
    %205 = vector.shape_cast %204 : vector<16xf32> to vector<16x1xf32>
    %206 = vector.broadcast %205 : vector<16x1xf32> to vector<16x16xf32>
    %207 = arith.subf %203, %206 : vector<16x16xf32>
    %208 = math.exp %207 : vector<16x16xf32>
    %cst_94 = arith.constant dense<0.000000e+00> : vector<16xf32>
    %209 = vector.multi_reduction <add>, %208, %cst_94 [1] : vector<16x16xf32> to vector<16xf32>
    %210 = vector.shape_cast %209 : vector<16xf32> to vector<16x1xf32>
    %211 = tpu.reciprocal %210 {approx = true} : vector<16x1xf32> -> vector<16x1xf32>
    %212 = vector.broadcast %211 : vector<16x1xf32> to vector<16x16xf32>
    %213 = arith.mulf %208, %212 : vector<16x16xf32>
    %214 = arith.truncf %213 : vector<16x16xf32> to vector<16x16xbf16>
    %cst_95 = arith.constant dense<0.000000e+00> : vector<16x128xf32>
    %215 = tpu.matmul %214, %199, %cst_95 {dimension_numbers = #tpu.dot_dimension_numbers<[1], [0], [0], [1], [0, 0, 1, 1], [], []>} : vector<16x16xbf16>, vector<16x128xbf16>, vector<16x128xf32> -> vector<16x128xf32>
    %216 = arith.addf %196, %215 : vector<16x128xf32>
    %217 = arith.truncf %216 : vector<16x128xf32> to vector<16x128xbf16>
    %c1_96 = arith.constant 1 : index
    %c0_97 = arith.constant 0 : index
    %c0_98 = arith.constant 0 : index
    %218 = vector.load %arg9[%c1_96, %c0_97, %c0_98] : memref<2x128x128xbf16, #tpu.memory_space<vmem>>, vector<1x128x128xbf16>
    %219 = vector.shape_cast %218 : vector<1x128x128xbf16> to vector<128x128xbf16>
    %cst_99 = arith.constant dense<0.000000e+00> : vector<16x128xf32>
    %220 = tpu.matmul %217, %219, %cst_99 {dimension_numbers = #tpu.dot_dimension_numbers<[1], [0], [0], [1], [0, 0, 1, 1], [], []>} : vector<16x128xbf16>, vector<128x128xbf16>, vector<16x128xf32> -> vector<16x128xf32>
    %c1_100 = arith.constant 1 : index
    %c0_101 = arith.constant 0 : index
    %c0_102 = arith.constant 0 : index
    %221 = vector.load %arg10[%c1_100, %c0_101, %c0_102] : memref<2x1x128xf32, #tpu.memory_space<vmem>>, vector<1x1x128xf32>
    %222 = vector.shape_cast %221 : vector<1x1x128xf32> to vector<1x128xf32>
    %223 = vector.broadcast %222 : vector<1x128xf32> to vector<16x128xf32>
    %224 = arith.addf %220, %223 : vector<16x128xf32>
    %225 = arith.addf %224, %168 : vector<16x128xf32>
    %c1_103 = arith.constant 1 : index
    %c0_104 = arith.constant 0 : index
    %c0_105 = arith.constant 0 : index
    %226 = vector.load %arg11[%c1_103, %c0_104, %c0_105] : memref<2x1x128xf32, #tpu.memory_space<vmem>>, vector<1x1x128xf32>
    %227 = vector.shape_cast %226 : vector<1x1x128xf32> to vector<1x128xf32>
    %c1_106 = arith.constant 1 : index
    %c0_107 = arith.constant 0 : index
    %c0_108 = arith.constant 0 : index
    %228 = vector.load %arg12[%c1_106, %c0_107, %c0_108] : memref<2x1x128xf32, #tpu.memory_space<vmem>>, vector<1x1x128xf32>
    %229 = vector.shape_cast %228 : vector<1x1x128xf32> to vector<1x128xf32>
    %cst_109 = arith.constant dense<0.000000e+00> : vector<16xf32>
    %230 = vector.multi_reduction <add>, %225, %cst_109 [1] : vector<16x128xf32> to vector<16xf32>
    %231 = vector.shape_cast %230 : vector<16xf32> to vector<16x1xf32>
    %cst_110 = arith.constant 1.280000e+02 : f32
    %232 = vector.broadcast %cst_110 : f32 to vector<16x1xf32>
    %233 = arith.divf %231, %232 : vector<16x1xf32>
    %234 = vector.broadcast %233 : vector<16x1xf32> to vector<16x128xf32>
    %235 = arith.subf %225, %234 : vector<16x128xf32>
    %236 = arith.mulf %235, %235 : vector<16x128xf32>
    %cst_111 = arith.constant dense<0.000000e+00> : vector<16xf32>
    %237 = vector.multi_reduction <add>, %236, %cst_111 [1] : vector<16x128xf32> to vector<16xf32>
    %238 = vector.shape_cast %237 : vector<16xf32> to vector<16x1xf32>
    %cst_112 = arith.constant 1.280000e+02 : f32
    %239 = vector.broadcast %cst_112 : f32 to vector<16x1xf32>
    %240 = arith.divf %238, %239 : vector<16x1xf32>
    %cst_113 = arith.constant 9.99999996E-13 : f32
    %241 = vector.broadcast %cst_113 : f32 to vector<16x1xf32>
    %242 = arith.addf %240, %241 : vector<16x1xf32>
    %243 = math.rsqrt %242 : vector<16x1xf32>
    %244 = vector.broadcast %243 : vector<16x1xf32> to vector<16x128xf32>
    %245 = arith.mulf %235, %244 : vector<16x128xf32>
    %246 = vector.broadcast %227 : vector<1x128xf32> to vector<16x128xf32>
    %247 = arith.mulf %245, %246 : vector<16x128xf32>
    %248 = vector.broadcast %229 : vector<1x128xf32> to vector<16x128xf32>
    %249 = arith.addf %247, %248 : vector<16x128xf32>
    %250 = arith.truncf %249 : vector<16x128xf32> to vector<16x128xbf16>
    %c1_114 = arith.constant 1 : index
    %c0_115 = arith.constant 0 : index
    %c0_116 = arith.constant 0 : index
    %251 = vector.load %arg13[%c1_114, %c0_115, %c0_116] : memref<2x128x256xbf16, #tpu.memory_space<vmem>>, vector<1x128x256xbf16>
    %252 = vector.shape_cast %251 : vector<1x128x256xbf16> to vector<128x256xbf16>
    %cst_117 = arith.constant dense<0.000000e+00> : vector<16x256xf32>
    %253 = tpu.matmul %250, %252, %cst_117 {dimension_numbers = #tpu.dot_dimension_numbers<[1], [0], [0], [1], [0, 0, 1, 1], [], []>} : vector<16x128xbf16>, vector<128x256xbf16>, vector<16x256xf32> -> vector<16x256xf32>
    %c1_118 = arith.constant 1 : index
    %c0_119 = arith.constant 0 : index
    %c0_120 = arith.constant 0 : index
    %254 = vector.load %arg14[%c1_118, %c0_119, %c0_120] : memref<2x1x256xf32, #tpu.memory_space<vmem>>, vector<1x1x256xf32>
    %255 = vector.shape_cast %254 : vector<1x1x256xf32> to vector<1x256xf32>
    %256 = vector.broadcast %255 : vector<1x256xf32> to vector<16x256xf32>
    %257 = arith.addf %253, %256 : vector<16x256xf32>
    %258 = arith.mulf %257, %257 : vector<16x256xf32>
    %259 = arith.mulf %257, %258 : vector<16x256xf32>
    %cst_121 = arith.constant 4.471500e-02 : f32
    %260 = vector.broadcast %cst_121 : f32 to vector<16x256xf32>
    %261 = arith.mulf %260, %259 : vector<16x256xf32>
    %262 = arith.addf %257, %261 : vector<16x256xf32>
    %cst_122 = arith.constant 0.797884583 : f32
    %263 = vector.broadcast %cst_122 : f32 to vector<16x256xf32>
    %264 = arith.mulf %263, %262 : vector<16x256xf32>
    %265 = math.tanh %264 : vector<16x256xf32>
    %cst_123 = arith.constant 1.000000e+00 : f32
    %266 = vector.broadcast %cst_123 : f32 to vector<16x256xf32>
    %267 = arith.addf %266, %265 : vector<16x256xf32>
    %cst_124 = arith.constant 5.000000e-01 : f32
    %268 = vector.broadcast %cst_124 : f32 to vector<16x256xf32>
    %269 = arith.mulf %268, %267 : vector<16x256xf32>
    %270 = arith.mulf %257, %269 : vector<16x256xf32>
    %271 = arith.truncf %270 : vector<16x256xf32> to vector<16x256xbf16>
    %c1_125 = arith.constant 1 : index
    %c0_126 = arith.constant 0 : index
    %c0_127 = arith.constant 0 : index
    %272 = vector.load %arg15[%c1_125, %c0_126, %c0_127] : memref<2x256x128xbf16, #tpu.memory_space<vmem>>, vector<1x256x128xbf16>
    %273 = vector.shape_cast %272 : vector<1x256x128xbf16> to vector<256x128xbf16>
    %cst_128 = arith.constant dense<0.000000e+00> : vector<16x128xf32>
    %274 = tpu.matmul %271, %273, %cst_128 {dimension_numbers = #tpu.dot_dimension_numbers<[1], [0], [0], [1], [0, 0, 1, 1], [], []>} : vector<16x256xbf16>, vector<256x128xbf16>, vector<16x128xf32> -> vector<16x128xf32>
    %c1_129 = arith.constant 1 : index
    %c0_130 = arith.constant 0 : index
    %c0_131 = arith.constant 0 : index
    %275 = vector.load %arg16[%c1_129, %c0_130, %c0_131] : memref<2x1x128xf32, #tpu.memory_space<vmem>>, vector<1x1x128xf32>
    %276 = vector.shape_cast %275 : vector<1x1x128xf32> to vector<1x128xf32>
    %277 = vector.broadcast %276 : vector<1x128xf32> to vector<16x128xf32>
    %278 = arith.addf %274, %277 : vector<16x128xf32>
    %279 = arith.addf %278, %249 : vector<16x128xf32>
    %c1_132 = arith.constant 1 : index
    %c0_133 = arith.constant 0 : index
    %c0_134 = arith.constant 0 : index
    %280 = vector.load %arg17[%c1_132, %c0_133, %c0_134] : memref<2x1x128xf32, #tpu.memory_space<vmem>>, vector<1x1x128xf32>
    %281 = vector.shape_cast %280 : vector<1x1x128xf32> to vector<1x128xf32>
    %c1_135 = arith.constant 1 : index
    %c0_136 = arith.constant 0 : index
    %c0_137 = arith.constant 0 : index
    %282 = vector.load %arg18[%c1_135, %c0_136, %c0_137] : memref<2x1x128xf32, #tpu.memory_space<vmem>>, vector<1x1x128xf32>
    %283 = vector.shape_cast %282 : vector<1x1x128xf32> to vector<1x128xf32>
    %cst_138 = arith.constant dense<0.000000e+00> : vector<16xf32>
    %284 = vector.multi_reduction <add>, %279, %cst_138 [1] : vector<16x128xf32> to vector<16xf32>
    %285 = vector.shape_cast %284 : vector<16xf32> to vector<16x1xf32>
    %cst_139 = arith.constant 1.280000e+02 : f32
    %286 = vector.broadcast %cst_139 : f32 to vector<16x1xf32>
    %287 = arith.divf %285, %286 : vector<16x1xf32>
    %288 = vector.broadcast %287 : vector<16x1xf32> to vector<16x128xf32>
    %289 = arith.subf %279, %288 : vector<16x128xf32>
    %290 = arith.mulf %289, %289 : vector<16x128xf32>
    %cst_140 = arith.constant dense<0.000000e+00> : vector<16xf32>
    %291 = vector.multi_reduction <add>, %290, %cst_140 [1] : vector<16x128xf32> to vector<16xf32>
    %292 = vector.shape_cast %291 : vector<16xf32> to vector<16x1xf32>
    %cst_141 = arith.constant 1.280000e+02 : f32
    %293 = vector.broadcast %cst_141 : f32 to vector<16x1xf32>
    %294 = arith.divf %292, %293 : vector<16x1xf32>
    %cst_142 = arith.constant 9.99999996E-13 : f32
    %295 = vector.broadcast %cst_142 : f32 to vector<16x1xf32>
    %296 = arith.addf %294, %295 : vector<16x1xf32>
    %297 = math.rsqrt %296 : vector<16x1xf32>
    %298 = vector.broadcast %297 : vector<16x1xf32> to vector<16x128xf32>
    %299 = arith.mulf %289, %298 : vector<16x128xf32>
    %300 = vector.broadcast %281 : vector<1x128xf32> to vector<16x128xf32>
    %301 = arith.mulf %299, %300 : vector<16x128xf32>
    %302 = vector.broadcast %283 : vector<1x128xf32> to vector<16x128xf32>
    %303 = arith.addf %301, %302 : vector<16x128xf32>
    %c0_143 = arith.constant 0 : index
    %c0_144 = arith.constant 0 : index
    %304 = vector.load %arg31[%c0_143, %c0_144] : memref<16x128xf32, #tpu.memory_space<vmem>>, vector<16x128xf32>
    tpu.vector_store %arg31[%c0_143, %c0_144], %303 {strides = array<i32>} : memref<16x128xf32, #tpu.memory_space<vmem>>, vector<16x128xf32>,
    %c0_145 = arith.constant 0 : index
    %c0_146 = arith.constant 0 : index
    %305 = tpu.strided_load %arg31[%c0_145, %c0_146] {strides = array<i32: 8, 1>} : memref<16x128xf32, #tpu.memory_space<vmem>>, vector<2x128xf32>
    %306 = arith.truncf %305 : vector<2x128xf32> to vector<2x128xbf16>
    %c0_147 = arith.constant 0 : index
    %c0_148 = arith.constant 0 : index
    %307 = vector.load %arg19[%c0_147, %c0_148] : memref<128x128xbf16, #tpu.memory_space<vmem>>, vector<128x128xbf16>
    %cst_149 = arith.constant dense<0.000000e+00> : vector<2x128xf32>
    %308 = tpu.matmul %306, %307, %cst_149 {dimension_numbers = #tpu.dot_dimension_numbers<[1], [0], [0], [1], [0, 0, 1, 1], [], []>} : vector<2x128xbf16>, vector<128x128xbf16>, vector<2x128xf32> -> vector<2x128xf32>
    %c0_150 = arith.constant 0 : index
    %c0_151 = arith.constant 0 : index
    %309 = vector.load %arg20[%c0_150, %c0_151] : memref<1x128xf32, #tpu.memory_space<vmem>>, vector<1x128xf32>
    %310 = vector.broadcast %309 : vector<1x128xf32> to vector<2x128xf32>
    %311 = arith.addf %308, %310 : vector<2x128xf32>
    %312 = math.tanh %311 : vector<2x128xf32>
    %c0_152 = arith.constant 0 : index
    %c0_153 = arith.constant 0 : index
    %313 = vector.load %arg3[%c0_152, %c0_153] : memref<16x1xf32, #tpu.memory_space<vmem>>, vector<16x1xf32>
    %c0_154 = arith.constant 0 : index
    %c0_155 = arith.constant 0 : index
    %314 = vector.load %arg21[%c0_154, %c0_155] : memref<2x128xf32, #tpu.memory_space<vmem>>, vector<1x128xf32>
    %315 = vector.broadcast %314 : vector<1x128xf32> to vector<16x128xf32>
    %316 = arith.mulf %303, %315 : vector<16x128xf32>
    %cst_156 = arith.constant dense<0.000000e+00> : vector<16xf32>
    %317 = vector.multi_reduction <add>, %316, %cst_156 [1] : vector<16x128xf32> to vector<16xf32>
    %318 = vector.shape_cast %317 : vector<16xf32> to vector<16x1xf32>
    %c0_157 = arith.constant 0 : index
    %c0_158 = arith.constant 0 : index
    %319 = vector.load %arg22[%c0_157, %c0_158] : memref<2x1xf32, #tpu.memory_space<vmem>>, vector<1x1xf32>
    %320 = vector.broadcast %319 : vector<1x1xf32> to vector<16x1xf32>
    %321 = arith.addf %318, %320 : vector<16x1xf32>
    %322 = arith.addf %321, %313 : vector<16x1xf32>
    %c1_159 = arith.constant 1 : index
    %c0_160 = arith.constant 0 : index
    %323 = vector.load %arg21[%c1_159, %c0_160] : memref<2x128xf32, #tpu.memory_space<vmem>>, vector<1x128xf32>
    %324 = vector.broadcast %323 : vector<1x128xf32> to vector<16x128xf32>
    %325 = arith.mulf %303, %324 : vector<16x128xf32>
    %cst_161 = arith.constant dense<0.000000e+00> : vector<16xf32>
    %326 = vector.multi_reduction <add>, %325, %cst_161 [1] : vector<16x128xf32> to vector<16xf32>
    %327 = vector.shape_cast %326 : vector<16xf32> to vector<16x1xf32>
    %c1_162 = arith.constant 1 : index
    %c0_163 = arith.constant 0 : index
    %328 = vector.load %arg22[%c1_162, %c0_163] : memref<2x1xf32, #tpu.memory_space<vmem>>, vector<1x1xf32>
    %329 = vector.broadcast %328 : vector<1x1xf32> to vector<16x1xf32>
    %330 = arith.addf %327, %329 : vector<16x1xf32>
    %331 = arith.addf %330, %313 : vector<16x1xf32>
    %332 = vector.extract_strided_slice %303 {offsets = [0, 0], sizes = [8, 128], strides = [1, 1]} : vector<16x128xf32> to vector<8x128xf32>
    %333 = vector.extract_strided_slice %322 {offsets = [0, 0], sizes = [8, 1], strides = [1, 1]} : vector<16x1xf32> to vector<8x1xf32>
    %cst_164 = arith.constant dense<0xFF800000> : vector<1xf32>
    %334 = vector.multi_reduction <maximumf>, %333, %cst_164 [0] : vector<8x1xf32> to vector<1xf32>
    %335 = vector.shape_cast %334 : vector<1xf32> to vector<1x1xf32>
    %336 = vector.broadcast %335 : vector<1x1xf32> to vector<8x1xf32>
    %337 = arith.subf %333, %336 : vector<8x1xf32>
    %338 = math.exp %337 : vector<8x1xf32>
    %cst_165 = arith.constant dense<0.000000e+00> : vector<1xf32>
    %339 = vector.multi_reduction <add>, %338, %cst_165 [0] : vector<8x1xf32> to vector<1xf32>
    %340 = vector.shape_cast %339 : vector<1xf32> to vector<1x1xf32>
    %341 = tpu.reciprocal %340 {approx = true} : vector<1x1xf32> -> vector<1x1xf32>
    %342 = vector.broadcast %341 : vector<1x1xf32> to vector<8x1xf32>
    %343 = arith.mulf %338, %342 : vector<8x1xf32>
    %344 = vector.broadcast %343 : vector<8x1xf32> to vector<8x128xf32>
    %345 = arith.mulf %332, %344 : vector<8x128xf32>
    %cst_166 = arith.constant dense<0.000000e+00> : vector<128xf32>
    %346 = vector.multi_reduction <add>, %345, %cst_166 [0] : vector<8x128xf32> to vector<128xf32>
    %347 = vector.shape_cast %346 : vector<128xf32> to vector<1x128xf32>
    %cst_167 = arith.constant 1.250000e-01 : f32
    %348 = vector.broadcast %cst_167 : f32 to vector<1x128xf32>
    %349 = arith.mulf %347, %348 : vector<1x128xf32>
    %350 = vector.extract_strided_slice %331 {offsets = [0, 0], sizes = [8, 1], strides = [1, 1]} : vector<16x1xf32> to vector<8x1xf32>
    %cst_168 = arith.constant dense<0xFF800000> : vector<1xf32>
    %351 = vector.multi_reduction <maximumf>, %350, %cst_168 [0] : vector<8x1xf32> to vector<1xf32>
    %352 = vector.shape_cast %351 : vector<1xf32> to vector<1x1xf32>
    %353 = vector.broadcast %352 : vector<1x1xf32> to vector<8x1xf32>
    %354 = arith.subf %350, %353 : vector<8x1xf32>
    %355 = math.exp %354 : vector<8x1xf32>
    %cst_169 = arith.constant dense<0.000000e+00> : vector<1xf32>
    %356 = vector.multi_reduction <add>, %355, %cst_169 [0] : vector<8x1xf32> to vector<1xf32>
    %357 = vector.shape_cast %356 : vector<1xf32> to vector<1x1xf32>
    %358 = tpu.reciprocal %357 {approx = true} : vector<1x1xf32> -> vector<1x1xf32>
    %359 = vector.broadcast %358 : vector<1x1xf32> to vector<8x1xf32>
    %360 = arith.mulf %355, %359 : vector<8x1xf32>
    %361 = vector.broadcast %360 : vector<8x1xf32> to vector<8x128xf32>
    %362 = arith.mulf %332, %361 : vector<8x128xf32>
    %cst_170 = arith.constant dense<0.000000e+00> : vector<128xf32>
    %363 = vector.multi_reduction <add>, %362, %cst_170 [0] : vector<8x128xf32> to vector<128xf32>
    %364 = vector.shape_cast %363 : vector<128xf32> to vector<1x128xf32>
    %cst_171 = arith.constant 1.250000e-01 : f32
    %365 = vector.broadcast %cst_171 : f32 to vector<1x128xf32>
    %366 = arith.mulf %364, %365 : vector<1x128xf32>
    %367 = vector.extract_strided_slice %303 {offsets = [8, 0], sizes = [8, 128], strides = [1, 1]} : vector<16x128xf32> to vector<8x128xf32>
    %368 = vector.extract_strided_slice %322 {offsets = [8, 0], sizes = [8, 1], strides = [1, 1]} : vector<16x1xf32> to vector<8x1xf32>
    %cst_172 = arith.constant dense<0xFF800000> : vector<1xf32>
    %369 = vector.multi_reduction <maximumf>, %368, %cst_172 [0] : vector<8x1xf32> to vector<1xf32>
    %370 = vector.shape_cast %369 : vector<1xf32> to vector<1x1xf32>
    %371 = vector.broadcast %370 : vector<1x1xf32> to vector<8x1xf32>
    %372 = arith.subf %368, %371 : vector<8x1xf32>
    %373 = math.exp %372 : vector<8x1xf32>
    %cst_173 = arith.constant dense<0.000000e+00> : vector<1xf32>
    %374 = vector.multi_reduction <add>, %373, %cst_173 [0] : vector<8x1xf32> to vector<1xf32>
    %375 = vector.shape_cast %374 : vector<1xf32> to vector<1x1xf32>
    %376 = tpu.reciprocal %375 {approx = true} : vector<1x1xf32> -> vector<1x1xf32>
    %377 = vector.broadcast %376 : vector<1x1xf32> to vector<8x1xf32>
    %378 = arith.mulf %373, %377 : vector<8x1xf32>
    %379 = vector.broadcast %378 : vector<8x1xf32> to vector<8x128xf32>
    %380 = arith.mulf %367, %379 : vector<8x128xf32>
    %cst_174 = arith.constant dense<0.000000e+00> : vector<128xf32>
    %381 = vector.multi_reduction <add>, %380, %cst_174 [0] : vector<8x128xf32> to vector<128xf32>
    %382 = vector.shape_cast %381 : vector<128xf32> to vector<1x128xf32>
    %cst_175 = arith.constant 1.250000e-01 : f32
    %383 = vector.broadcast %cst_175 : f32 to vector<1x128xf32>
    %384 = arith.mulf %382, %383 : vector<1x128xf32>
    %385 = vector.extract_strided_slice %331 {offsets = [8, 0], sizes = [8, 1], strides = [1, 1]} : vector<16x1xf32> to vector<8x1xf32>
    %cst_176 = arith.constant dense<0xFF800000> : vector<1xf32>
    %386 = vector.multi_reduction <maximumf>, %385, %cst_176 [0] : vector<8x1xf32> to vector<1xf32>
    %387 = vector.shape_cast %386 : vector<1xf32> to vector<1x1xf32>
    %388 = vector.broadcast %387 : vector<1x1xf32> to vector<8x1xf32>
    %389 = arith.subf %385, %388 : vector<8x1xf32>
    %390 = math.exp %389 : vector<8x1xf32>
    %cst_177 = arith.constant dense<0.000000e+00> : vector<1xf32>
    %391 = vector.multi_reduction <add>, %390, %cst_177 [0] : vector<8x1xf32> to vector<1xf32>
    %392 = vector.shape_cast %391 : vector<1xf32> to vector<1x1xf32>
    %393 = tpu.reciprocal %392 {approx = true} : vector<1x1xf32> -> vector<1x1xf32>
    %394 = vector.broadcast %393 : vector<1x1xf32> to vector<8x1xf32>
    %395 = arith.mulf %390, %394 : vector<8x1xf32>
    %396 = vector.broadcast %395 : vector<8x1xf32> to vector<8x128xf32>
    %397 = arith.mulf %367, %396 : vector<8x128xf32>
    %cst_178 = arith.constant dense<0.000000e+00> : vector<128xf32>
    %398 = vector.multi_reduction <add>, %397, %cst_178 [0] : vector<8x128xf32> to vector<128xf32>
    %399 = vector.shape_cast %398 : vector<128xf32> to vector<1x128xf32>
    %cst_179 = arith.constant 1.250000e-01 : f32
    %400 = vector.broadcast %cst_179 : f32 to vector<1x128xf32>
    %401 = arith.mulf %399, %400 : vector<1x128xf32>
    %402 = tpu.concatenate %349, %384 in 0 : vector<1x128xf32>, vector<1x128xf32> -> vector<2x128xf32>
    %403 = tpu.concatenate %366, %401 in 0 : vector<1x128xf32>, vector<1x128xf32> -> vector<2x128xf32>
    %c0_180 = arith.constant 0 : index
    %c0_181 = arith.constant 0 : index
    %404 = vector.load %arg23[%c0_180, %c0_181] : memref<2x128xf32, #tpu.memory_space<vmem>>, vector<1x128xf32>
    %405 = vector.broadcast %404 : vector<1x128xf32> to vector<2x128xf32>
    %406 = arith.mulf %312, %405 : vector<2x128xf32>
    %c0_182 = arith.constant 0 : index
    %c0_183 = arith.constant 0 : index
    %407 = vector.load %arg24[%c0_182, %c0_183] : memref<2x128xf32, #tpu.memory_space<vmem>>, vector<1x128xf32>
    %408 = vector.broadcast %407 : vector<1x128xf32> to vector<2x128xf32>
    %409 = arith.mulf %402, %408 : vector<2x128xf32>
    %410 = arith.addf %406, %409 : vector<2x128xf32>
    %cst_184 = arith.constant dense<0.000000e+00> : vector<2xf32>
    %411 = vector.multi_reduction <add>, %410, %cst_184 [1] : vector<2x128xf32> to vector<2xf32>
    %412 = vector.shape_cast %411 : vector<2xf32> to vector<2x1xf32>
    %c0_185 = arith.constant 0 : index
    %c0_186 = arith.constant 0 : index
    %413 = vector.load %arg25[%c0_185, %c0_186] : memref<2x1xf32, #tpu.memory_space<vmem>>, vector<1x1xf32>
    %414 = vector.broadcast %413 : vector<1x1xf32> to vector<2x1xf32>
    %415 = arith.addf %412, %414 : vector<2x1xf32>
    %c1_187 = arith.constant 1 : index
    %c0_188 = arith.constant 0 : index
    %416 = vector.load %arg23[%c1_187, %c0_188] : memref<2x128xf32, #tpu.memory_space<vmem>>, vector<1x128xf32>
    %417 = vector.broadcast %416 : vector<1x128xf32> to vector<2x128xf32>
    %418 = arith.mulf %312, %417 : vector<2x128xf32>
    %c1_189 = arith.constant 1 : index
    %c0_190 = arith.constant 0 : index
    %419 = vector.load %arg24[%c1_189, %c0_190] : memref<2x128xf32, #tpu.memory_space<vmem>>, vector<1x128xf32>
    %420 = vector.broadcast %419 : vector<1x128xf32> to vector<2x128xf32>
    %421 = arith.mulf %403, %420 : vector<2x128xf32>
    %422 = arith.addf %418, %421 : vector<2x128xf32>
    %cst_191 = arith.constant dense<0.000000e+00> : vector<2xf32>
    %423 = vector.multi_reduction <add>, %422, %cst_191 [1] : vector<2x128xf32> to vector<2xf32>
    %424 = vector.shape_cast %423 : vector<2xf32> to vector<2x1xf32>
    %c1_192 = arith.constant 1 : index
    %c0_193 = arith.constant 0 : index
    %425 = vector.load %arg25[%c1_192, %c0_193] : memref<2x1xf32, #tpu.memory_space<vmem>>, vector<1x1xf32>
    %426 = vector.broadcast %425 : vector<1x1xf32> to vector<2x1xf32>
    %427 = arith.addf %424, %426 : vector<2x1xf32>
    %cst_194 = arith.constant 0.000000e+00 : f32
    %428 = vector.broadcast %cst_194 : f32 to vector<2x1xf32>
    %429 = arith.subf %428, %415 : vector<2x1xf32>
    %430 = math.exp %429 : vector<2x1xf32>
    %cst_195 = arith.constant 1.000000e+00 : f32
    %431 = vector.broadcast %cst_195 : f32 to vector<2x1xf32>
    %432 = arith.addf %431, %430 : vector<2x1xf32>
    %cst_196 = arith.constant 1.000000e+00 : f32
    %433 = vector.broadcast %cst_196 : f32 to vector<2x1xf32>
    %434 = arith.divf %433, %432 : vector<2x1xf32>
    %cst_197 = arith.constant 0.000000e+00 : f32
    %435 = vector.broadcast %cst_197 : f32 to vector<2x1xf32>
    %436 = arith.subf %435, %427 : vector<2x1xf32>
    %437 = math.exp %436 : vector<2x1xf32>
    %cst_198 = arith.constant 1.000000e+00 : f32
    %438 = vector.broadcast %cst_198 : f32 to vector<2x1xf32>
    %439 = arith.addf %438, %437 : vector<2x1xf32>
    %cst_199 = arith.constant 1.000000e+00 : f32
    %440 = vector.broadcast %cst_199 : f32 to vector<2x1xf32>
    %441 = arith.divf %440, %439 : vector<2x1xf32>
    %442 = vector.broadcast %434 : vector<2x1xf32> to vector<2x128xf32>
    %443 = arith.mulf %442, %402 : vector<2x128xf32>
    %cst_200 = arith.constant 1.000000e+00 : f32
    %444 = vector.broadcast %cst_200 : f32 to vector<2x1xf32>
    %445 = arith.subf %444, %434 : vector<2x1xf32>
    %446 = vector.broadcast %445 : vector<2x1xf32> to vector<2x128xf32>
    %447 = arith.mulf %446, %312 : vector<2x128xf32>
    %448 = arith.addf %443, %447 : vector<2x128xf32>
    %449 = vector.broadcast %441 : vector<2x1xf32> to vector<2x128xf32>
    %450 = arith.mulf %449, %403 : vector<2x128xf32>
    %cst_201 = arith.constant 1.000000e+00 : f32
    %451 = vector.broadcast %cst_201 : f32 to vector<2x1xf32>
    %452 = arith.subf %451, %441 : vector<2x1xf32>
    %453 = vector.broadcast %452 : vector<2x1xf32> to vector<2x128xf32>
    %454 = arith.mulf %453, %312 : vector<2x128xf32>
    %455 = arith.addf %450, %454 : vector<2x128xf32>
    %456 = tpu.concatenate %448, %455, %448, %455 in 0 : vector<2x128xf32>, vector<2x128xf32>, vector<2x128xf32>, vector<2x128xf32> -> vector<8x128xf32>
    %457 = arith.truncf %456 : vector<8x128xf32> to vector<8x128xbf16>
    %c0_202 = arith.constant 0 : index
    %c0_203 = arith.constant 0 : index
    %458 = vector.load %arg26[%c0_202, %c0_203] : memref<128x128xbf16, #tpu.memory_space<vmem>>, vector<128x128xbf16>
    %cst_204 = arith.constant dense<0.000000e+00> : vector<8x128xf32>
    %459 = tpu.matmul %457, %458, %cst_204 {dimension_numbers = #tpu.dot_dimension_numbers<[1], [0], [0], [1], [0, 0, 1, 1], [], []>} : vector<8x128xbf16>, vector<128x128xbf16>, vector<8x128xf32> -> vector<8x128xf32>
    %cst_205 = arith.constant 0.000000e+00 : f32
    %460 = vector.broadcast %cst_205 : f32 to vector<8x128xf32>
    %461 = arith.cmpf ogt, %459, %460 : vector<8x128xf32>
    %cst_206 = arith.constant 0.000000e+00 : f32
    %462 = vector.broadcast %cst_206 : f32 to vector<8x128xf32>
    %463 = arith.minimumf %459, %462 : vector<8x128xf32>
    %464 = math.exp %463 : vector<8x128xf32>
    %cst_207 = arith.constant 1.000000e+00 : f32
    %465 = vector.broadcast %cst_207 : f32 to vector<8x128xf32>
    %466 = arith.subf %464, %465 : vector<8x128xf32>
    %467 = arith.select %461, %459, %466 : vector<8x128xi1>, vector<8x128xf32>
    %468 = vector.extract_strided_slice %467 {offsets = [0, 0], sizes = [2, 64], strides = [1, 1]} : vector<8x128xf32> to vector<2x64xf32>
    %c0_208 = arith.constant 0 : index
    %c0_209 = arith.constant 0 : index
    %469 = vector.load %arg27[%c0_208, %c0_209] : memref<1x128xf32, #tpu.memory_space<vmem>>, vector<1x64xf32>
    %c0_210 = arith.constant 0 : index
    %c0_211 = arith.constant 0 : index
    %470 = vector.load %arg28[%c0_210, %c0_211] : memref<1x128xf32, #tpu.memory_space<vmem>>, vector<1x64xf32>
    %cst_212 = arith.constant dense<0.000000e+00> : vector<2xf32>
    %471 = vector.multi_reduction <add>, %468, %cst_212 [1] : vector<2x64xf32> to vector<2xf32>
    %472 = vector.shape_cast %471 : vector<2xf32> to vector<2x1xf32>
    %cst_213 = arith.constant 6.400000e+01 : f32
    %473 = vector.broadcast %cst_213 : f32 to vector<2x1xf32>
    %474 = arith.divf %472, %473 : vector<2x1xf32>
    %475 = vector.broadcast %474 : vector<2x1xf32> to vector<2x64xf32>
    %476 = arith.subf %468, %475 : vector<2x64xf32>
    %477 = arith.mulf %476, %476 : vector<2x64xf32>
    %cst_214 = arith.constant dense<0.000000e+00> : vector<2xf32>
    %478 = vector.multi_reduction <add>, %477, %cst_214 [1] : vector<2x64xf32> to vector<2xf32>
    %479 = vector.shape_cast %478 : vector<2xf32> to vector<2x1xf32>
    %cst_215 = arith.constant 6.400000e+01 : f32
    %480 = vector.broadcast %cst_215 : f32 to vector<2x1xf32>
    %481 = arith.divf %479, %480 : vector<2x1xf32>
    %cst_216 = arith.constant 9.99999974E-6 : f32
    %482 = vector.broadcast %cst_216 : f32 to vector<2x1xf32>
    %483 = arith.addf %481, %482 : vector<2x1xf32>
    %484 = math.rsqrt %483 : vector<2x1xf32>
    %485 = vector.broadcast %484 : vector<2x1xf32> to vector<2x64xf32>
    %486 = arith.mulf %476, %485 : vector<2x64xf32>
    %487 = vector.broadcast %469 : vector<1x64xf32> to vector<2x64xf32>
    %488 = arith.mulf %486, %487 : vector<2x64xf32>
    %489 = vector.broadcast %470 : vector<1x64xf32> to vector<2x64xf32>
    %490 = arith.addf %488, %489 : vector<2x64xf32>
    %491 = vector.extract_strided_slice %467 {offsets = [2, 64], sizes = [2, 64], strides = [1, 1]} : vector<8x128xf32> to vector<2x64xf32>
    %c0_217 = arith.constant 0 : index
    %c64 = arith.constant 64 : index
    %492 = vector.load %arg27[%c0_217, %c64] : memref<1x128xf32, #tpu.memory_space<vmem>>, vector<1x64xf32>
    %c0_218 = arith.constant 0 : index
    %c64_219 = arith.constant 64 : index
    %493 = vector.load %arg28[%c0_218, %c64_219] : memref<1x128xf32, #tpu.memory_space<vmem>>, vector<1x64xf32>
    %cst_220 = arith.constant dense<0.000000e+00> : vector<2xf32>
    %494 = vector.multi_reduction <add>, %491, %cst_220 [1] : vector<2x64xf32> to vector<2xf32>
    %495 = vector.shape_cast %494 : vector<2xf32> to vector<2x1xf32>
    %cst_221 = arith.constant 6.400000e+01 : f32
    %496 = vector.broadcast %cst_221 : f32 to vector<2x1xf32>
    %497 = arith.divf %495, %496 : vector<2x1xf32>
    %498 = vector.broadcast %497 : vector<2x1xf32> to vector<2x64xf32>
    %499 = arith.subf %491, %498 : vector<2x64xf32>
    %500 = arith.mulf %499, %499 : vector<2x64xf32>
    %cst_222 = arith.constant dense<0.000000e+00> : vector<2xf32>
    %501 = vector.multi_reduction <add>, %500, %cst_222 [1] : vector<2x64xf32> to vector<2xf32>
    %502 = vector.shape_cast %501 : vector<2xf32> to vector<2x1xf32>
    %cst_223 = arith.constant 6.400000e+01 : f32
    %503 = vector.broadcast %cst_223 : f32 to vector<2x1xf32>
    %504 = arith.divf %502, %503 : vector<2x1xf32>
    %cst_224 = arith.constant 9.99999974E-6 : f32
    %505 = vector.broadcast %cst_224 : f32 to vector<2x1xf32>
    %506 = arith.addf %504, %505 : vector<2x1xf32>
    %507 = math.rsqrt %506 : vector<2x1xf32>
    %508 = vector.broadcast %507 : vector<2x1xf32> to vector<2x64xf32>
    %509 = arith.mulf %499, %508 : vector<2x64xf32>
    %510 = vector.broadcast %492 : vector<1x64xf32> to vector<2x64xf32>
    %511 = arith.mulf %509, %510 : vector<2x64xf32>
    %512 = vector.broadcast %493 : vector<1x64xf32> to vector<2x64xf32>
    %513 = arith.addf %511, %512 : vector<2x64xf32>
    %514 = tpu.concatenate %490, %513, %490, %513 in 0 : vector<2x64xf32>, vector<2x64xf32>, vector<2x64xf32>, vector<2x64xf32> -> vector<8x64xf32>
    %515 = arith.truncf %514 : vector<8x64xf32> to vector<8x64xbf16>
    %c0_225 = arith.constant 0 : index
    %c0_226 = arith.constant 0 : index
    %516 = vector.load %arg29[%c0_225, %c0_226] : memref<64x128xbf16, #tpu.memory_space<vmem>>, vector<64x128xbf16>
    %cst_227 = arith.constant dense<0.000000e+00> : vector<8x128xf32>
    %517 = tpu.matmul %515, %516, %cst_227 {dimension_numbers = #tpu.dot_dimension_numbers<[1], [0], [0], [1], [0, 0, 1, 1], [], []>} : vector<8x64xbf16>, vector<64x128xbf16>, vector<8x128xf32> -> vector<8x128xf32>
    %c0_228 = arith.constant 0 : index
    %c0_229 = arith.constant 0 : index
    %518 = vector.load %arg30[%c0_228, %c0_229] : memref<8x128xf32, #tpu.memory_space<vmem>>, vector<8x128xf32>
    tpu.vector_store %arg30[%c0_228, %c0_229], %517 {strides = array<i32>} : memref<8x128xf32, #tpu.memory_space<vmem>>, vector<8x128xf32>,
    return
  }
}

</mosaic_0001>

<bundles_post_ra>
// kernel: mymodel3_forward.1
= control target key start
LH: loop header
LB: loop body
LE: loop exit
PB: predicated region body
PF: predicated region fallthrough
CT: control target
= control target key end

     0   :  { %s5937_s6 = smov 1   ;;  %s5938_s10 = smov 2   ;;  %s6548_s0 = inlined_call_operand.smem [shape: u32[31], index: -1, kind: input, shape index: {}] }
   0x1   :  { %s6009_s5 = sld [smem:[%s6548_s0]]   ;;  %s5939_s14 = smov 3  }
   0x2   :  { %s6014_s9 = sld [smem:[%s6548_s0 + %s5937_s6]]   ;;  %s5940_s18 = smov 4  }
   0x3   :  { %s6019_s13 = sld [smem:[%s6548_s0 + %s5938_s10]]   ;;  %s5941_s22 = smov 5  }
   0x4   :  { %s6024_s17 = sld [smem:[%s6548_s0 + %s5939_s14]]   ;;  %s5942_s26 = smov 6  }
   0x5   :  { %s6029_s21 = sld [smem:[%s6548_s0 + %s5940_s18]]   ;;  %s5943_s30 = smov 7  }
   0x6   :  { %s6034_s25 = sld [smem:[%s6548_s0 + %s5941_s22]]   ;;  %s5944_s4 = smov 8  }
   0x7   :  { %6558 = sst [smem:[#allocation45_spill]] %s6009_s5  ;;  %s5945_s10 = smov 9  }
   0x8   :  { %s6039_s29 = sld [smem:[%s6548_s0 + %s5942_s26]]   ;;  %s5946_s15 = smov 10  }
   0x9   :  { %6559 = sst [smem:[#allocation46_spill]] %s6019_s13  ;;  %s5947_s20 = smov 11  }
   0xa   :  { %6560 = sst [smem:[#allocation47_spill]] %s6024_s17  ;;  %s5948_s26 = smov 12  }
   0xb   :  { %s6044_s3 = sld [smem:[%s6548_s0 + %s5943_s30]]   ;;  %s5949_s1 = smov 13  }
   0xc   :  { %s6049_s8 = sld [smem:[%s6548_s0 + %s5944_s4]]   ;;  %s5950_s7 = smov 14  }
   0xd   :  { %s6054_s14 = sld [smem:[%s6548_s0 + %s5945_s10]]   ;;  %s5952_s22 = smov 16  }
   0xe   :  { %s6059_s19 = sld [smem:[%s6548_s0 + %s5946_s15]]   ;;  %s5951_s15 = smov 15  }
   0xf   :  { %s6064_s24 = sld [smem:[%s6548_s0 + %s5947_s20]]   ;;  %s5953_s28 = smov 17  }
  0x10   :  { %s6069_s30 = sld [smem:[%s6548_s0 + %s5948_s26]]  }
  0x11   :  { %s6074_s6 = sld [smem:[%s6548_s0 + %s5949_s1]]  }
  0x12   :  { %s6079_s12 = sld [smem:[%s6548_s0 + %s5950_s7]]   ;;  %s5954_s7 = smov 18  }
  0x13   :  { %s6084_s20 = sld [smem:[%s6548_s0 + %s5951_s15]]   ;;  %s5955_s15 = smov 19  }
  0x14   :  { %s6089_s27 = sld [smem:[%s6548_s0 + %s5952_s22]]   ;;  %s5956_s22 = smov 20  }
  0x15   :  { %s6094_s4 = sld [smem:[%s6548_s0 + %s5953_s28]]   ;;  %s5957_s28 = smov 21  }
  0x16   :  { %s6099_s17 = sld [smem:[%s6548_s0 + %s5954_s7]]   ;;  %s5958_s7 = smov 22  }
  0x17   :  { %6561 = sst [smem:[#allocation48_spill]] %s6074_s6 }
  0x18   :  { %6562 = sst [smem:[#allocation49_spill]] %s6079_s12 }
  0x19   :  { %s6104_s12 = sld [smem:[%s6548_s0 + %s5955_s15]]   ;;  %s5959_s15 = smov 23  }
  0x1a   :  { %6563 = sst [smem:[#allocation50_spill]] %s6089_s27 }
  0x1b   :  { %s6109_s13 = sld [smem:[%s6548_s0 + %s5956_s22]]   ;;  %s5960_s22 = smov 24  }
  0x1c   :  { %6564 = sst [smem:[#allocation51_spill]] %s6099_s17 }
  0x1d   :  { %s6114_s5 = sld [smem:[%s6548_s0 + %s5957_s28]]   ;;  %s5961_s28 = smov 25  }
  0x1e   :  { %s6119_s17 = sld [smem:[%s6548_s0 + %s5958_s7]]   ;;  %s5962_s7 = smov 26  }
  0x1f   :  { %6565 = sst [smem:[#allocation52_spill]] %s6104_s12 }
  0x20   :  { %s6124_s12 = sld [smem:[%s6548_s0 + %s5959_s15]]   ;;  %s5963_s15 = smov 27  }
  0x21   :  { %s6129_s27 = sld [smem:[%s6548_s0 + %s5960_s22]]   ;;  %s5964_s22 = smov 28  }
  0x23   :  { %6566 = sst [smem:[#allocation53_spill]] %s6114_s5 }
  0x24   :  { %6567 = sst [smem:[#allocation54_spill]] %s6119_s17 }
  0x25   :  { %s6134_s5 = sld [smem:[%s6548_s0 + %s5961_s28]]   ;;  %s5965_s28 = smov 29  }
  0x26   :  { %6568 = sst [smem:[#allocation55_spill]] %s6124_s12 }
  0x27   :  { %6569 = sst [smem:[#allocation56_spill]] %s6129_s27 }
  0x28   :  { %s6139_s17 = sld [smem:[%s6548_s0 + %s5962_s7]]   ;;  %s5966_s7 = smov 30  }
  0x29   :  { %s6144_s12 = sld [smem:[%s6548_s0 + %s5963_s15]]  }
  0x2a   :  { %s6149_s27 = sld [smem:[%s6548_s0 + %s5964_s22]]  }
  0x2b   :  { %6570 = sst [smem:[#allocation57_spill]] %s6134_s5 }
  0x2c   :  { %s6154_s5 = sld [smem:[%s6548_s0 + %s5965_s28]]  }
  0x2d   :  { %s6159_s6 = sld [smem:[%s6548_s0 + %s5966_s7]]  }
  0x2e   :  { %66 = vsyncpa [#allocation4], 0 }
  0x2f   :  { %67 = vsyncpa [#allocation6], 0 }
  0x30   :  { %68 = vsyncpa [#allocation9], 0 }
  0x31   :  { %69 = vsyncpa [#allocation12], 0 }
  0x32   :  { %70 = vsyncpa [#allocation15], 0 }
  0x33   :  { %71 = vsyncpa [#allocation18], 0 }
  0x34   :  { %72 = vsyncpa [#allocation21], 0 }
  0x35   :  { %73 = vsyncpa [#allocation24], 0 }
  0x36   :  { %74 = vsyncpa [#allocation27], 0 }
  0x37   :  { %75 = vsyncpa [#allocation30], 0 }
  0x38   :  { %76 = vsyncpa [#allocation33], 0  ;;  %s5967_s15 = smov [#allocation5]  }
  0x39   :  { %s100_s16 = sshll.u32 %s5967_s15, 4  ;;  %s101_s16 = int_to_ptr.vmem [resolvable:$true] %s100_s16 }
  0x3a   :  { %s5523_s18 = scalar_lea.vmem %s101_s16, 8192  ;;  %p5528_p1 = scmp.lt.s32.totalorder %s101_s16, %s101_s16 }
  0x3b   :  { %p5524_p0 = scmp.ne.s32.totalorder %s101_s16, %s5523_s18  ;;  %p5529_p2 = scmp.lt.s32.totalorder %s5523_s18, %s5523_s18 }
  0x3d   :  { %p5530_p3 = por %p5529_p2, %p5528_p1 }
  0x3f   :  { %p5531_p4 = pnand %p5530_p3, %p5524_p0 }
  0x41   :  { %5534 = shalt.err (!%p5531_p4)
}
  0x42   :  { %s5968_s0 = smov 64   ;;  %s5969_s22 = smov 4  }
  0x43   :  { %106 = dma.hbm_to_vmem [thread:$0]  %s6029_s21, 8192, %s101_s16, [#allocation6], %s5968_s0, %s5968_s0, %s5969_s22  }
  0x44   :  { %s5970_s23 = smov [#allocation8]   ;;  %s5971_s28 = smov [#allocation11]  }
  0x45   :  { %s123_s26 = sshll.u32 %s5970_s23, 4  ;;  %s144_s1 = sshll.u32 %s5971_s28, 4  ;;  %s124_s26 = int_to_ptr.vmem [resolvable:$true] %s123_s26  ;;  %s145_s1 = int_to_ptr.vmem [resolvable:$true] %s144_s1 }
  0x46   :  { %s5543_s2 = scalar_lea.vmem %s124_s26, 16  ;;  %s5547_s7 = scalar_lea.vmem %s124_s26, 32 }
  0x47   :  { %p5544_p5 = scmp.ne.s32.totalorder %s124_s26, %s5543_s2  ;;  %p5548_p6 = scmp.lt.s32.totalorder %s124_s26, %s124_s26 }
  0x48   :  { %p5549_p7 = scmp.lt.s32.totalorder %s5547_s7, %s5543_s2 }
  0x4a   :  { %p5550_p8 = por %p5549_p7, %p5548_p6 }
  0x4c   :  { %p5551_p9 = pnand %p5550_p8, %p5544_p5 }
  0x4e   :  { %5554 = shalt.err (!%p5551_p9)
}
  0x4f   :  { %126 = dma.hbm_to_vmem [thread:$0]  %s6039_s29, 16, %s124_s26, [#allocation9]  }
  0x50   :  { %s5563_s10 = scalar_lea.vmem %s145_s1, 192  ;;  %p5568_p11 = scmp.lt.s32.totalorder %s145_s1, %s145_s1 }
  0x51   :  { %p5564_p10 = scmp.ne.s32.totalorder %s145_s1, %s5563_s10  ;;  %p5569_p12 = scmp.lt.s32.totalorder %s5563_s10, %s5563_s10 }
  0x53   :  { %p5570_p13 = por %p5569_p12, %p5568_p11 }
  0x55   :  { %p5571_p0 = pnand %p5570_p13, %p5564_p10 }
  0x57   :  { %5574 = shalt.err (!%p5571_p0)
}
  0x58   :  { %s5972_s21 = smov 96   ;;  %s5973_s11 = smov 6  }
  0x59   :  { %150 = dma.hbm_to_vmem [thread:$0]  %s6049_s8, 192, %s145_s1, [#allocation12], %s5972_s21, %s5972_s21, %s5973_s11  }
  0x5a   :  { %s5974_s15 = smov [#allocation14]  }
  0x5b   :  { %s168_s16 = sshll.u32 %s5974_s15, 4  ;;  %s169_s16 = int_to_ptr.vmem [resolvable:$true] %s168_s16 }
  0x5c   :  { %s5583_s18 = scalar_lea.vmem %s169_s16, 32  ;;  %p5588_p2 = scmp.lt.s32.totalorder %s169_s16, %s169_s16 }
  0x5d   :  { %p5584_p1 = scmp.ne.s32.totalorder %s169_s16, %s5583_s18  ;;  %p5589_p3 = scmp.lt.s32.totalorder %s5583_s18, %s5583_s18 }
  0x5f   :  { %p5590_p4 = por %p5589_p3, %p5588_p2 }
  0x61   :  { %p5591_p5 = pnand %p5590_p4, %p5584_p1 }
  0x63   :  { %5594 = shalt.err (!%p5591_p5)
}
  0x64   :  { %s5975_s29 = smov 16   ;;  %s5976_s23 = smov 1  }
  0x65   :  { %174 = dma.hbm_to_vmem [thread:$0]  %s6059_s19, 32, %s169_s16, [#allocation15], %s5975_s29, %s5975_s29, %s5976_s23  }
  0x66   :  { %s5977_s26 = smov [#allocation17]   ;;  %s5978_s8 = smov [#allocation20]  }
  0x67   :  { %s192_s28 = sshll.u32 %s5977_s26, 4  ;;  %s218_s1 = sshll.u32 %s5978_s8, 4  ;;  %s193_s28 = int_to_ptr.vmem [resolvable:$true] %s192_s28  ;;  %s219_s1 = int_to_ptr.vmem [resolvable:$true] %s218_s1 }
  0x68   :  { %s5603_s2 = scalar_lea.vmem %s193_s28, 32  ;;  %p5608_p7 = scmp.lt.s32.totalorder %s193_s28, %s193_s28 }
  0x69   :  { %p5604_p6 = scmp.ne.s32.totalorder %s193_s28, %s5603_s2  ;;  %p5609_p8 = scmp.lt.s32.totalorder %s5603_s2, %s5603_s2 }
  0x6b   :  { %p5610_p9 = por %p5609_p8, %p5608_p7 }
  0x6d   :  { %p5611_p10 = pnand %p5610_p9, %p5604_p6 }
  0x6f   :  { %5614 = shalt.err (!%p5611_p10)
}
  0x70   :  { %198 = dma.hbm_to_vmem [thread:$0]  %s6069_s30, 32, %s193_s28, [#allocation18], %s5975_s29, %s5975_s29, %s5976_s23  }
  0x71   :  { %s5623_s7 = scalar_lea.vmem %s219_s1, 4096  ;;  %p5628_p12 = scmp.lt.s32.totalorder %s219_s1, %s219_s1 }
  0x72   :  { %p5624_p11 = scmp.ne.s32.totalorder %s219_s1, %s5623_s7  ;;  %p5629_p13 = scmp.lt.s32.totalorder %s5623_s7, %s5623_s7 }
  0x74   :  { %p5630_p0 = por %p5629_p13, %p5628_p12 }
  0x76   :  { %p5631_p1 = pnand %p5630_p0, %p5624_p11 }
  0x78   :  { %5634 = shalt.err (!%p5631_p1)
}
  0x79   :  { %224 = dma.hbm_to_vmem [thread:$0]  %s6084_s20, 4096, %s219_s1, [#allocation21], %s5968_s0, %s5968_s0, %s5969_s22  }
  0x7a   :  { %s5979_s19 = smov [#allocation23]   ;;  %s5980_s21 = smov [#allocation26]  }
  0x7b   :  { %s242_s10 = sshll.u32 %s5979_s19, 4  ;;  %s269_s11 = sshll.u32 %s5980_s21, 4  ;;  %s243_s10 = int_to_ptr.vmem [resolvable:$true] %s242_s10  ;;  %s270_s11 = int_to_ptr.vmem [resolvable:$true] %s269_s11 }
  0x7c   :  { %s5643_s15 = scalar_lea.vmem %s243_s10, 32  ;;  %p5648_p3 = scmp.lt.s32.totalorder %s243_s10, %s243_s10 }
  0x7d   :  { %p5644_p2 = scmp.ne.s32.totalorder %s243_s10, %s5643_s15  ;;  %p5649_p4 = scmp.lt.s32.totalorder %s5643_s15, %s5643_s15 }
  0x7f   :  { %p5650_p5 = por %p5649_p4, %p5648_p3 }
  0x81   :  { %p5651_p6 = pnand %p5650_p5, %p5644_p2 }
  0x83   :  { %5654 = shalt.err (!%p5651_p6)
}
  0x84   :  { %248 = dma.hbm_to_vmem [thread:$0]  %s6094_s4, 32, %s243_s10, [#allocation24], %s5975_s29, %s5975_s29, %s5976_s23  }
  0x85   :  { %s5663_s30 = scalar_lea.vmem %s270_s11, 16  ;;  %s5667_s20 = scalar_lea.vmem %s270_s11, 32 }
  0x86   :  { %p5664_p7 = scmp.ne.s32.totalorder %s270_s11, %s5663_s30  ;;  %p5668_p8 = scmp.lt.s32.totalorder %s270_s11, %s270_s11 }
  0x87   :  { %p5669_p9 = scmp.lt.s32.totalorder %s5667_s20, %s5663_s30 }
  0x89   :  { %p5670_p10 = por %p5669_p9, %p5668_p8 }
  0x8b   :  { %p5671_p11 = pnand %p5670_p10, %p5664_p7 }
  0x8d   :  { %5674 = shalt.err (!%p5671_p11)
}
  0x8e   :  { %272 = dma.hbm_to_vmem [thread:$0]  %s6109_s13, 16, %s270_s11, [#allocation27]  }
  0x8f   :  { %s5981_s16 = smov [#allocation29]   ;;  %s5982_s26 = smov [#allocation3]  }
  0x90   :  { %s296_s18 = sshll.u32 %s5981_s16, 4  ;;  %s84_s28 = sshll.u32 %s5982_s26, 4  ;;  %s297_s18 = int_to_ptr.vmem [resolvable:$true] %s296_s18  ;;  %s85_s28 = int_to_ptr.vmem [resolvable:$true] %s84_s28 }
  0x91   :  { %s5683_s8 = scalar_lea.vmem %s297_s18, 1024  ;;  %p5688_p13 = scmp.lt.s32.totalorder %s297_s18, %s297_s18 }
  0x92   :  { %p5684_p12 = scmp.ne.s32.totalorder %s297_s18, %s5683_s8  ;;  %p5689_p0 = scmp.lt.s32.totalorder %s5683_s8, %s5683_s8 }
  0x94   :  { %p5690_p1 = por %p5689_p0, %p5688_p13 }
  0x96   :  { %p5691_p2 = pnand %p5690_p1, %p5684_p12 }
  0x98   :  { %5694 = shalt.err (!%p5691_p2)
}
  0x99   :  { %302 = dma.hbm_to_vmem [thread:$0]  %s6139_s17, 1024, %s297_s18, [#allocation30], %s5968_s0, %s5968_s0, %s5969_s22  }
  0x9a   :  { %s5703_s4 = scalar_lea.vmem %s85_s28, 256  ;;  %p5708_p4 = scmp.lt.s32.totalorder %s85_s28, %s85_s28 }
  0x9b   :  { %p5704_p3 = scmp.ne.s32.totalorder %s85_s28, %s5703_s4  ;;  %p5709_p5 = scmp.lt.s32.totalorder %s5703_s4, %s5703_s4 }
  0x9d   :  { %p5710_p6 = por %p5709_p5, %p5708_p4 }
  0x9f   :  { %p5711_p7 = pnand %p5710_p6, %p5704_p3 }
  0xa1   :  { %5714 = shalt.err (!%p5711_p7)
}
  0xa2   :  { %s5983_s13 = smov 128   ;;  %s5984_s1 = smov 8  }
  0xa3   :  { %90 = dma.hbm_to_vmem [thread:$0]  %s6014_s9, 256, %s85_s28, [#allocation4], %s5983_s13, %s5983_s13, %s5984_s1  }
  0xa4   :  { %s5985_s2 = smov [#allocation7]   ;;  %s5986_s19 = smov [#allocation10]  }
  0xa5   :  { %s113_s7 = sshll.u32 %s5985_s2, 4  ;;  %s132_s10 = sshll.u32 %s5986_s19, 4  ;;  %s114_s7 = int_to_ptr.vmem [resolvable:$true] %s113_s7  ;;  %s133_s10 = int_to_ptr.vmem [resolvable:$true] %s132_s10 }
  0xa6   :  { %s5723_s17 = scalar_lea.vmem %s114_s7, 16  ;;  %s5727_s21 = scalar_lea.vmem %s114_s7, 32 }
  0xa7   :  { %p5724_p8 = scmp.ne.s32.totalorder %s114_s7, %s5723_s17  ;;  %p5728_p9 = scmp.lt.s32.totalorder %s114_s7, %s114_s7 }
  0xa8   :  { %p5729_p10 = scmp.lt.s32.totalorder %s5727_s21, %s5723_s17 }
  0xaa   :  { %p5730_p11 = por %p5729_p10, %p5728_p9 }
  0xac   :  { %p5731_p12 = pnand %p5730_p11, %p5724_p8 }
  0xae   :  { %5734 = shalt.err (!%p5731_p12)
}
  0xaf   :  { %116 = dma.hbm_to_vmem [thread:$0]  %s6034_s25, 16, %s114_s7, [#allocation6]  }
  0xb0   :  { %s5743_s11 = scalar_lea.vmem %s133_s10, 12288  ;;  %p5748_p0 = scmp.lt.s32.totalorder %s133_s10, %s133_s10 }
  0xb1   :  { %p5744_p13 = scmp.ne.s32.totalorder %s133_s10, %s5743_s11  ;;  %p5749_p1 = scmp.lt.s32.totalorder %s5743_s11, %s5743_s11 }
  0xb3   :  { %p5750_p2 = por %p5749_p1, %p5748_p0 }
  0xb5   :  { %p5751_p3 = pnand %p5750_p2, %p5744_p13 }
  0xb7   :  { %5754 = shalt.err (!%p5751_p3)
}
  0xb8   :  { %s5987_s9 = smov 384   ;;  %s5988_s15 = smov 24  }
  0xb9   :  { %138 = dma.hbm_to_vmem [thread:$0]  %s6044_s3, 12288, %s133_s10, [#allocation9], %s5987_s9, %s5987_s9, %s5988_s15  }
  0xba   :  { %s5989_s30 = smov [#allocation13]   ;;  %s5990_s16 = smov [#allocation16]  }
  0xbb   :  { %s156_s20 = sshll.u32 %s5989_s30, 4  ;;  %s180_s18 = sshll.u32 %s5990_s16, 4  ;;  %s157_s20 = int_to_ptr.vmem [resolvable:$true] %s156_s20  ;;  %s181_s18 = int_to_ptr.vmem [resolvable:$true] %s180_s18 }
  0xbc   :  { %s5763_s26 = scalar_lea.vmem %s157_s20, 2048  ;;  %p5768_p5 = scmp.lt.s32.totalorder %s157_s20, %s157_s20 }
  0xbd   :  { %p5764_p4 = scmp.ne.s32.totalorder %s157_s20, %s5763_s26  ;;  %p5769_p6 = scmp.lt.s32.totalorder %s5763_s26, %s5763_s26 }
  0xbf   :  { %p5770_p7 = por %p5769_p6, %p5768_p5 }
  0xc1   :  { %p5771_p8 = pnand %p5770_p7, %p5764_p4 }
  0xc3   :  { %5774 = shalt.err (!%p5771_p8)
}
  0xc4   :  { %162 = dma.hbm_to_vmem [thread:$0]  %s6054_s14, 2048, %s157_s20, [#allocation12], %s5968_s0, %s5968_s0, %s5969_s22  }
  0xc5   :  { %s5783_s25 = scalar_lea.vmem %s181_s18, 32  ;;  %p5788_p10 = scmp.lt.s32.totalorder %s181_s18, %s181_s18 }
  0xc6   :  { %p5784_p9 = scmp.ne.s32.totalorder %s181_s18, %s5783_s25  ;;  %p5789_p11 = scmp.lt.s32.totalorder %s5783_s25, %s5783_s25 }
  0xc8   :  { %p5790_p12 = por %p5789_p11, %p5788_p10 }
  0xca   :  { %p5791_p13 = pnand %p5790_p12, %p5784_p9 }
  0xcc   :  { %5794 = shalt.err (!%p5791_p13)
}
  0xcd   :  { %186 = dma.hbm_to_vmem [thread:$0]  %s6064_s24, 32, %s181_s18, [#allocation15], %s5975_s29, %s5975_s29, %s5976_s23  }
  0xce   :  { %s5991_s3 = smov [#allocation19]   ;;  %s5992_s8 = smov [#allocation22]  }
  0xcf   :  { %s204_s28 = sshll.u32 %s5991_s3, 4  ;;  %s230_s4 = sshll.u32 %s5992_s8, 4  ;;  %s205_s28 = int_to_ptr.vmem [resolvable:$true] %s204_s28  ;;  %s231_s4 = int_to_ptr.vmem [resolvable:$true] %s230_s4 }
  0xd0   :  { %s5803_s2 = scalar_lea.vmem %s205_s28, 4096  ;;  %p5808_p1 = scmp.lt.s32.totalorder %s205_s28, %s205_s28 }
  0xd1   :  { %p5804_p0 = scmp.ne.s32.totalorder %s205_s28, %s5803_s2  ;;  %p5809_p2 = scmp.lt.s32.totalorder %s5803_s2, %s5803_s2 }
  0xd3   :  { %p5810_p3 = por %p5809_p2, %p5808_p1 }
  0xd5   :  { %p5811_p4 = pnand %p5810_p3, %p5804_p0 }
  0xd7   :  { %5814 = shalt.err (!%p5811_p4)
}
  0xd8   :  { %s6571_s14 = sld [smem:[#allocation48_spill]]  ;;  %s5823_s22 = scalar_lea.vmem %s231_s4, 32 }
  0xd9   :  { %p5824_p5 = scmp.ne.s32.totalorder %s231_s4, %s5823_s22  ;;  %p5828_p6 = scmp.lt.s32.totalorder %s231_s4, %s231_s4 }
  0xda   :  { %p5829_p7 = scmp.lt.s32.totalorder %s5823_s22, %s5823_s22 }
  0xdc   :  { %p5830_p8 = por %p5829_p7, %p5828_p6 }
  0xde   :  { %210 = dma.hbm_to_vmem [thread:$0]  %s6571_s14, 4096, %s205_s28, [#allocation18], %s5983_s13, %s5983_s13, %s5984_s1  }
  0xdf   :  { %p5831_p9 = pnand %p5830_p8, %p5824_p5 }
  0xe1   :  { %5834 = shalt.err (!%p5831_p9)
}
  0xe2   :  { %s6572_s24 = sld [smem:[#allocation50_spill]]  ;;  %s5993_s7 = smov [#allocation25]  }
  0xe3   :  { %s254_s19 = sshll.u32 %s5993_s7, 4  ;;  %s5994_s10 = smov [#allocation28]   ;;  %s255_s19 = int_to_ptr.vmem [resolvable:$true] %s254_s19 }
  0xe4   :  { %s279_s17 = sshll.u32 %s5994_s10, 4  ;;  %s5843_s21 = scalar_lea.vmem %s255_s19, 32  ;;  %s280_s17 = int_to_ptr.vmem [resolvable:$true] %s279_s17 }
  0xe5   :  { %p5844_p10 = scmp.ne.s32.totalorder %s255_s19, %s5843_s21  ;;  %p5848_p11 = scmp.lt.s32.totalorder %s255_s19, %s255_s19 }
  0xe6   :  { %p5849_p12 = scmp.lt.s32.totalorder %s5843_s21, %s5843_s21 }
  0xe8   :  { %236 = dma.hbm_to_vmem [thread:$0]  %s6572_s24, 32, %s231_s4, [#allocation21], %s5975_s29, %s5975_s29, %s5976_s23  }
  0xe9   :  { %p5850_p13 = por %p5849_p12, %p5848_p11 }
  0xeb   :  { %p5851_p0 = pnand %p5850_p13, %p5844_p10 }
  0xed   :  { %5854 = shalt.err (!%p5851_p0)
}
  0xee   :  { %s6573_s13 = sld [smem:[#allocation51_spill]]  ;;  %s5863_s1 = scalar_lea.vmem %s280_s17, 32 }
  0xef   :  { %p5864_p1 = scmp.ne.s32.totalorder %s280_s17, %s5863_s1  ;;  %p5868_p2 = scmp.lt.s32.totalorder %s280_s17, %s280_s17 }
  0xf0   :  { %p5869_p3 = scmp.lt.s32.totalorder %s5863_s1, %s5863_s1 }
  0xf2   :  { %p5870_p4 = por %p5869_p3, %p5868_p2 }
  0xf4   :  { %260 = dma.hbm_to_vmem [thread:$0]  %s6573_s13, 32, %s255_s19, [#allocation24], %s5975_s29, %s5975_s29, %s5976_s23  }
  0xf5   :  { %p5871_p5 = pnand %p5870_p4, %p5864_p1 }
  0xf7   :  { %5874 = shalt.err (!%p5871_p5)
}
  0xf8   :  { %s6574_s11 = sld [smem:[#allocation53_spill]]  ;;  %s5995_s9 = smov [#allocation31]  }
  0xf9   :  { %s309_s15 = sshll.u32 %s5995_s9, 4  ;;  %s5996_s30 = smov [#allocation32]   ;;  %s310_s15 = int_to_ptr.vmem [resolvable:$true] %s309_s15 }
  0xfa   :  { %s319_s20 = sshll.u32 %s5996_s30, 4  ;;  %s5883_s16 = scalar_lea.vmem %s310_s15, 16  ;;  %s320_s20 = int_to_ptr.vmem [resolvable:$true] %s319_s20 }
  0xfb   :  { %p5884_p6 = scmp.ne.s32.totalorder %s310_s15, %s5883_s16  ;;  %s5887_s18 = scalar_lea.vmem %s310_s15, 32 }
  0xfc   :  { %p5888_p7 = scmp.lt.s32.totalorder %s310_s15, %s310_s15  ;;  %p5889_p8 = scmp.lt.s32.totalorder %s5887_s18, %s5883_s16 }
  0xfe   :  { %282 = dma.hbm_to_vmem [thread:$0]  %s6574_s11, 32, %s280_s17, [#allocation27]  }
  0xff   :  { %p5890_p9 = por %p5889_p8, %p5888_p7 }
 0x101   :  { %p5891_p10 = pnand %p5890_p9, %p5884_p6 }
 0x103   :  { %5894 = shalt.err (!%p5891_p10)
}
 0x104   :  { %312 = dma.hbm_to_vmem [thread:$0]  %s6144_s12, 16, %s310_s15, [#allocation30]  }
 0x105   :  { %s5903_s29 = scalar_lea.vmem %s320_s20, 16  ;;  %s5907_s23 = scalar_lea.vmem %s320_s20, 32 }
 0x106   :  { %p5904_p11 = scmp.ne.s32.totalorder %s320_s20, %s5903_s29  ;;  %p5908_p12 = scmp.lt.s32.totalorder %s320_s20, %s320_s20 }
 0x107   :  { %p5909_p13 = scmp.lt.s32.totalorder %s5907_s23, %s5903_s29 }
 0x109   :  { %p5910_p0 = por %p5909_p13, %p5908_p12 }
 0x10b   :  { %p5911_p1 = pnand %p5910_p0, %p5904_p11 }
 0x10d   :  { %5914 = shalt.err (!%p5911_p1)
}
 0x10e   :  { %322 = dma.hbm_to_vmem [thread:$0]  %s6149_s27, 16, %s320_s20, [#allocation33]  }
 0x10f   :  { %5915 = dma.done.wait [#allocation4], 256  }
 0x110   :  { %5916 = vsyncadd [#allocation4], 4294967040 }
 0x111   :  { %5917 = dma.done.wait [#allocation6], 8208  }
 0x112   :  { %5918 = vsyncadd [#allocation6], 4294959088 }
 0x113   :  { %5919 = dma.done.wait [#allocation9], 12304  }
 0x114   :  { %5920 = vsyncadd [#allocation9], 4294954992 }
 0x115   :  { %5921 = dma.done.wait [#allocation12], 2240  }
 0x116   :  { %5922 = vsyncadd [#allocation12], 4294965056 }
 0x117   :  { %5923 = dma.done.wait [#allocation15], 64  }
 0x118   :  { %5924 = vsyncadd [#allocation15], 4294967232 }
 0x119   :  { %5925 = dma.done.wait [#allocation18], 4128  }
 0x11a   :  { %5926 = vsyncadd [#allocation18], 4294963168 }
 0x11b   :  { %5927 = dma.done.wait [#allocation21], 4128  }
 0x11c   :  { %5928 = vsyncadd [#allocation21], 4294963168 }
 0x11d   :  { %5929 = dma.done.wait [#allocation24], 64  }
 0x11e   :  { %5930 = vsyncadd [#allocation24], 4294967232 }
 0x11f   :  { %5931 = dma.done.wait [#allocation27], 48  }
 0x120   :  { %5932 = vsyncadd [#allocation27], 4294967248 }
 0x121   :  { %5933 = dma.done.wait [#allocation30], 1040  }
 0x122   :  { %5934 = vsyncadd [#allocation30], 4294966256 }
 0x123   :  { %5935 = dma.done.wait [#allocation33], 16  }
 0x124   :  { %5936 = vsyncadd [#allocation33], 4294967280  ;;  %s6575_s12 = sld [smem:[#allocation45_spill]]  ;;  %v5997_v0 = vmov 0   ;;  %v5091_v3 = vld [vmem:[#allocation5 + $0x78] sm:$0xff]   ;;  %v5095_v7 = vld [vmem:[#allocation5 + $0x70] sm:$0xff]   ;;  %v386_v37 = vlaneseq }
 0x125   :  { %5089 = vset.pattern.permute.xlu0 %v5997_v0  ;;  %5090 = vset.pattern.permute.xlu1 %v5997_v0  ;;  %v5092_v4 = vld [vmem:[#allocation5 + $0xf8] sm:$0xff]   ;;  %v5096_v8 = vld [vmem:[#allocation5 + $0xf0] sm:$0xff]   ;;  %v5099_v11 = vld [vmem:[#allocation5 + $0x68] sm:$0xff]   ;;  %v5998_v49 = vmov 1.0|1.0   ;;  %s6576_s27 = sld [smem:[#allocation46_spill]] }
 0x126   :  { %4696 = vmatprep.subr.bf16.mxu0 %v5091_v3  ;;  %v5093_v5 = vld [vmem:[#allocation5 + $0x38] sm:$0xff]   ;;  %4718 = vmatprep.subr.bf16.mxu1 %v5092_v4  ;;  %v5097_v9 = vld [vmem:[#allocation5 + $0x30] sm:$0xff]   ;;  %v5100_v12 = vld [vmem:[#allocation5 + $0xe8] sm:$0xff]   ;;  %v6222_v38 = vand.u32 127, %v386_v37  ;;  %s6577_s26 = sld [smem:[#allocation49_spill]] }
 0x127   :  { %v5094_v6 = vld [vmem:[#allocation5 + $0xb8] sm:$0xff]   ;;  %4697 = vmatpush3.bf16.msra.mxu0 %v5093_v5  ;;  %v5098_v10 = vld [vmem:[#allocation5 + $0xb0] sm:$0xff]   ;;  %v5101_v13 = vld [vmem:[#allocation5 + $0x28] sm:$0xff]   ;;  %s6578_s25 = sld [smem:[#allocation52_spill]] }
 0x128   :  { %4719 = vmatpush3.bf16.msra.mxu1 %v5094_v6  ;;  %4698 = vmatprep.subr.bf16.mxu0 %v5095_v7  ;;  %v5102_v14 = vld [vmem:[#allocation5 + $0xa8] sm:$0xff]   ;;  %v5103_v15 = vld [vmem:[#allocation5 + $0x60] sm:$0xff]   ;;  %v5107_v19 = vld [vmem:[#allocation5 + $0x58] sm:$0xff]   ;;  %v388_v40 = vadd.s32 128, %v6222_v38  ;;  %v390_v41 = vadd.s32 384, %v6222_v38  ;;  %v389_v42 = vadd.s32 256, %v6222_v38 }
 0x129   :  { %4720 = vmatprep.subr.bf16.mxu1 %v5096_v8  ;;  %v5104_v16 = vld [vmem:[#allocation5 + $0xe0] sm:$0xff]   ;;  %v5108_v20 = vld [vmem:[#allocation5 + $0xd8] sm:$0xff]   ;;  %v5111_v23 = vld [vmem:[#allocation5 + $0x50] sm:$0xff]   ;;  %v392_v43 = vadd.s32 640, %v6222_v38  ;;  %v394_v47 = vadd.s32 896, %v6222_v38  ;;  %s6579_s3 = sld [smem:[#allocation54_spill]] }
 0x12a   :  { %v395_v1 = vld [vmem:[%s6575_s12] sm:$0xff]  ;;  %v396_v2 = vld [vmem:[%s6575_s12 + $0x8] sm:$0xff]  ;;  %v5109_v21 = vld [vmem:[#allocation5 + $0x18] sm:$0xff]   ;;  %s6580_s28 = sld [smem:[#allocation47_spill]] }
 0x12b   :  { %398 = vperm.xlu0 %5089, %v395_v1   ;;  %4699 = vmatpush3.bf16.msra.mxu0 %v5097_v9  ;;  %v5105_v17 = vld [vmem:[#allocation5 + $0x20] sm:$0xff]   ;;  %v5110_v22 = vld [vmem:[#allocation5 + $0x98] sm:$0xff]   ;;  %v5112_v24 = vld [vmem:[#allocation5 + $0xd0] sm:$0xff]   ;;  %s6581_s8 = sld [smem:[#allocation55_spill]] }
 0x12c   :  { %4721 = vmatpush3.bf16.msra.mxu1 %v5098_v10  ;;  %4700 = vmatprep.subr.bf16.mxu0 %v5099_v11  ;;  %v5106_v18 = vld [vmem:[#allocation5 + $0xa0] sm:$0xff]   ;;  %v5113_v25 = vld [vmem:[#allocation5 + $0x10] sm:$0xff]   ;;  %v5115_v27 = vld [vmem:[#allocation5 + $0x48] sm:$0xff]   ;;  %s6582_s4 = sld [smem:[#allocation56_spill]] }
 0x12d   :  { %4722 = vmatprep.subr.bf16.mxu1 %v5100_v12  ;;  %v5114_v26 = vld [vmem:[#allocation5 + $0x90] sm:$0xff]   ;;  %v5116_v28 = vld [vmem:[#allocation5 + $0xc8] sm:$0xff]   ;;  %v5119_v31 = vld [vmem:[#allocation5 + $0x40] sm:$0xff]   ;;  %s6583_s2 = sld [smem:[#allocation57_spill]] }
 0x12e   :  { %v5117_v29 = vld [vmem:[#allocation5 + $0x8] sm:$0xff]   ;;  %v5120_v32 = vld [vmem:[#allocation5 + $0xc0] sm:$0xff]   ;;  %v5123_v35 = vld [vmem:[#allocation5 + $0x178] sm:$0xff]  }
 0x12f   :  { %401 = vperm.xlu0 %5089, %v396_v2   ;;  %4701 = vmatpush3.bf16.msra.mxu0 %v5101_v13  ;;  %v5118_v30 = vld [vmem:[#allocation5 + $0x88] sm:$0xff]   ;;  %v5121_v33 = vld [vmem:[#allocation5] sm:$0xff]   ;;  %v5124_v36 = vld [vmem:[#allocation5 + $0x1f8] sm:$0xff]  }
 0x130   :  { %4723 = vmatpush3.bf16.msra.mxu1 %v5102_v14  ;;  %4702 = vmatprep.subr.bf16.mxu0 %v5103_v15  ;;  %v5122_v34 = vld [vmem:[#allocation5 + $0x80] sm:$0xff]   ;;  %v5125_v45 = vld [vmem:[#allocation5 + $0x138] sm:$0xff]   ;;  %v5127_v48 = vld [vmem:[#allocation5 + $0x170] sm:$0xff]   ;;  %v391_v14 = vadd.s32 512, %v6222_v38  ;;  %v393_v15 = vadd.s32 768, %v6222_v38 }
 0x131   :  { %4724 = vmatprep.subr.bf16.mxu1 %v5104_v16  ;;  %v5126_v46 = vld [vmem:[#allocation5 + $0x1b8] sm:$0xff]   ;;  %v5128_v50 = vld [vmem:[#allocation5 + $0x1f0] sm:$0xff]   ;;  %v5131_v53 = vld [vmem:[#allocation5 + $0x168] sm:$0xff]  }
 0x132   :  { %v5129_v51 = vld [vmem:[#allocation5 + $0x130] sm:$0xff]   ;;  %v5132_v54 = vld [vmem:[#allocation5 + $0x1e8] sm:$0xff]   ;;  %v5135_v57 = vld [vmem:[#allocation5 + $0x160] sm:$0xff]  }
 0x133   :  { %4703 = vmatpush3.bf16.msra.mxu0 %v5105_v17  ;;  %v5130_v52 = vld [vmem:[#allocation5 + $0x1b0] sm:$0xff]   ;;  %v5133_v55 = vld [vmem:[#allocation5 + $0x128] sm:$0xff]   ;;  %v5136_v58 = vld [vmem:[#allocation5 + $0x1e0] sm:$0xff]  }
 0x134   :  { %4725 = vmatpush3.bf16.msra.mxu1 %v5106_v18  ;;  %4704 = vmatprep.subr.bf16.mxu0 %v5107_v19  ;;  %v5134_v56 = vld [vmem:[#allocation5 + $0x1a8] sm:$0xff]   ;;  %v5137_v59 = vld [vmem:[#allocation5 + $0x120] sm:$0xff]   ;;  %v5139_v61 = vld [vmem:[#allocation5 + $0x158] sm:$0xff]  }
 0x135   :  { %4726 = vmatprep.subr.bf16.mxu1 %v5108_v20  ;;  %v5138_v60 = vld [vmem:[#allocation5 + $0x1a0] sm:$0xff]   ;;  %v5140_v62 = vld [vmem:[#allocation5 + $0x1d8] sm:$0xff]   ;;  %v5143_v2 = vld [vmem:[#allocation5 + $0x150] sm:$0xff]  }
 0x136   :  { %v5141_v63 = vld [vmem:[#allocation5 + $0x118] sm:$0xff]   ;;  %v5144_v3 = vld [vmem:[#allocation5 + $0x1d0] sm:$0xff]   ;;  %v5147_v6 = vld [vmem:[#allocation5 + $0x148] sm:$0xff]  }
 0x137   :  { %4705 = vmatpush3.bf16.msra.mxu0 %v5109_v21  ;;  %v5142_v1 = vld [vmem:[#allocation5 + $0x198] sm:$0xff]   ;;  %v5145_v4 = vld [vmem:[#allocation5 + $0x110] sm:$0xff]   ;;  %v5148_v7 = vld [vmem:[#allocation5 + $0x1c8] sm:$0xff]  }
 0x138   :  { %4727 = vmatpush3.bf16.msra.mxu1 %v5110_v22  ;;  %4706 = vmatprep.subr.bf16.mxu0 %v5111_v23  ;;  %v5146_v5 = vld [vmem:[#allocation5 + $0x190] sm:$0xff]   ;;  %v5149_v8 = vld [vmem:[#allocation5 + $0x108] sm:$0xff]   ;;  %v5151_v10 = vld [vmem:[#allocation5 + $0x140] sm:$0xff]  }
 0x139   :  { %4728 = vmatprep.subr.bf16.mxu1 %v5112_v24  ;;  %v5150_v9 = vld [vmem:[#allocation5 + $0x188] sm:$0xff]   ;;  %v5152_v11 = vld [vmem:[#allocation5 + $0x1c0] sm:$0xff]   ;;  %v587_v23 = vld [vmem:[#allocation3] sm:$0xff] }
 0x13a   :  { %v5153_v12 = vld [vmem:[#allocation5 + $0x100] sm:$0xff]  }
 0x13b   :  { %4707 = vmatpush3.bf16.msra.mxu0 %v5113_v25  ;;  %v5154_v13 = vld [vmem:[#allocation5 + $0x180] sm:$0xff]  }
 0x13c   :  { %4729 = vmatpush3.bf16.msra.mxu1 %v5114_v26  ;;  %4708 = vmatprep.subr.bf16.mxu0 %v5115_v27 }
 0x13d   :  { %4730 = vmatprep.subr.bf16.mxu1 %v5116_v28  ;;  %v588_v28 = vld [vmem:[#allocation3 + $0x8] sm:$0xff] }
 0x13f   :  { %4709 = vmatpush3.bf16.msra.mxu0 %v5117_v29 }
 0x140   :  { %4731 = vmatpush3.bf16.msra.mxu1 %v5118_v30  ;;  %4710 = vmatprep.subr.bf16.mxu0 %v5119_v31 }
 0x141   :  { %4732 = vmatprep.subr.bf16.mxu1 %v5120_v32 }
 0x143   :  { %4711 = vmatpush3.bf16.msra.mxu0 %v5121_v33 }
 0x144   :  { %4733 = vmatpush3.bf16.msra.mxu1 %v5122_v34  ;;  %4740 = vmatprep.subr.bf16.mxu0 %v5123_v35 }
 0x145   :  { %4762 = vmatprep.subr.bf16.mxu1 %v5124_v36 }
 0x1a6   :  { %v6224_v39 = vpop.permute.xlu0 %398 }
 0x1a7   :  { %vm404_vm0 = vcmp.eq.s32.totalorder %v388_v40, %v6224_v39  ;;  %vm406_vm5 = vcmp.eq.s32.totalorder %v390_v41, %v6224_v39  ;;  %vm403_vm8 = vcmp.eq.s32.totalorder %v6222_v38, %v6224_v39  ;;  %vm405_vm11 = vcmp.eq.s32.totalorder %v389_v42, %v6224_v39 }
 0x1a8   :  { %vm408_vm14 = vcmp.eq.s32.totalorder %v392_v43, %v6224_v39 }
 0x1aa   :  { %v6230_v44 = vpop.permute.xlu0 %401 }
 0x1ab   :  { %vm412_vm1 = vcmp.eq.s32.totalorder %v388_v40, %v6230_v44  ;;  %vm414_vm2 = vcmp.eq.s32.totalorder %v390_v41, %v6230_v44  ;;  %vm411_vm3 = vcmp.eq.s32.totalorder %v6222_v38, %v6230_v44  ;;  %vm413_vm6 = vcmp.eq.s32.totalorder %v389_v42, %v6230_v44 }
 0x1ac   :  { %vm4450_vm4 = vmpackc.low %vm412_vm1, %vm404_vm0  ;;  %vm416_vm9 = vcmp.eq.s32.totalorder %v392_v43, %v6230_v44  ;;  %vm418_vm12 = vcmp.eq.s32.totalorder %v394_v47, %v6230_v44  ;;  %vm410_vm0 = vcmp.eq.s32.totalorder %v394_v47, %v6224_v39 }
 0x1ad   :  { %4451 = vmatprep.mubr.msk.bf16.mxu0 %vm4450_vm4, %v5998_v49  ;;  %vm4454_vm7 = vmpackc.low %vm414_vm2, %vm406_vm5  ;;  %vm415_vm2 = vcmp.eq.s32.totalorder %v391_v14, %v6230_v44  ;;  %vm407_vm4 = vcmp.eq.s32.totalorder %v391_v14, %v6224_v39  ;;  %v5179_v14 = vld [vmem:[#allocation10 + $0x90] ss:$24 sps:$4 sm:$0xff]  }
 0x1ae   :  { %4455 = vmatprep.mubr.msk.bf16.mxu1 %vm4454_vm7, %v5998_v49  ;;  %vm4452_vm10 = vmpackc.low %vm411_vm3, %vm403_vm8  ;;  %vm417_vm3 = vcmp.eq.s32.totalorder %v393_v15, %v6230_v44  ;;  %vm6000_vm8 = vmmov 0  }
 0x1af   :  { %4453 = vmatmul.mubr.msk.bf16.vlgmr.msra.gmra.mxu0 %vm4452_vm10, %v5998_v49  ;;  %vm4456_vm13 = vmpackc.low %vm413_vm6, %vm405_vm11  ;;  %vm409_vm6 = vcmp.eq.s32.totalorder %v393_v15, %v6224_v39  ;;  %v5182_v15 = vld [vmem:[#allocation10 + $0x98] ss:$24 sps:$4 sm:$0xff]   ;;  %vm3837_vm10 = vcmask 7168   ;;  %vm3966_vm11 = vcmask 1040384  }
 0x1b0   :  { %4457 = vmatmul.mubr.msk.bf16.vlgmr.msra.gmra.mxu1 %vm4456_vm13, %v5998_v49  ;;  %4741 = vmatpush3.bf16.msra.mxu0 %v5125_v45  ;;  %vm4458_vm15 = vmpackc.low %vm416_vm9, %vm408_vm14  ;;  %vm1681_vm9 = vcmask 130048   ;;  %vm4063_vm13 = vcmask 1043456   ;;  %vm4065_vm14 = vcmask 1045504  }
 0x1b1   :  { %4763 = vmatpush3.bf16.msra.mxu1 %v5126_v46  ;;  %4459 = vmatprep.mubr.msk.bf16.mxu0 %vm4458_vm15, %v5998_v49  ;;  %vm4462_vm1 = vmpackc.low %vm418_vm12, %vm410_vm0  ;;  %vm3982_vm12 = vcmask 1041408   ;;  %vm4213_vm0 = vcmask 519170  }
 0x1b2   :  { %4463 = vmatprep.mubr.msk.bf16.mxu1 %vm4462_vm1, %v5998_v49  ;;  %4742 = vmatprep.subr.bf16.mxu0 %v5127_v48  ;;  %vm4460_vm5 = vmpackc.low %vm415_vm2, %vm407_vm4  ;;  %vm4180_vm1 = vcmask 517120   ;;  %vm4280_vm2 = vcmask 523264  }
 0x1b3   :  { %4764 = vmatprep.subr.bf16.mxu1 %v5128_v50  ;;  %vm4464_vm7 = vmpackc.low %vm417_vm3, %vm409_vm6 }
 0x1b4   :  { %4743 = vmatpush3.bf16.msra.mxu0 %v5129_v51  ;;  %v5155_v51 = vld [vmem:[#allocation10 + $0x150] ss:$24 sps:$4 sm:$0xff]  }
 0x1b5   :  { %4765 = vmatpush3.bf16.msra.mxu1 %v5130_v52  ;;  %4744 = vmatprep.subr.bf16.mxu0 %v5131_v53  ;;  %v5157_v52 = vld [vmem:[#allocation10 + $0x154] ss:$24 sps:$4 sm:$0xff]   ;;  %v5158_v53 = vld [vmem:[#allocation10 + $0x158] ss:$24 sps:$4 sm:$0xff]  }
 0x1b6   :  { %4766 = vmatprep.subr.bf16.mxu1 %v5132_v54  ;;  %v5160_v54 = vld [vmem:[#allocation10 + $0x15c] ss:$24 sps:$4 sm:$0xff]  }
 0x1b8   :  { %4745 = vmatpush3.bf16.msra.mxu0 %v5133_v55 }
 0x1b9   :  { %4767 = vmatpush3.bf16.msra.mxu1 %v5134_v56  ;;  %4746 = vmatprep.subr.bf16.mxu0 %v5135_v57 }
 0x1ba   :  { %4768 = vmatprep.subr.bf16.mxu1 %v5136_v58 }
 0x1bc   :  { %4747 = vmatpush3.bf16.msra.mxu0 %v5137_v59 }
 0x1bd   :  { %4769 = vmatpush3.bf16.msra.mxu1 %v5138_v60  ;;  %4748 = vmatprep.subr.bf16.mxu0 %v5139_v61 }
 0x1be   :  { %4770 = vmatprep.subr.bf16.mxu1 %v5140_v62 }
 0x1c0   :  { %4749 = vmatpush3.bf16.msra.mxu0 %v5141_v63  ;;  %v5161_v63 = vld [vmem:[#allocation10 + $0x120] ss:$24 sps:$4 sm:$0xff]  }
 0x1c1   :  { %4771 = vmatpush3.bf16.msra.mxu1 %v5142_v1  ;;  %4750 = vmatprep.subr.bf16.mxu0 %v5143_v2  ;;  %v5163_v1 = vld [vmem:[#allocation10 + $0x124] ss:$24 sps:$4 sm:$0xff]   ;;  %v5164_v2 = vld [vmem:[#allocation10 + $0x128] ss:$24 sps:$4 sm:$0xff]  }
 0x1c2   :  { %4772 = vmatprep.subr.bf16.mxu1 %v5144_v3  ;;  %v5166_v3 = vld [vmem:[#allocation10 + $0x12c] ss:$24 sps:$4 sm:$0xff]  }
 0x1c4   :  { %4751 = vmatpush3.bf16.msra.mxu0 %v5145_v4  ;;  %v5167_v4 = vld [vmem:[#allocation10 + $0xf0] ss:$24 sps:$4 sm:$0xff]  }
 0x1c5   :  { %4773 = vmatpush3.bf16.msra.mxu1 %v5146_v5  ;;  %4752 = vmatprep.subr.bf16.mxu0 %v5147_v6  ;;  %v5169_v5 = vld [vmem:[#allocation10 + $0xf4] ss:$24 sps:$4 sm:$0xff]   ;;  %v5170_v6 = vld [vmem:[#allocation10 + $0xf8] ss:$24 sps:$4 sm:$0xff]  }
 0x1c6   :  { %4774 = vmatprep.subr.bf16.mxu1 %v5148_v7  ;;  %v5172_v7 = vld [vmem:[#allocation10 + $0xfc] ss:$24 sps:$4 sm:$0xff]  }
 0x1c8   :  { %4753 = vmatpush3.bf16.msra.mxu0 %v5149_v8  ;;  %v5175_v8 = vld [vmem:[#allocation10 + $0xc4] ss:$24 sps:$4 sm:$0xff]  }
 0x1c9   :  { %4775 = vmatpush3.bf16.msra.mxu1 %v5150_v9  ;;  %4754 = vmatprep.subr.bf16.mxu0 %v5151_v10  ;;  %v5178_v9 = vld [vmem:[#allocation10 + $0xcc] ss:$24 sps:$4 sm:$0xff]   ;;  %v5173_v10 = vld [vmem:[#allocation10 + $0xc0] ss:$24 sps:$4 sm:$0xff]  }
 0x1ca   :  { %4776 = vmatprep.subr.bf16.mxu1 %v5152_v11  ;;  %v5176_v11 = vld [vmem:[#allocation10 + $0xc8] ss:$24 sps:$4 sm:$0xff]  }
 0x1cc   :  { %4755 = vmatpush3.bf16.msra.mxu0 %v5153_v12  ;;  %v5181_v12 = vld [vmem:[#allocation10 + $0x94] ss:$24 sps:$4 sm:$0xff]  }
 0x1cd   :  { %4777 = vmatpush3.bf16.msra.mxu1 %v5154_v13  ;;  %1501 = vmatprep.subr.bf16.mxu0 %v5157_v52  ;;  %v5184_v13 = vld [vmem:[#allocation10 + $0x9c] ss:$24 sps:$4 sm:$0xff]  }
 0x1ce   :  { %1544 = vmatprep.subr.bf16.mxu1 %v5160_v54  ;;  %v5214_v52 = vld [vmem:[#allocation10 + $0xd4] ss:$24 sps:$4 sm:$0xff]   ;;  %v5217_v54 = vld [vmem:[#allocation10 + $0xa4] ss:$24 sps:$4 sm:$0xff]  }
 0x1cf   :  { %4461 = vmatmul.mubr.msk.bf16.vlgmr.msra.gmra.mxu0 %vm4460_vm5, %v5998_v49 }
 0x1d0   :  { %4465 = vmatmul.mubr.msk.bf16.vlgmr.msra.gmra.mxu1 %vm4464_vm7, %v5998_v49  ;;  %1533 = vmatprep.mubr.bf16.mxu0 %v5997_v0 }
 0x1d1   :  { %1576 = vmatprep.mubr.bf16.mxu1 %v5997_v0  ;;  %1502 = vmatpush1.bf16.msra.mxu0 %v5155_v51  ;;  %v5209_v51 = vld [vmem:[#allocation10 + $0x100] ss:$24 sps:$4 sm:$0xff]  }
 0x1d2   :  { %1545 = vmatpush1.bf16.msra.mxu1 %v5158_v53  ;;  %1503 = vmatprep.subr.bf16.mxu0 %v5163_v1  ;;  %v5212_v53 = vld [vmem:[#allocation10 + $0xd0] ss:$24 sps:$4 sm:$0xff]  }
 0x1d3   :  { %1546 = vmatprep.subr.bf16.mxu1 %v5166_v3 }
 0x1d5   :  { %1504 = vmatpush1.bf16.msra.mxu0 %v5161_v63  ;;  %v6289_v63 = vshrl.u32 %v386_v37, 7 }
 0x1d6   :  { %1547 = vmatpush1.bf16.msra.mxu1 %v5164_v2  ;;  %1505 = vmatprep.subr.bf16.mxu0 %v5169_v5  ;;  %v1229_v2 = vld [vmem:[#allocation11] sm:$0x3f] }
 0x1d7   :  { %1548 = vmatprep.subr.bf16.mxu1 %v5172_v7  ;;  %v1241_v1 = vsub.s32 2, %v6289_v63 }
 0x1d9   :  { %1506 = vmatpush1.bf16.msra.mxu0 %v5167_v4  ;;  %v1242_v5 = vrot.slane %v1229_v2, %v1241_v1 }
 0x1da   :  { %1549 = vmatpush1.bf16.msra.mxu1 %v5170_v6  ;;  %1507 = vmatprep.subr.bf16.mxu0 %v5175_v8  ;;  %v6295_v8 = vsub.s32 0, %v6289_v63 }
 0x1db   :  { %1550 = vmatprep.subr.bf16.mxu1 %v5178_v9 }
 0x1dd   :  { %1508 = vmatpush1.bf16.msra.mxu0 %v5173_v10 }
 0x1de   :  { %1551 = vmatpush1.bf16.msra.mxu1 %v5176_v11  ;;  %1509 = vmatprep.subr.bf16.mxu0 %v5181_v12  ;;  %v1245_v11 = vsub.s32 3, %v6289_v63 }
 0x1df   :  { %1552 = vmatprep.subr.bf16.mxu1 %v5184_v13 }
 0x1e1   :  { %1510 = vmatpush1.bf16.msra.mxu0 %v5179_v14  ;;  %v1234_v14 = vrot.slane %v1229_v2, %v6295_v8 }
 0x1e2   :  { %1553 = vmatpush1.bf16.msra.mxu1 %v5182_v15 }
 0x26f   :  { %v4712_v16 = vpop.f32.mrf.mxu0 }
 0x270   :  { %v4734_v17 = vpop.f32.mrf.mxu1 }
 0x271   :  { %v4713_v18 = vpop.f32.mrf.mxu0 }
 0x272   :  { %v4735_v19 = vpop.f32.mrf.mxu1  ;;  %v4714_v21 = vadd.f32 %v4713_v18, %v4712_v16  ;;  %v5187_v16 = vld [vmem:[#allocation10 + $0x64] ss:$24 sps:$4 sm:$0xff]   ;;  %v5185_v18 = vld [vmem:[#allocation10 + $0x60] ss:$24 sps:$4 sm:$0xff]  }
 0x273   :  { %v4715_v20 = vpop.f32.mrf.mxu0  ;;  %v4736_v30 = vadd.f32 %v4735_v19, %v4734_v17  ;;  %v5190_v17 = vld [vmem:[#allocation10 + $0x6c] ss:$24 sps:$4 sm:$0xff]   ;;  %1511 = vmatprep.subr.bf16.mxu0 %v5187_v16  ;;  %v5188_v19 = vld [vmem:[#allocation10 + $0x68] ss:$24 sps:$4 sm:$0xff]   ;;  %v1246_v16 = vrot.slane %v1229_v2, %v1245_v11 }
 0x274   :  { %v4737_v22 = vpop.f32.mrf.mxu1  ;;  %v1008_v25 = vadd.f32 %v4714_v21, %v587_v23  ;;  %1554 = vmatprep.subr.bf16.mxu1 %v5190_v17  ;;  %v5196_v21 = vld [vmem:[#allocation10 + $0x3c] ss:$24 sps:$4 sm:$0xff]   ;;  %1512 = vmatpush1.bf16.msra.mxu0 %v5185_v18  ;;  %v5194_v23 = vld [vmem:[#allocation10 + $0x38] ss:$24 sps:$4 sm:$0xff]  }
 0x275   :  { %v4716_v24 = vpop.f32.mrf.mxu0  ;;  %1555 = vmatpush1.bf16.msra.mxu1 %v5188_v19 }
 0x276   :  { %v4717_v26 = vadd.f32 %v4716_v24, %v4715_v20  ;;  %v4738_v27 = vpop.f32.mrf.mxu1  ;;  %v1049_v33 = vadd.f32 %v4736_v30, %v1008_v25  ;;  %v5193_v20 = vld [vmem:[#allocation10 + $0x34] ss:$24 sps:$4 sm:$0xff]   ;;  %v5199_v24 = vld [vmem:[#allocation10 + $0x4] ss:$24 sps:$4 sm:$0xff]   ;;  %1556 = vmatprep.subr.bf16.mxu1 %v5196_v21 }
 0x277   :  { %v4739_v39 = vadd.f32 %v4738_v27, %v4737_v22  ;;  %v5191_v22 = vld [vmem:[#allocation10 + $0x30] ss:$24 sps:$4 sm:$0xff]   ;;  %1513 = vmatprep.subr.bf16.mxu0 %v5193_v20  ;;  %v5202_v25 = vld [vmem:[#allocation10 + $0xc] ss:$24 sps:$4 sm:$0xff]   ;;  %v6303_v20 = vsub.s32 1, %v6289_v63 }
 0x278   :  { %v1011_v34 = vadd.f32 %v4717_v26, %v588_v28  ;;  %1514 = vmatpush1.bf16.msra.mxu0 %v5191_v22  ;;  %v5197_v26 = vld [vmem:[#allocation10] ss:$24 sps:$4 sm:$0xff]   ;;  %v5205_v28 = vld [vmem:[#allocation10 + $0x164] ss:$24 sps:$4 sm:$0xff]  }
 0x279   :  { %1557 = vmatpush1.bf16.msra.mxu1 %v5194_v23  ;;  %1515 = vmatprep.subr.bf16.mxu0 %v5199_v24  ;;  %v5200_v27 = vld [vmem:[#allocation10 + $0x8] ss:$24 sps:$4 sm:$0xff]  }
 0x27a   :  { %v1052_v44 = vadd.f32 %v4739_v39, %v1011_v34  ;;  %1558 = vmatprep.subr.bf16.mxu1 %v5202_v25  ;;  %v1238_v25 = vrot.slane %v1229_v2, %v6303_v20 }
 0x27c   :  { %1516 = vmatpush1.bf16.msra.mxu0 %v5197_v26 }
 0x27d   :  { %1559 = vmatpush1.bf16.msra.mxu1 %v5200_v27  ;;  %1587 = vmatprep.subr.bf16.mxu0 %v5205_v28 }
 0x28f   :  { %v4756_v29 = vpop.f32.mrf.mxu0 }
 0x290   :  { %v4778_v31 = vpop.f32.mrf.mxu1 }
 0x291   :  { %v4757_v32 = vpop.f32.mrf.mxu0 }
 0x292   :  { %v4758_v35 = vadd.f32 %v4757_v32, %v4756_v29  ;;  %v4779_v36 = vpop.f32.mrf.mxu1 }
 0x293   :  { %v4759_v38 = vpop.f32.mrf.mxu0  ;;  %v4780_v41 = vadd.f32 %v4779_v36, %v4778_v31 }
 0x294   :  { %v1090_v40 = vadd.f32 %v4758_v35, %v1049_v33  ;;  %v4781_v42 = vpop.f32.mrf.mxu1 }
 0x295   :  { %v4760_v43 = vpop.f32.mrf.mxu0 }
 0x296   :  { %v4761_v45 = vadd.f32 %v4760_v43, %v4759_v38  ;;  %v4782_v46 = vpop.f32.mrf.mxu1  ;;  %v1131_v47 = vadd.f32 %v4780_v41, %v1090_v40  ;;  %v4466_v38 = vld [vmem:[#allocation7] ss:$0 sm:$0xff] }
 0x297   :  { %v4783_v49 = vadd.f32 %v4782_v46, %v4781_v42  ;;  %v4467_v42 = vld [vmem:[#allocation8] ss:$0 sm:$0xff]  ;;  %v5203_v46 = vld [vmem:[#allocation10 + $0x160] ss:$24 sps:$4 sm:$0xff]  }
 0x298   :  { %v1093_v48 = vadd.f32 %v4761_v45, %v1052_v44  ;;  %1139 = vadd.xlane.f32.xlu1 %v1131_v47 }
 0x29a   :  { %v1134_v50 = vadd.f32 %v4783_v49, %v1093_v48  ;;  %v5208_v48 = vld [vmem:[#allocation10 + $0x134] ss:$24 sps:$4 sm:$0xff]   ;;  %v5206_v49 = vld [vmem:[#allocation10 + $0x130] ss:$24 sps:$4 sm:$0xff]  }
 0x29c   :  { %1141 = vadd.xlane.f32.xlu1 %v1134_v50 }
 0x321   :  { %v1140_v55 = vpop.xlane.xlu1 %1139 }
 0x322   :  { %v1144_v56 = vmul.f32 0.0078125, %v1140_v55  ;;  %v5215_v55 = vld [vmem:[#allocation10 + $0xa0] ss:$24 sps:$4 sm:$0xff]  }
 0x324   :  { %v6265_v57 = vsub.f32 %v1131_v47, %v1144_v56  ;;  %v5220_v56 = vld [vmem:[#allocation10 + $0x74] ss:$24 sps:$4 sm:$0xff]  }
 0x325   :  { %v1142_v58 = vpop.xlane.xlu1 %1141 }
 0x326   :  { %v1145_v59 = vmul.f32 0.0078125, %v1142_v58  ;;  %v1148_v60 = vmul.f32 %v6265_v57, %v6265_v57  ;;  %v5223_v58 = vld [vmem:[#allocation10 + $0x44] ss:$24 sps:$4 sm:$0xff]  }
 0x328   :  { %v6269_v61 = vsub.f32 %v1134_v50, %v1145_v59  ;;  %1150 = vadd.xlane.f32.xlu0 %v1148_v60  ;;  %v5211_v50 = vld [vmem:[#allocation10 + $0x104] ss:$24 sps:$4 sm:$0xff]   ;;  %v5221_v59 = vld [vmem:[#allocation10 + $0x40] ss:$24 sps:$4 sm:$0xff]   ;;  %v5226_v60 = vld [vmem:[#allocation10 + $0x14] ss:$24 sps:$4 sm:$0xff]  }
 0x32a   :  { %v1149_v62 = vmul.f32 %v6269_v61, %v6269_v61 }
 0x32c   :  { %1152 = vadd.xlane.f32.xlu1 %v1149_v62  ;;  %v5999_v62 = vmov 0.0  }
 0x32d   :  { %4885 = vmatprep.subr.bf16.mxu1 %v5999_v62 }
 0x3b1   :  { %v1151_v29 = vpop.xlane.xlu0 %1150 }
 0x3b2   :  { %v1154_v30 = vmul.f32 0.0078125, %v1151_v29  ;;  %v1249_v29 = vsub.s32 4, %v6289_v63 }
 0x3b4   :  { %v1156_v31 = vadd.f32 1e-12, %v1154_v30  ;;  %v1253_v30 = vsub.s32 5, %v6289_v63 }
 0x3b5   :  { %v1153_v32 = vpop.xlane.xlu1 %1152 }
 0x3b6   :  { %5415 = vrsqrt.f32 %v1156_v31  ;;  %v1155_v33 = vmul.f32 0.0078125, %v1153_v32  ;;  %v1250_v32 = vrot.slane %v1229_v2, %v1249_v29 }
 0x3b8   :  { %v1157_v34 = vadd.f32 1e-12, %v1155_v33 }
 0x3ba   :  { %5417 = vrsqrt.f32 %v1157_v34  ;;  %v1254_v34 = vrot.slane %v1229_v2, %v1253_v30 }
 0x3c3   :  { %v5416_v35 = vpop.eup %5415 }
 0x3c4   :  { %v1160_v36 = vmul.f32 %v5416_v35, %v6265_v57  ;;  %v5218_v57 = vld [vmem:[#allocation10 + $0x70] ss:$24 sps:$4 sm:$0xff]  }
 0x3c6   :  { %v1168_v41 = vmul.f32 %v4466_v38, %v1160_v36 }
 0x3c7   :  { %v5418_v39 = vpop.eup %5417 }
 0x3c8   :  { %v1161_v40 = vmul.f32 %v5418_v39, %v6269_v61  ;;  %v6275_v44 = vadd.f32 %v4467_v42, %v1168_v41  ;;  %v5224_v61 = vld [vmem:[#allocation10 + $0x10] ss:$24 sps:$4 sm:$0xff]  }
 0x3ca   :  { %v1169_v43 = vmul.f32 %v4466_v38, %v1161_v40 }
 0x3cc   :  { %v6277_v45 = vadd.f32 %v4467_v42, %v1169_v43 }
 0x3ce   :  { %v1180_v47 = vpack.c.bf16 %v6277_v45, %v6275_v44 }
 0x3d0   :  { %1534 = vmatmul.mubr.bf16.vlgmr.msra.gmra.mxu0 %v1180_v47  ;;  %1577 = vmatmul.mubr.bf16.vlgmr.msra.gmra.mxu1 %v1180_v47 }
 0x3d1   :  { %1588 = vmatpush1.bf16.msra.mxu0 %v5203_v46  ;;  %1619 = vmatprep.mubr.bf16.mxu0 %v5997_v0 }
 0x3d2   :  { %1589 = vmatprep.subr.bf16.mxu0 %v5208_v48  ;;  %4887 = vmatprep.mubr.msk.bf16.mxu1 %vm6000_vm8, %v5999_v62 }
 0x3d5   :  { %1590 = vmatpush1.bf16.msra.mxu0 %v5206_v49 }
 0x3d6   :  { %1591 = vmatprep.subr.bf16.mxu0 %v5211_v50 }
 0x3d9   :  { %1592 = vmatpush1.bf16.msra.mxu0 %v5209_v51 }
 0x3da   :  { %1593 = vmatprep.subr.bf16.mxu0 %v5214_v52 }
 0x3dd   :  { %1594 = vmatpush1.bf16.msra.mxu0 %v5212_v53  ;;  %v6325_v53 = vld [vmem:[%s6576_s27] sm:$0xff] }
 0x3de   :  { %1595 = vmatprep.subr.bf16.mxu0 %v5217_v54 }
 0x3e1   :  { %1596 = vmatpush1.bf16.msra.mxu0 %v5215_v55 }
 0x3e2   :  { %1597 = vmatprep.subr.bf16.mxu0 %v5220_v56 }
 0x3e5   :  { %1598 = vmatpush1.bf16.msra.mxu0 %v5218_v57 }
 0x3e6   :  { %1599 = vmatprep.subr.bf16.mxu0 %v5223_v58 }
 0x3e9   :  { %1600 = vmatpush1.bf16.msra.mxu0 %v5221_v59 }
 0x3ea   :  { %1601 = vmatprep.subr.bf16.mxu0 %v5226_v60  ;;  %v6330_v60 = vld [vmem:[%s6576_s27 + $0x8] sm:$0xff] }
 0x3ed   :  { %1602 = vmatpush1.bf16.msra.mxu0 %v5224_v61 }
 0x3ee   :  { %4909 = vmatprep.subr.bf16.mxu0 %v5999_v62 }
 0x3f0   :  { %1620 = vmatmul.mubr.bf16.vlgmr.msra.gmra.mxu0 %v1180_v47 }
 0x3f1   :  { %4925 = vmatprep.mubr.msk.bf16.mxu0 %vm6000_vm8, %v5999_v62 }
 0x490   :  { %v1535_v3 = vpop.f32.mrf.mxu0  ;;  %v1578_v4 = vpop.f32.mrf.mxu1 }
 0x491   :  { %v1579_v10 = vadd.f32 %v1578_v4, %v1242_v5  ;;  %v1536_v19 = vadd.f32 %v1535_v3, %v1234_v14 }
 0x492   :  { %v1580_v6 = vpop.f32.mrf.mxu1  ;;  %v1537_v7 = vpop.f32.mrf.mxu0 }
 0x493   :  { %v1581_v21 = vadd.f32 %v1580_v6, %v1246_v16  ;;  %v1538_v27 = vadd.f32 %v1537_v7, %v1238_v25 }
 0x494   :  { %v1582_v9 = vpop.f32.mrf.mxu1  ;;  %v1539_v37 = vpop.f32.mrf.mxu0 }
 0x495   :  { %v1583_v12 = vadd.f32 %v1582_v9, %v1242_v5  ;;  %v1540_v17 = vadd.f32 %v1539_v37, %v1234_v14 }
 0x496   :  { %v1584_v15 = vpop.f32.mrf.mxu1  ;;  %v1541_v23 = vpop.f32.mrf.mxu0 }
 0x497   :  { %v1632_v13 = vpack.c.bf16 %v1583_v12, %v1579_v10  ;;  %v1585_v18 = vadd.f32 %v1584_v15, %v1246_v16  ;;  %v1630_v22 = vpack.c.bf16 %v1540_v17, %v1536_v19  ;;  %v1542_v26 = vadd.f32 %v1541_v23, %v1238_v25 }
 0x499   :  { %4886 = vmatpush3.bf16.xpose.msra.mxu1 %v1632_v13  ;;  %v1633_v24 = vpack.c.bf16 %v1585_v18, %v1581_v21  ;;  %v1631_v28 = vpack.c.bf16 %v1542_v26, %v1538_v27 }
 0x49a   :  { %4891 = vmatprep.subr.bf16.mxu1 %v5999_v62 }
 0x4a0   :  { %4888 = vmatmul.mubr.bf16.vlgmr.msra.gmra.mxu1 %v1630_v22 }
 0x4a1   :  { %4892 = vmatpush3.bf16.xpose.msra.mxu1 %v1633_v24  ;;  %4893 = vmatprep.mubr.msk.bf16.mxu1 %vm6000_vm8, %v5999_v62 }
 0x4a2   :  { %4897 = vmatprep.subr.bf16.mxu1 %v5999_v62 }
 0x4a8   :  { %4894 = vmatmul.mubr.bf16.vlgmr.msra.gmra.mxu1 %v1631_v28 }
 0x4a9   :  { %4899 = vmatprep.mubr.msk.bf16.mxu1 %vm6000_vm8, %v5999_v62 }
 0x4b0   :  { %v1621_v31 = vpop.f32.mrf.mxu0 }
 0x4b1   :  { %v6317_v36 = vadd.f32 %v1621_v31, %v1250_v32 }
 0x4b2   :  { %v1623_v33 = vpop.f32.mrf.mxu0 }
 0x4b3   :  { %v1624_v40 = vadd.f32 %v1623_v33, %v1254_v34  ;;  %v5228_v33 = vld [vmem:[#allocation13 + $0x30] sm:$0xff]  }
 0x4b4   :  { %v1625_v35 = vpop.f32.mrf.mxu0 }
 0x4b5   :  { %v6319_v38 = vadd.f32 %v1625_v35, %v1250_v32  ;;  %v5227_v32 = vld [vmem:[#allocation13 + $0x38] sm:$0xff]   ;;  %v5230_v35 = vld [vmem:[#allocation13 + $0x20] sm:$0xff]  }
 0x4b6   :  { %v1627_v39 = vpop.f32.mrf.mxu0  ;;  %4910 = vmatpush3.bf16.msra.mxu0 %v5227_v32  ;;  %v5238_v32 = vld [vmem:[#allocation19 + $0x60] ss:$8 sps:$4 sm:$0xff]  }
 0x4b7   :  { %v1634_v41 = vpack.c.bf16 %v6319_v38, %v6317_v36  ;;  %v1628_v42 = vadd.f32 %v1627_v39, %v1254_v34  ;;  %4911 = vmatprep.subr.bf16.mxu0 %v5999_v62  ;;  %v5229_v34 = vld [vmem:[#allocation13 + $0x28] sm:$0xff]   ;;  %v5234_v38 = vld [vmem:[#allocation13] sm:$0xff]  }
 0x4b8   :  { %v5233_v36 = vld [vmem:[#allocation13 + $0x8] sm:$0xff]  }
 0x4b9   :  { %v1635_v43 = vpack.c.bf16 %v1628_v42, %v1624_v40 }
 0x4ba   :  { %4912 = vmatpush3.bf16.msra.mxu0 %v5228_v33  ;;  %v5240_v33 = vld [vmem:[#allocation19 + $0x64] ss:$8 sps:$4 sm:$0xff]  }
 0x4bb   :  { %4898 = vmatpush3.bf16.msra.mxu1 %v1635_v43  ;;  %4913 = vmatprep.subr.bf16.mxu0 %v5999_v62 }
 0x4bc   :  { %4903 = vmatprep.subr.bf16.mxu1 %v5999_v62 }
 0x4be   :  { %4914 = vmatpush3.bf16.msra.mxu0 %v5229_v34  ;;  %v5243_v34 = vld [vmem:[#allocation19 + $0x54] ss:$8 sps:$4 sm:$0xff]  }
 0x4bf   :  { %4915 = vmatprep.subr.bf16.mxu0 %v5999_v62 }
 0x4c2   :  { %4916 = vmatpush3.bf16.msra.mxu0 %v5230_v35  ;;  %v5246_v35 = vld [vmem:[#allocation19 + $0x44] ss:$8 sps:$4 sm:$0xff]  }
 0x4c3   :  { %4917 = vmatprep.subr.bf16.mxu0 %v5999_v62 }
 0x560   :  { %v1670_v46 = vpop.f32.mrf.mxu1 }
 0x561   :  { %v1677_v56 = vmul.f32 0.125, %v1670_v46 }
 0x562   :  { %v4889_v47 = vpop.f32.mrf.mxu1 }
 0x563   :  { %v1679_v4 = vadd.f32 %v1677_v56, %v6325_v53 }
 0x564   :  { %v1673_v48 = vpop.f32.mrf.mxu1 }
 0x565   :  { %v1678_v2 = vmul.f32 0.125, %v1673_v48  ;;  %v1682_v5 = vsel %vm1681_vm9, %v1679_v4, -inf }
 0x566   :  { %v4890_v49 = vpop.f32.mrf.mxu1 }
 0x567   :  { %v1680_v6 = vadd.f32 %v1678_v2, %v6330_v60 }
 0x568   :  { %v1739_v50 = vpop.f32.mrf.mxu1 }
 0x569   :  { %v1746_v51 = vmul.f32 0.125, %v1739_v50  ;;  %v1685_v7 = vsel %vm1681_vm9, %v1680_v6, -inf }
 0x56a   :  { %v4895_v52 = vpop.f32.mrf.mxu1 }
 0x56b   :  { %v1748_v54 = vadd.f32 %v1746_v51, %v6325_v53 }
 0x56c   :  { %v1742_v55 = vpop.f32.mrf.mxu1 }
 0x56d   :  { %v1747_v57 = vmul.f32 0.125, %v1742_v55  ;;  %v1750_v58 = vsel %vm1681_vm9, %v1748_v54, -inf }
 0x56e   :  { %1751 = vmax.xlane.f32.xlu1 %v1750_v58  ;;  %v4896_v59 = vpop.f32.mrf.mxu1  ;;  %v5232_v58 = vld [vmem:[#allocation13 + $0x10] sm:$0xff]  }
 0x56f   :  { %v1749_v61 = vadd.f32 %v1747_v57, %v6330_v60  ;;  %v5231_v57 = vld [vmem:[#allocation13 + $0x18] sm:$0xff]  }
 0x570   :  { %4918 = vmatpush3.bf16.msra.mxu0 %v5231_v57 }
 0x571   :  { %v1753_v3 = vsel %vm1681_vm9, %v1749_v61, -inf  ;;  %4919 = vmatprep.subr.bf16.mxu0 %v5999_v62 }
 0x572   :  { %1754 = vmax.xlane.f32.xlu1 %v1753_v3 }
 0x574   :  { %4920 = vmatpush3.bf16.msra.mxu0 %v5232_v58 }
 0x575   :  { %4921 = vmatprep.subr.bf16.mxu0 %v5999_v62 }
 0x576   :  { %1683 = vmax.xlane.f32.xlu1 %v1682_v5 }
 0x578   :  { %4922 = vmatpush3.bf16.msra.mxu0 %v5233_v36 }
 0x579   :  { %4923 = vmatprep.subr.bf16.mxu0 %v5999_v62 }
 0x57a   :  { %1686 = vmax.xlane.f32.xlu1 %v1685_v7 }
 0x57c   :  { %4924 = vmatpush3.bf16.msra.mxu0 %v5234_v38  ;;  %v4527_v38 = vld [vmem:[#allocation16] ss:$0 sm:$0xff] }
 0x5f7   :  { %v1752_v9 = vpop.xlane.xlu1 %1751 }
 0x5f8   :  { %v1756_v10 = vsub.f32 %v1748_v54, %v1752_v9 }
 0x5fa   :  { %v1758_v12 = vmul.f32 1.442695, %v1756_v10 }
 0x5fb   :  { %v1755_v37 = vpop.xlane.xlu1 %1754 }
 0x5fc   :  { %5419 = vpow2.f32 %v1758_v12  ;;  %v1757_v13 = vsub.f32 %v1749_v61, %v1755_v37  ;;  %v4518_v12 = vld [vmem:[#allocation14] ss:$0 sm:$0xff] }
 0x5fe   :  { %v1760_v14 = vmul.f32 1.442695, %v1757_v13 }
 0x5ff   :  { %v1684_v15 = vpop.xlane.xlu1 %1683 }
 0x600   :  { %5421 = vpow2.f32 %v1760_v14  ;;  %v1688_v16 = vsub.f32 %v1679_v4, %v1684_v15 }
 0x602   :  { %v1690_v17 = vmul.f32 1.442695, %v1688_v16 }
 0x603   :  { %v1687_v18 = vpop.xlane.xlu1 %1686 }
 0x604   :  { %5423 = vpow2.f32 %v1690_v17  ;;  %v1689_v19 = vsub.f32 %v1680_v6, %v1687_v18 }
 0x606   :  { %v1692_v21 = vmul.f32 1.442695, %v1689_v19 }
 0x608   :  { %5425 = vpow2.f32 %v1692_v21  ;;  %v5235_v21 = vld [vmem:[#allocation19 + $0x70] ss:$8 sps:$4 sm:$0xff]  }
 0x609   :  { %v5420_v22 = vpop.eup %5419 }
 0x60a   :  { %v1762_v23 = vsel %vm1681_vm9, %v5420_v22, 0.0 }
 0x60b   :  { %1763 = vadd.xlane.f32.xlu1 %v1762_v23 }
 0x60d   :  { %v5422_v24 = vpop.eup %5421 }
 0x60e   :  { %v1765_v25 = vsel %vm1681_vm9, %v5422_v24, 0.0 }
 0x60f   :  { %1766 = vadd.xlane.f32.xlu1 %v1765_v25 }
 0x611   :  { %v5424_v26 = vpop.eup %5423 }
 0x612   :  { %v1694_v27 = vsel %vm1681_vm9, %v5424_v26, 0.0 }
 0x613   :  { %1695 = vadd.xlane.f32.xlu1 %v1694_v27 }
 0x615   :  { %v5426_v28 = vpop.eup %5425 }
 0x616   :  { %v1697_v31 = vsel %vm1681_vm9, %v5426_v28, 0.0 }
 0x617   :  { %1698 = vadd.xlane.f32.xlu0 %v1697_v31 }
 0x694   :  { %v1764_v39 = vpop.xlane.xlu1 %1763 }
 0x695   :  { %5427 = vrcp.f32 %v1764_v39  ;;  %v5244_v39 = vld [vmem:[#allocation19 + $0x40] ss:$8 sps:$4 sm:$0xff]  }
 0x698   :  { %v1767_v40 = vpop.xlane.xlu1 %1766 }
 0x699   :  { %5429 = vrcp.f32 %v1767_v40  ;;  %v5249_v40 = vld [vmem:[#allocation19 + $0x34] ss:$8 sps:$4 sm:$0xff]  }
 0x69c   :  { %v1696_v42 = vpop.xlane.xlu1 %1695 }
 0x69d   :  { %5431 = vrcp.f32 %v1696_v42  ;;  %v5247_v42 = vld [vmem:[#allocation19 + $0x30] ss:$8 sps:$4 sm:$0xff]  }
 0x6a0   :  { %v1699_v43 = vpop.xlane.xlu0 %1698 }
 0x6a1   :  { %5433 = vrcp.f32 %v1699_v43  ;;  %v5252_v43 = vld [vmem:[#allocation19 + $0x24] ss:$8 sps:$4 sm:$0xff]  }
 0x6a2   :  { %v5428_v46 = vpop.eup %5427 }
 0x6a3   :  { %v1770_v48 = vmul.f32 %v5428_v46, %v5420_v22  ;;  %v5237_v22 = vld [vmem:[#allocation19 + $0x74] ss:$8 sps:$4 sm:$0xff]   ;;  %v5250_v46 = vld [vmem:[#allocation19 + $0x20] ss:$8 sps:$4 sm:$0xff]  }
 0x6a6   :  { %v5430_v47 = vpop.eup %5429 }
 0x6a7   :  { %v1771_v49 = vmul.f32 %v5430_v47, %v5422_v24  ;;  %v5255_v47 = vld [vmem:[#allocation19 + $0x14] ss:$8 sps:$4 sm:$0xff]  }
 0x6a9   :  { %v1772_v50 = vpack.c.bf16 %v1771_v49, %v1770_v48  ;;  %v5253_v48 = vld [vmem:[#allocation19 + $0x10] ss:$8 sps:$4 sm:$0xff]   ;;  %v5258_v49 = vld [vmem:[#allocation19 + $0x4] ss:$8 sps:$4 sm:$0xff]  }
 0x6aa   :  { %v5432_v51 = vpop.eup %5431 }
 0x6ab   :  { %4900 = vmatmul.mubr.msk.bf16.vlgmr.msra.gmra.mxu1 %vm1681_vm9, %v1772_v50  ;;  %v1702_v54 = vmul.f32 %v5432_v51, %v5424_v26  ;;  %v5256_v50 = vld [vmem:[#allocation19] ss:$8 sps:$4 sm:$0xff]  }
 0x6ac   :  { %4904 = vmatpush3.bf16.msra.mxu1 %v1634_v41  ;;  %4905 = vmatprep.mubr.msk.bf16.mxu1 %vm6000_vm8, %v5999_v62 }
 0x6ad   :  { %2125 = vmatprep.subr.bf16.mxu1 %v5237_v22  ;;  %v5272_v22 = vld [vmem:[#allocation20 + $0x8] sm:$0xff]  }
 0x6ae   :  { %v5434_v52 = vpop.eup %5433 }
 0x6af   :  { %v1703_v55 = vmul.f32 %v5434_v52, %v5426_v28 }
 0x6b1   :  { %v1704_v56 = vpack.c.bf16 %v1703_v55, %v1702_v54 }
 0x6b3   :  { %4906 = vmatmul.mubr.msk.bf16.vlgmr.msra.gmra.mxu1 %vm1681_vm9, %v1704_v56 }
 0x6b4   :  { %2157 = vmatprep.mubr.bf16.mxu1 %v5997_v0  ;;  %2126 = vmatpush1.bf16.msra.mxu1 %v5235_v21  ;;  %v5271_v21 = vld [vmem:[#allocation20 + $0x48] sm:$0xff]  }
 0x6b5   :  { %2127 = vmatprep.subr.bf16.mxu1 %v5240_v33 }
 0x6b8   :  { %2128 = vmatpush1.bf16.msra.mxu1 %v5238_v32 }
 0x6b9   :  { %2129 = vmatprep.subr.bf16.mxu1 %v5243_v34 }
 0x76b   :  { %v1810_v41 = vpop.f32.mrf.mxu1 }
 0x76d   :  { %v4901_v59 = vpop.f32.mrf.mxu1 }
 0x76f   :  { %v1813_v61 = vpop.f32.mrf.mxu1 }
 0x771   :  { %v4902_v2 = vpop.f32.mrf.mxu1 }
 0x772   :  { %v4528_v2 = vld [vmem:[#allocation17] ss:$0 sm:$0xff] }
 0x773   :  { %v1854_v3 = vpop.f32.mrf.mxu1 }
 0x774   :  { %v1855_v6 = vadd.f32 %v1854_v3, %v1810_v41 }
 0x775   :  { %v4907_v4 = vpop.f32.mrf.mxu1 }
 0x777   :  { %v1857_v5 = vpop.f32.mrf.mxu1 }
 0x778   :  { %v1858_v7 = vadd.f32 %v1857_v5, %v1813_v61 }
 0x779   :  { %v4908_v9 = vpop.f32.mrf.mxu1 }
 0x77a   :  { %v1861_v10 = vpack.c.bf16 %v1858_v7, %v1855_v6  ;;  %v5259_v7 = vld [vmem:[#allocation20 + $0x78] sm:$0xff]  }
 0x77b   :  { %v5260_v9 = vld [vmem:[#allocation20 + $0x38] sm:$0xff]   ;;  %4801 = vmatprep.subr.bf16.mxu0 %v5259_v7 }
 0x77c   :  { %4926 = vmatmul.mubr.bf16.vlgmr.msra.gmra.mxu0 %v1861_v10  ;;  %v5261_v10 = vld [vmem:[#allocation20 + $0x70] sm:$0xff]  }
 0x77d   :  { %4802 = vmatpush3.bf16.msra.mxu0 %v5260_v9 }
 0x77e   :  { %4803 = vmatprep.subr.bf16.mxu0 %v5261_v10 }
 0x83c   :  { %v1967_v37 = vpop.f32.mrf.mxu0 }
 0x83d   :  { %v1968_v13 = vadd.f32 %v4518_v12, %v1967_v37  ;;  %v5263_v37 = vld [vmem:[#allocation20 + $0x68] sm:$0xff]  }
 0x83e   :  { %v4927_v14 = vpop.f32.mrf.mxu0 }
 0x83f   :  { %v1974_v15 = vadd.f32 %v1968_v13, %v6275_v44  ;;  %v5264_v13 = vld [vmem:[#allocation20 + $0x28] sm:$0xff]   ;;  %v5265_v14 = vld [vmem:[#allocation20 + $0x60] sm:$0xff]  }
 0x840   :  { %v1970_v16 = vpop.f32.mrf.mxu0 }
 0x841   :  { %v1971_v17 = vadd.f32 %v4518_v12, %v1970_v16  ;;  %1978 = vadd.xlane.f32.xlu1 %v1974_v15  ;;  %v5262_v12 = vld [vmem:[#allocation20 + $0x30] sm:$0xff]   ;;  %v5267_v16 = vld [vmem:[#allocation20 + $0x58] sm:$0xff]  }
 0x842   :  { %v4928_v18 = vpop.f32.mrf.mxu0  ;;  %4804 = vmatpush3.bf16.msra.mxu0 %v5262_v12 }
 0x843   :  { %v1975_v19 = vadd.f32 %v1971_v17, %v6277_v45  ;;  %v5241_v45 = vld [vmem:[#allocation19 + $0x50] ss:$8 sps:$4 sm:$0xff]   ;;  %4805 = vmatprep.subr.bf16.mxu0 %v5263_v37 }
 0x844   :  { %2130 = vmatpush1.bf16.msra.mxu1 %v5241_v45  ;;  %v5268_v17 = vld [vmem:[#allocation20 + $0x18] sm:$0xff]   ;;  %v5269_v18 = vld [vmem:[#allocation20 + $0x50] sm:$0xff]  }
 0x845   :  { %1980 = vadd.xlane.f32.xlu0 %v1975_v19  ;;  %2131 = vmatprep.subr.bf16.mxu1 %v5246_v35 }
 0x846   :  { %4806 = vmatpush3.bf16.msra.mxu0 %v5264_v13 }
 0x847   :  { %4807 = vmatprep.subr.bf16.mxu0 %v5265_v14 }
 0x848   :  { %2132 = vmatpush1.bf16.msra.mxu1 %v5244_v39 }
 0x849   :  { %2133 = vmatprep.subr.bf16.mxu1 %v5249_v40 }
 0x84c   :  { %2134 = vmatpush1.bf16.msra.mxu1 %v5247_v42 }
 0x84d   :  { %2135 = vmatprep.subr.bf16.mxu1 %v5252_v43 }
 0x850   :  { %2136 = vmatpush1.bf16.msra.mxu1 %v5250_v46 }
 0x851   :  { %2137 = vmatprep.subr.bf16.mxu1 %v5255_v47 }
 0x854   :  { %2138 = vmatpush1.bf16.msra.mxu1 %v5253_v48 }
 0x855   :  { %2139 = vmatprep.subr.bf16.mxu1 %v5258_v49 }
 0x858   :  { %2140 = vmatpush1.bf16.msra.mxu1 %v5256_v50 }
 0x8ca   :  { %v1979_v23 = vpop.xlane.xlu1 %1978 }
 0x8cb   :  { %v1982_v24 = vmul.f32 0.0078125, %v1979_v23  ;;  %v5273_v23 = vld [vmem:[#allocation20 + $0x40] sm:$0xff]  }
 0x8cd   :  { %v1984_v25 = vsub.f32 %v1974_v15, %v1982_v24  ;;  %v5266_v15 = vld [vmem:[#allocation20 + $0x20] sm:$0xff]  }
 0x8ce   :  { %v1981_v26 = vpop.xlane.xlu0 %1980  ;;  %4808 = vmatpush3.bf16.msra.mxu0 %v5266_v15  ;;  %v5274_v24 = vld [vmem:[#allocation20] sm:$0xff]  }
 0x8cf   :  { %v1983_v27 = vmul.f32 0.0078125, %v1981_v26  ;;  %v1986_v28 = vmul.f32 %v1984_v25, %v1984_v25  ;;  %4809 = vmatprep.subr.bf16.mxu0 %v5267_v16 }
 0x8d1   :  { %v1985_v31 = vsub.f32 %v1975_v19, %v1983_v27  ;;  %1988 = vadd.xlane.f32.xlu1 %v1986_v28  ;;  %v5270_v19 = vld [vmem:[#allocation20 + $0x10] sm:$0xff]  }
 0x8d2   :  { %4810 = vmatpush3.bf16.msra.mxu0 %v5268_v17 }
 0x8d3   :  { %v1987_v44 = vmul.f32 %v1985_v31, %v1985_v31  ;;  %4811 = vmatprep.subr.bf16.mxu0 %v5269_v18 }
 0x8d5   :  { %1990 = vadd.xlane.f32.xlu0 %v1987_v44 }
 0x8d6   :  { %4812 = vmatpush3.bf16.msra.mxu0 %v5270_v19 }
 0x8d7   :  { %4813 = vmatprep.subr.bf16.mxu0 %v5271_v21 }
 0x8da   :  { %4814 = vmatpush3.bf16.msra.mxu0 %v5272_v22 }
 0x8db   :  { %4815 = vmatprep.subr.bf16.mxu0 %v5273_v23 }
 0x8de   :  { %4816 = vmatpush3.bf16.msra.mxu0 %v5274_v24  ;;  %v4545_v24 = vld [vmem:[#allocation22] ss:$0 sm:$0xff] }
 0x95a   :  { %v1989_v51 = vpop.xlane.xlu1 %1988 }
 0x95b   :  { %v1992_v52 = vmul.f32 0.0078125, %v1989_v51 }
 0x95d   :  { %v1994_v54 = vadd.f32 1e-12, %v1992_v52 }
 0x95e   :  { %v1991_v55 = vpop.xlane.xlu0 %1990 }
 0x95f   :  { %5435 = vrsqrt.f32 %v1994_v54  ;;  %v1993_v56 = vmul.f32 0.0078125, %v1991_v55 }
 0x961   :  { %v1995_v57 = vadd.f32 1e-12, %v1993_v56 }
 0x963   :  { %5437 = vrsqrt.f32 %v1995_v57 }
 0x96c   :  { %v5436_v58 = vpop.eup %5435 }
 0x96d   :  { %v1998_v36 = vmul.f32 %v5436_v58, %v1984_v25  ;;  %v2033_v25 = vld [vmem:[%s6577_s26] sm:$0x3] }
 0x96e   :  { %v2038_v26 = vrot.slane %v2033_v25, %v6295_v8  ;;  %v2042_v27 = vrot.slane %v2033_v25, %v6303_v20 }
 0x96f   :  { %v2006_v61 = vmul.f32 %v4527_v38, %v1998_v36 }
 0x970   :  { %v5438_v41 = vpop.eup %5437 }
 0x971   :  { %v1999_v59 = vmul.f32 %v5438_v41, %v1985_v31  ;;  %v6359_v4 = vadd.f32 %v4528_v2, %v2006_v61 }
 0x973   :  { %v2007_v3 = vmul.f32 %v4527_v38, %v1999_v59 }
 0x975   :  { %v6361_v5 = vadd.f32 %v4528_v2, %v2007_v3 }
 0x977   :  { %v2016_v6 = vpack.c.bf16 %v6361_v5, %v6359_v4 }
 0x979   :  { %2158 = vmatmul.mubr.bf16.vlgmr.msra.gmra.mxu1 %v2016_v6 }
 0x97a   :  { %2779 = vmatprep.mubr.bf16.mxu1 %v5997_v0 }
 0xa39   :  { %v2159_v28 = vpop.f32.mrf.mxu1 }
 0xa3a   :  { %v2160_v31 = vadd.f32 %v2159_v28, %v2038_v26 }
 0xa3b   :  { %v2161_v44 = vpop.f32.mrf.mxu1 }
 0xa3c   :  { %v2168_v32 = vmul.f32 %v2160_v31, %v2160_v31  ;;  %v2162_v33 = vadd.f32 %v2161_v44, %v2042_v27 }
 0xa3d   :  { %v2163_v45 = vpop.f32.mrf.mxu1 }
 0xa3e   :  { %v2172_v34 = vmul.f32 %v2168_v32, %v2160_v31  ;;  %v2169_v35 = vmul.f32 %v2162_v33, %v2162_v33  ;;  %v2164_v39 = vadd.f32 %v2163_v45, %v2038_v26 }
 0xa3f   :  { %v2165_v40 = vpop.f32.mrf.mxu1 }
 0xa40   :  { %v2176_v42 = vmul.f32 0.044715, %v2172_v34  ;;  %v2173_v43 = vmul.f32 %v2169_v35, %v2162_v33  ;;  %v2170_v46 = vmul.f32 %v2164_v39, %v2164_v39  ;;  %v2166_v47 = vadd.f32 %v2165_v40, %v2042_v27  ;;  %v5277_v35 = vld [vmem:[#allocation10 + $0x2d4] ss:$24 sps:$4 sm:$0xff]  }
 0xa41   :  { %v5280_v40 = vld [vmem:[#allocation10 + $0x2dc] ss:$24 sps:$4 sm:$0xff]   ;;  %2747 = vmatprep.subr.bf16.mxu1 %v5277_v35 }
 0xa42   :  { %v2180_v48 = vadd.f32 %v2176_v42, %v2160_v31  ;;  %v2177_v49 = vmul.f32 0.044715, %v2173_v43  ;;  %v2174_v50 = vmul.f32 %v2170_v46, %v2164_v39  ;;  %v2171_v51 = vmul.f32 %v2166_v47, %v2166_v47  ;;  %2790 = vmatprep.subr.bf16.mxu0 %v5280_v40 }
 0xa44   :  { %v2184_v52 = vmul.f32 0.7978846, %v2180_v48  ;;  %v2181_v54 = vadd.f32 %v2177_v49, %v2162_v33  ;;  %v2178_v55 = vmul.f32 0.044715, %v2174_v50  ;;  %v2175_v56 = vmul.f32 %v2171_v51, %v2166_v47  ;;  %v5281_v50 = vld [vmem:[#allocation10 + $0x2a0] ss:$24 sps:$4 sm:$0xff]  }
 0xa45   :  { %v5283_v51 = vld [vmem:[#allocation10 + $0x2a4] ss:$24 sps:$4 sm:$0xff]  }
 0xa46   :  { %v2185_v57 = vmul.f32 0.7978846, %v2181_v54  ;;  %v2182_v58 = vadd.f32 %v2178_v55, %v2164_v39  ;;  %v2179_v36 = vmul.f32 0.044715, %v2175_v56  ;;  %5439 = vtanh.f32 %v2184_v52  ;;  %v5284_v52 = vld [vmem:[#allocation10 + $0x2a8] ss:$24 sps:$4 sm:$0xff]  }
 0xa47   :  { %v5286_v54 = vld [vmem:[#allocation10 + $0x2ac] ss:$24 sps:$4 sm:$0xff]   ;;  %v5287_v55 = vld [vmem:[#allocation10 + $0x270] ss:$24 sps:$4 sm:$0xff]  }
 0xa48   :  { %5441 = vtanh.f32 %v2185_v57  ;;  %v2186_v38 = vmul.f32 0.7978846, %v2182_v58  ;;  %v2183_v41 = vadd.f32 %v2179_v36, %v2166_v47  ;;  %v5289_v56 = vld [vmem:[#allocation10 + $0x274] ss:$24 sps:$4 sm:$0xff]   ;;  %v5290_v57 = vld [vmem:[#allocation10 + $0x278] ss:$24 sps:$4 sm:$0xff]  }
 0xa49   :  { %v5292_v58 = vld [vmem:[#allocation10 + $0x27c] ss:$24 sps:$4 sm:$0xff]  }
 0xa4a   :  { %5443 = vtanh.f32 %v2186_v38  ;;  %v2187_v59 = vmul.f32 0.7978846, %v2183_v41  ;;  %v5295_v36 = vld [vmem:[#allocation10 + $0x244] ss:$24 sps:$4 sm:$0xff]   ;;  %v5293_v41 = vld [vmem:[#allocation10 + $0x240] ss:$24 sps:$4 sm:$0xff]  }
 0xa4b   :  { %v5298_v38 = vld [vmem:[#allocation10 + $0x24c] ss:$24 sps:$4 sm:$0xff]  }
 0xa4c   :  { %5445 = vtanh.f32 %v2187_v59  ;;  %v5296_v59 = vld [vmem:[#allocation10 + $0x248] ss:$24 sps:$4 sm:$0xff]  }
 0xa53   :  { %v5440_v61 = vpop.eup %5439 }
 0xa54   :  { %v2192_v7 = vadd.f32 1.0, %v5440_v61  ;;  %v5301_v61 = vld [vmem:[#allocation10 + $0x214] ss:$24 sps:$4 sm:$0xff]  }
 0xa55   :  { %v5442_v2 = vpop.eup %5441 }
 0xa56   :  { %v2193_v3 = vadd.f32 1.0, %v5442_v2  ;;  %v2196_v14 = vmul.f32 0.5, %v2192_v7  ;;  %v5304_v2 = vld [vmem:[#allocation10 + $0x21c] ss:$24 sps:$4 sm:$0xff]  }
 0xa57   :  { %v5444_v6 = vpop.eup %5443  ;;  %v5307_v7 = vld [vmem:[#allocation10 + $0x1e4] ss:$24 sps:$4 sm:$0xff]  }
 0xa58   :  { %v2194_v9 = vadd.f32 1.0, %v5444_v6  ;;  %v2197_v13 = vmul.f32 0.5, %v2193_v3  ;;  %v2200_v19 = vmul.f32 %v2196_v14, %v2160_v31  ;;  %v5299_v3 = vld [vmem:[#allocation10 + $0x210] ss:$24 sps:$4 sm:$0xff]  }
 0xa59   :  { %v5446_v10 = vpop.eup %5445  ;;  %v5302_v6 = vld [vmem:[#allocation10 + $0x218] ss:$24 sps:$4 sm:$0xff]  }
 0xa5a   :  { %v2198_v12 = vmul.f32 0.5, %v2194_v9  ;;  %v2195_v37 = vadd.f32 1.0, %v5446_v10  ;;  %v2201_v17 = vmul.f32 %v2197_v13, %v2162_v33  ;;  %v5275_v33 = vld [vmem:[#allocation10 + $0x2d0] ss:$24 sps:$4 sm:$0xff]   ;;  %v5310_v9 = vld [vmem:[#allocation10 + $0x1ec] ss:$24 sps:$4 sm:$0xff]  }
 0xa5b   :  { %2748 = vmatpush1.bf16.msra.mxu1 %v5275_v33  ;;  %v5305_v10 = vld [vmem:[#allocation10 + $0x1e0] ss:$24 sps:$4 sm:$0xff]   ;;  %v5316_v13 = vld [vmem:[#allocation10 + $0x1bc] ss:$24 sps:$4 sm:$0xff]   ;;  %v5311_v14 = vld [vmem:[#allocation10 + $0x1b0] ss:$24 sps:$4 sm:$0xff]  }
 0xa5c   :  { %v2199_v15 = vmul.f32 0.5, %v2195_v37  ;;  %v2202_v16 = vmul.f32 %v2198_v12, %v2164_v39  ;;  %v5278_v39 = vld [vmem:[#allocation10 + $0x2d8] ss:$24 sps:$4 sm:$0xff]   ;;  %2749 = vmatprep.subr.bf16.mxu1 %v5283_v51  ;;  %v5308_v12 = vld [vmem:[#allocation10 + $0x1e8] ss:$24 sps:$4 sm:$0xff]  }
 0xa5d   :  { %v5313_v37 = vld [vmem:[#allocation10 + $0x1b4] ss:$24 sps:$4 sm:$0xff]   ;;  %v5335_v51 = vld [vmem:[#allocation10 + $0x220] ss:$24 sps:$4 sm:$0xff]  }
 0xa5e   :  { %v2203_v18 = vmul.f32 %v2199_v15, %v2166_v47  ;;  %v2204_v22 = vpack.c.bf16 %v2202_v16, %v2200_v19  ;;  %v5314_v15 = vld [vmem:[#allocation10 + $0x1b8] ss:$24 sps:$4 sm:$0xff]   ;;  %v5319_v16 = vld [vmem:[#allocation10 + $0x184] ss:$24 sps:$4 sm:$0xff]   ;;  %v5320_v19 = vld [vmem:[#allocation10 + $0x188] ss:$24 sps:$4 sm:$0xff]  }
 0xa5f   :  { %2750 = vmatpush1.bf16.msra.mxu1 %v5281_v50  ;;  %v4563_v33 = vld [vmem:[#allocation25] ss:$0 sm:$0xff]  ;;  %v5337_v50 = vld [vmem:[#allocation10 + $0x224] ss:$24 sps:$4 sm:$0xff]  }
 0xa60   :  { %v2205_v21 = vpack.c.bf16 %v2203_v18, %v2201_v17  ;;  %2751 = vmatprep.subr.bf16.mxu1 %v5289_v56  ;;  %v5322_v17 = vld [vmem:[#allocation10 + $0x18c] ss:$24 sps:$4 sm:$0xff]   ;;  %v5317_v18 = vld [vmem:[#allocation10 + $0x180] ss:$24 sps:$4 sm:$0xff]  }
 0xa61   :  { %v5341_v56 = vld [vmem:[#allocation10 + $0x1c0] ss:$24 sps:$4 sm:$0xff]  }
 0xa62   :  { %2373 = vmatprep.mubr.bf16.mxu0 %v2205_v21  ;;  %v5325_v21 = vld [vmem:[#allocation10 + $0x2e4] ss:$24 sps:$4 sm:$0xff]  }
 0xa63   :  { %2374 = vmatmul.mubr.bf16.vlgmr.msra.gmra.mxu0 %v2204_v22  ;;  %2752 = vmatpush1.bf16.msra.mxu1 %v5287_v55  ;;  %v5343_v55 = vld [vmem:[#allocation10 + $0x1c4] ss:$24 sps:$4 sm:$0xff]  }
 0xa64   :  { %2822 = vmatprep.mubr.bf16.mxu0 %v5997_v0  ;;  %2791 = vmatpush1.bf16.msra.mxu0 %v5278_v39 }
 0xa65   :  { %2792 = vmatprep.subr.bf16.mxu0 %v5286_v54  ;;  %2753 = vmatprep.subr.bf16.mxu1 %v5295_v36  ;;  %v5338_v54 = vld [vmem:[#allocation10 + $0x1f0] ss:$24 sps:$4 sm:$0xff]  }
 0xa66   :  { %v2475_v36 = vld [vmem:[#allocation11 + $0x6] sm:$0x3f] }
 0xa67   :  { %2754 = vmatpush1.bf16.msra.mxu1 %v5293_v41 }
 0xa68   :  { %2793 = vmatpush1.bf16.msra.mxu0 %v5284_v52  ;;  %2755 = vmatprep.subr.bf16.mxu1 %v5301_v61  ;;  %v5340_v52 = vld [vmem:[#allocation10 + $0x1f4] ss:$24 sps:$4 sm:$0xff]  }
 0xa69   :  { %2794 = vmatprep.subr.bf16.mxu0 %v5292_v58  ;;  %v5344_v58 = vld [vmem:[#allocation10 + $0x190] ss:$24 sps:$4 sm:$0xff]  }
 0xa6b   :  { %2756 = vmatpush1.bf16.msra.mxu1 %v5299_v3 }
 0xa6c   :  { %2795 = vmatpush1.bf16.msra.mxu0 %v5290_v57  ;;  %2757 = vmatprep.subr.bf16.mxu1 %v5307_v7  ;;  %v5346_v57 = vld [vmem:[#allocation10 + $0x194] ss:$24 sps:$4 sm:$0xff]  }
 0xa6d   :  { %2796 = vmatprep.subr.bf16.mxu0 %v5298_v38 }
 0xa6f   :  { %2758 = vmatpush1.bf16.msra.mxu1 %v5305_v10 }
 0xa70   :  { %2797 = vmatpush1.bf16.msra.mxu0 %v5296_v59  ;;  %2759 = vmatprep.subr.bf16.mxu1 %v5313_v37  ;;  %v2488_v59 = vrot.slane %v2475_v36, %v1241_v1 }
 0xa71   :  { %2798 = vmatprep.subr.bf16.mxu0 %v5304_v2 }
 0xa73   :  { %2760 = vmatpush1.bf16.msra.mxu1 %v5311_v14 }
 0xa74   :  { %2799 = vmatpush1.bf16.msra.mxu0 %v5302_v6  ;;  %2761 = vmatprep.subr.bf16.mxu1 %v5319_v16 }
 0xa75   :  { %2800 = vmatprep.subr.bf16.mxu0 %v5310_v9 }
 0xa77   :  { %2762 = vmatpush1.bf16.msra.mxu1 %v5317_v18 }
 0xa78   :  { %2801 = vmatpush1.bf16.msra.mxu0 %v5308_v12  ;;  %2833 = vmatprep.subr.bf16.mxu1 %v5325_v21  ;;  %v2480_v12 = vrot.slane %v2475_v36, %v6295_v8  ;;  %v2484_v21 = vrot.slane %v2475_v36, %v6303_v20 }
 0xa79   :  { %2802 = vmatprep.subr.bf16.mxu0 %v5316_v13  ;;  %v2492_v13 = vrot.slane %v2475_v36, %v1245_v11 }
 0xa7c   :  { %2803 = vmatpush1.bf16.msra.mxu0 %v5314_v15 }
 0xa7d   :  { %2804 = vmatprep.subr.bf16.mxu0 %v5322_v17 }
 0xa80   :  { %2805 = vmatpush1.bf16.msra.mxu0 %v5320_v19 }
 0xa81   :  { %4941 = vmatprep.subr.bf16.mxu0 %v5999_v62 }
 0xb23   :  { %v4817_v23 = vpop.f32.mrf.mxu0 }
 0xb25   :  { %v4818_v25 = vpop.f32.mrf.mxu0 }
 0xb26   :  { %v4819_v26 = vadd.f32 %v4818_v25, %v4817_v23 }
 0xb27   :  { %v4820_v27 = vpop.f32.mrf.mxu0 }
 0xb28   :  { %v2376_v28 = vadd.f32 %v4819_v26, %v4545_v24 }
 0xb29   :  { %v4821_v44 = vpop.f32.mrf.mxu0 }
 0xb2a   :  { %v4822_v32 = vadd.f32 %v4821_v44, %v4820_v27  ;;  %v2382_v45 = vadd.f32 %v2376_v28, %v6359_v4 }
 0xb2c   :  { %v2379_v34 = vadd.f32 %v4822_v32, %v4545_v24  ;;  %2386 = vadd.xlane.f32.xlu1 %v2382_v45  ;;  %v4562_v32 = vld [vmem:[#allocation23] ss:$0 sm:$0xff] }
 0xb2e   :  { %v2383_v31 = vadd.f32 %v2379_v34, %v6361_v5 }
 0xb30   :  { %2388 = vadd.xlane.f32.xlu0 %v2383_v31 }
 0xbb5   :  { %v2387_v42 = vpop.xlane.xlu1 %2386 }
 0xbb6   :  { %v2390_v43 = vmul.f32 0.0078125, %v2387_v42  ;;  %v5323_v42 = vld [vmem:[#allocation10 + $0x2e0] ss:$24 sps:$4 sm:$0xff]  }
 0xbb8   :  { %v6372_v46 = vsub.f32 %v2382_v45, %v2390_v43 }
 0xbb9   :  { %v2389_v47 = vpop.xlane.xlu0 %2388 }
 0xbba   :  { %v2391_v48 = vmul.f32 0.0078125, %v2389_v47  ;;  %v2394_v4 = vmul.f32 %v6372_v46, %v6372_v46  ;;  %v5328_v47 = vld [vmem:[#allocation10 + $0x2b4] ss:$24 sps:$4 sm:$0xff]  }
 0xbbc   :  { %v6376_v49 = vsub.f32 %v2383_v31, %v2391_v48  ;;  %2396 = vadd.xlane.f32.xlu1 %v2394_v4  ;;  %v5331_v48 = vld [vmem:[#allocation10 + $0x284] ss:$24 sps:$4 sm:$0xff]   ;;  %v5329_v4 = vld [vmem:[#allocation10 + $0x280] ss:$24 sps:$4 sm:$0xff]  }
 0xbbe   :  { %v2395_v5 = vmul.f32 %v6376_v49, %v6376_v49 }
 0xbc0   :  { %2398 = vadd.xlane.f32.xlu0 %v2395_v5  ;;  %v5332_v5 = vld [vmem:[#allocation10 + $0x250] ss:$24 sps:$4 sm:$0xff]  }
 0xc45   :  { %v2397_v22 = vpop.xlane.xlu1 %2396 }
 0xc46   :  { %v2400_v23 = vmul.f32 0.0078125, %v2397_v22 }
 0xc48   :  { %v2402_v24 = vadd.f32 1e-12, %v2400_v23 }
 0xc49   :  { %v2399_v25 = vpop.xlane.xlu0 %2398 }
 0xc4a   :  { %5447 = vrsqrt.f32 %v2402_v24  ;;  %v2401_v26 = vmul.f32 0.0078125, %v2399_v25  ;;  %v2496_v25 = vrot.slane %v2475_v36, %v1249_v29 }
 0xc4c   :  { %v2403_v27 = vadd.f32 1e-12, %v2401_v26 }
 0xc4e   :  { %5449 = vrsqrt.f32 %v2403_v27  ;;  %v2500_v27 = vrot.slane %v2475_v36, %v1253_v30 }
 0xc57   :  { %v5448_v28 = vpop.eup %5447 }
 0xc58   :  { %v2406_v44 = vmul.f32 %v5448_v28, %v6372_v46  ;;  %v5326_v46 = vld [vmem:[#allocation10 + $0x2b0] ss:$24 sps:$4 sm:$0xff]  }
 0xc5a   :  { %v2414_v31 = vmul.f32 %v4562_v32, %v2406_v44 }
 0xc5b   :  { %v5450_v45 = vpop.eup %5449 }
 0xc5c   :  { %v2407_v34 = vmul.f32 %v5450_v45, %v6376_v49  ;;  %v6383_v39 = vadd.f32 %v4563_v33, %v2414_v31  ;;  %v5334_v49 = vld [vmem:[#allocation10 + $0x254] ss:$24 sps:$4 sm:$0xff]  }
 0xc5e   :  { %v2415_v35 = vmul.f32 %v4562_v32, %v2407_v34 }
 0xc60   :  { %v6385_v40 = vadd.f32 %v4563_v33, %v2415_v35 }
 0xc62   :  { %v2424_v43 = vpack.c.bf16 %v6385_v40, %v6383_v39 }
 0xc64   :  { %2780 = vmatmul.mubr.bf16.vlgmr.msra.gmra.mxu1 %v2424_v43  ;;  %2823 = vmatmul.mubr.bf16.vlgmr.msra.gmra.mxu0 %v2424_v43 }
 0xc65   :  { %2834 = vmatpush1.bf16.msra.mxu1 %v5323_v42  ;;  %2865 = vmatprep.mubr.bf16.mxu1 %v5997_v0 }
 0xc66   :  { %2835 = vmatprep.subr.bf16.mxu1 %v5328_v47  ;;  %4943 = vmatprep.mubr.msk.bf16.mxu0 %vm6000_vm8, %v5999_v62 }
 0xc69   :  { %2836 = vmatpush1.bf16.msra.mxu1 %v5326_v46 }
 0xc6a   :  { %2837 = vmatprep.subr.bf16.mxu1 %v5331_v48 }
 0xc6d   :  { %2838 = vmatpush1.bf16.msra.mxu1 %v5329_v4 }
 0xc6e   :  { %2839 = vmatprep.subr.bf16.mxu1 %v5334_v49 }
 0xc71   :  { %2840 = vmatpush1.bf16.msra.mxu1 %v5332_v5 }
 0xc72   :  { %2841 = vmatprep.subr.bf16.mxu1 %v5337_v50 }
 0xc75   :  { %2842 = vmatpush1.bf16.msra.mxu1 %v5335_v51 }
 0xc76   :  { %2843 = vmatprep.subr.bf16.mxu1 %v5340_v52 }
 0xc79   :  { %2844 = vmatpush1.bf16.msra.mxu1 %v5338_v54 }
 0xc7a   :  { %2845 = vmatprep.subr.bf16.mxu1 %v5343_v55 }
 0xc7d   :  { %2846 = vmatpush1.bf16.msra.mxu1 %v5341_v56 }
 0xc7e   :  { %2847 = vmatprep.subr.bf16.mxu1 %v5346_v57 }
 0xc81   :  { %2848 = vmatpush1.bf16.msra.mxu1 %v5344_v58 }
 0xc82   :  { %4929 = vmatprep.subr.bf16.mxu1 %v5999_v62 }
 0xc84   :  { %2866 = vmatmul.mubr.bf16.vlgmr.msra.gmra.mxu1 %v2424_v43 }
 0xc85   :  { %4931 = vmatprep.mubr.msk.bf16.mxu1 %vm6000_vm8, %v5999_v62 }
 0xd24   :  { %v2781_v38 = vpop.f32.mrf.mxu1  ;;  %v2824_v41 = vpop.f32.mrf.mxu0 }
 0xd25   :  { %v2825_v6 = vadd.f32 %v2824_v41, %v2488_v59  ;;  %v2782_v16 = vadd.f32 %v2781_v38, %v2480_v12 }
 0xd26   :  { %v2826_v61 = vpop.f32.mrf.mxu0  ;;  %v2783_v2 = vpop.f32.mrf.mxu1 }
 0xd27   :  { %v2827_v1 = vadd.f32 %v2826_v61, %v2492_v13  ;;  %v2784_v11 = vadd.f32 %v2783_v2, %v2484_v21 }
 0xd28   :  { %v2828_v3 = vpop.f32.mrf.mxu0  ;;  %v2785_v9 = vpop.f32.mrf.mxu1 }
 0xd29   :  { %v2829_v7 = vadd.f32 %v2828_v3, %v2488_v59  ;;  %v2786_v14 = vadd.f32 %v2785_v9, %v2480_v12 }
 0xd2a   :  { %v2830_v37 = vpop.f32.mrf.mxu0  ;;  %v2787_v18 = vpop.f32.mrf.mxu1 }
 0xd2b   :  { %v2878_v10 = vpack.c.bf16 %v2829_v7, %v2825_v6  ;;  %v2831_v15 = vadd.f32 %v2830_v37, %v2492_v13  ;;  %v2876_v17 = vpack.c.bf16 %v2786_v14, %v2782_v16  ;;  %v2788_v22 = vadd.f32 %v2787_v18, %v2484_v21 }
 0xd2d   :  { %4930 = vmatpush3.bf16.xpose.msra.mxu1 %v2878_v10  ;;  %v2879_v19 = vpack.c.bf16 %v2831_v15, %v2827_v1  ;;  %v2877_v23 = vpack.c.bf16 %v2788_v22, %v2784_v11 }
 0xd2e   :  { %4935 = vmatprep.subr.bf16.mxu1 %v5999_v62 }
 0xd34   :  { %4932 = vmatmul.mubr.bf16.vlgmr.msra.gmra.mxu1 %v2876_v17 }
 0xd35   :  { %4936 = vmatpush3.bf16.xpose.msra.mxu1 %v2879_v19  ;;  %4937 = vmatprep.mubr.msk.bf16.mxu1 %vm6000_vm8, %v5999_v62 }
 0xd36   :  { %4947 = vmatprep.subr.bf16.mxu1 %v5999_v62 }
 0xd3c   :  { %4938 = vmatmul.mubr.bf16.vlgmr.msra.gmra.mxu1 %v2877_v23 }
 0xd3d   :  { %4949 = vmatprep.mubr.msk.bf16.mxu1 %vm6000_vm8, %v5999_v62 }
 0xd44   :  { %v2867_v24 = vpop.f32.mrf.mxu1 }
 0xd45   :  { %v2868_v44 = vadd.f32 %v2867_v24, %v2496_v25 }
 0xd46   :  { %v2869_v26 = vpop.f32.mrf.mxu1 }
 0xd47   :  { %v2870_v34 = vadd.f32 %v2869_v26, %v2500_v27 }
 0xd48   :  { %v2871_v28 = vpop.f32.mrf.mxu1 }
 0xd49   :  { %v2872_v32 = vadd.f32 %v2871_v28, %v2496_v25 }
 0xd4a   :  { %v2873_v45 = vpop.f32.mrf.mxu1 }
 0xd4b   :  { %v2880_v31 = vpack.c.bf16 %v2872_v32, %v2868_v44  ;;  %v2874_v33 = vadd.f32 %v2873_v45, %v2500_v27  ;;  %v5347_v45 = vld [vmem:[#allocation13 + $0x78] sm:$0xff]  }
 0xd4d   :  { %v2881_v35 = vpack.c.bf16 %v2874_v33, %v2870_v34  ;;  %4948 = vmatpush3.bf16.msra.mxu1 %v2880_v31  ;;  %v5348_v31 = vld [vmem:[#allocation13 + $0x70] sm:$0xff]   ;;  %v5349_v33 = vld [vmem:[#allocation13 + $0x68] sm:$0xff]  }
 0xd4f   :  { %4942 = vmatpush3.bf16.msra.mxu0 %v2881_v35  ;;  %v5351_v35 = vld [vmem:[#allocation13 + $0x58] sm:$0xff]  }
 0xd50   :  { %4953 = vmatprep.subr.bf16.mxu0 %v5999_v62 }
 0xdf4   :  { %v2916_v42 = vpop.f32.mrf.mxu1 }
 0xdf5   :  { %v2923_v43 = vmul.f32 0.125, %v2916_v42  ;;  %v5352_v42 = vld [vmem:[#allocation13 + $0x50] sm:$0xff]  }
 0xdf6   :  { %v4933_v47 = vpop.f32.mrf.mxu1 }
 0xdf7   :  { %v2925_v29 = vadd.f32 %v2923_v43, %v6325_v53  ;;  %v5353_v43 = vld [vmem:[#allocation13 + $0x48] sm:$0xff]   ;;  %v5354_v47 = vld [vmem:[#allocation13 + $0x40] sm:$0xff]  }
 0xdf8   :  { %v2919_v46 = vpop.f32.mrf.mxu1 }
 0xdf9   :  { %v2924_v63 = vmul.f32 0.125, %v2919_v46  ;;  %v2927_v30 = vsel %vm1681_vm9, %v2925_v29, -inf }
 0xdfa   :  { %2928 = vmax.xlane.f32.xlu1 %v2927_v30  ;;  %v4934_v48 = vpop.f32.mrf.mxu1 }
 0xdfb   :  { %v2926_v4 = vadd.f32 %v2924_v63, %v6330_v60 }
 0xdfc   :  { %v2984_v49 = vpop.f32.mrf.mxu1 }
 0xdfd   :  { %v2991_v5 = vmul.f32 0.125, %v2984_v49  ;;  %v2930_v50 = vsel %vm1681_vm9, %v2926_v4, -inf }
 0xdfe   :  { %2931 = vmax.xlane.f32.xlu0 %v2930_v50  ;;  %v4939_v51 = vpop.f32.mrf.mxu1 }
 0xdff   :  { %v2993_v52 = vadd.f32 %v2991_v5, %v6325_v53 }
 0xe00   :  { %v2987_v54 = vpop.f32.mrf.mxu1 }
 0xe01   :  { %v2992_v55 = vmul.f32 0.125, %v2987_v54  ;;  %v2995_v56 = vsel %vm1681_vm9, %v2993_v52, -inf  ;;  %v4614_v54 = vld [vmem:[#allocation14 + $0x1] ss:$0 sm:$0xff] }
 0xe02   :  { %2996 = vmax.xlane.f32.xlu1 %v2995_v56  ;;  %v4940_v57 = vpop.f32.mrf.mxu1 }
 0xe03   :  { %v2994_v58 = vadd.f32 %v2992_v55, %v6330_v60 }
 0xe05   :  { %v2998_v36 = vsel %vm1681_vm9, %v2994_v58, -inf }
 0xe06   :  { %2999 = vmax.xlane.f32.xlu0 %v2998_v36 }
 0xe83   :  { %v2929_v38 = vpop.xlane.xlu1 %2928 }
 0xe84   :  { %v2933_v41 = vsub.f32 %v2925_v29, %v2929_v38 }
 0xe86   :  { %v2935_v59 = vmul.f32 1.442695, %v2933_v41 }
 0xe87   :  { %v2932_v61 = vpop.xlane.xlu0 %2931 }
 0xe88   :  { %5451 = vpow2.f32 %v2935_v59  ;;  %v2934_v2 = vsub.f32 %v2926_v4, %v2932_v61  ;;  %v5355_v61 = vld [vmem:[#allocation19 + $0xf0] ss:$8 sps:$4 sm:$0xff]  }
 0xe8a   :  { %v2937_v3 = vmul.f32 1.442695, %v2934_v2  ;;  %v5357_v2 = vld [vmem:[#allocation19 + $0xf4] ss:$8 sps:$4 sm:$0xff]  }
 0xe8b   :  { %v2997_v6 = vpop.xlane.xlu1 %2996  ;;  %3376 = vmatprep.subr.bf16.mxu1 %v5357_v2 }
 0xe8c   :  { %5453 = vpow2.f32 %v2937_v3  ;;  %v3001_v53 = vsub.f32 %v2993_v52, %v2997_v6 }
 0xe8e   :  { %v3003_v7 = vmul.f32 1.442695, %v3001_v53 }
 0xe8f   :  { %v3000_v9 = vpop.xlane.xlu0 %2999 }
 0xe90   :  { %5455 = vpow2.f32 %v3003_v7  ;;  %v3002_v10 = vsub.f32 %v2994_v58, %v3000_v9 }
 0xe92   :  { %v3005_v12 = vmul.f32 1.442695, %v3002_v10 }
 0xe94   :  { %5457 = vpow2.f32 %v3005_v12 }
 0xe95   :  { %v5452_v60 = vpop.eup %5451 }
 0xe96   :  { %v2939_v37 = vsel %vm1681_vm9, %v5452_v60, 0.0 }
 0xe97   :  { %2940 = vadd.xlane.f32.xlu1 %v2939_v37  ;;  %v5360_v37 = vld [vmem:[#allocation19 + $0xe4] ss:$8 sps:$4 sm:$0xff]  }
 0xe99   :  { %v5454_v13 = vpop.eup %5453 }
 0xe9a   :  { %v2942_v14 = vsel %vm1681_vm9, %v5454_v13, 0.0 }
 0xe9b   :  { %2943 = vadd.xlane.f32.xlu0 %v2942_v14  ;;  %v5366_v14 = vld [vmem:[#allocation19 + $0xc4] ss:$8 sps:$4 sm:$0xff]  }
 0xe9d   :  { %v5456_v15 = vpop.eup %5455 }
 0xe9e   :  { %v3007_v16 = vsel %vm1681_vm9, %v5456_v15, 0.0 }
 0xe9f   :  { %3008 = vadd.xlane.f32.xlu1 %v3007_v16  ;;  %v5369_v16 = vld [vmem:[#allocation19 + $0xb4] ss:$8 sps:$4 sm:$0xff]  }
 0xea1   :  { %v5458_v1 = vpop.eup %5457 }
 0xea2   :  { %v3010_v17 = vsel %vm1681_vm9, %v5458_v1, 0.0 }
 0xea3   :  { %3011 = vadd.xlane.f32.xlu0 %v3010_v17  ;;  %v5372_v17 = vld [vmem:[#allocation19 + $0xa4] ss:$8 sps:$4 sm:$0xff]  }
 0xf20   :  { %v2941_v18 = vpop.xlane.xlu1 %2940 }
 0xf21   :  { %5459 = vrcp.f32 %v2941_v18  ;;  %v5370_v18 = vld [vmem:[#allocation19 + $0xa0] ss:$8 sps:$4 sm:$0xff]  }
 0xf24   :  { %v2944_v19 = vpop.xlane.xlu0 %2943 }
 0xf25   :  { %5461 = vrcp.f32 %v2944_v19  ;;  %v5375_v19 = vld [vmem:[#allocation19 + $0x94] ss:$8 sps:$4 sm:$0xff]  }
 0xf28   :  { %v3009_v21 = vpop.xlane.xlu1 %3008 }
 0xf29   :  { %5463 = vrcp.f32 %v3009_v21  ;;  %v5373_v21 = vld [vmem:[#allocation19 + $0x90] ss:$8 sps:$4 sm:$0xff]  }
 0xf2c   :  { %v3012_v22 = vpop.xlane.xlu0 %3011 }
 0xf2d   :  { %5465 = vrcp.f32 %v3012_v22  ;;  %v5378_v22 = vld [vmem:[#allocation19 + $0x84] ss:$8 sps:$4 sm:$0xff]  }
 0xf2e   :  { %v5460_v11 = vpop.eup %5459 }
 0xf2f   :  { %v2947_v24 = vmul.f32 %v5460_v11, %v5452_v60  ;;  %v5358_v60 = vld [vmem:[#allocation19 + $0xe0] ss:$8 sps:$4 sm:$0xff]  }
 0xf30   :  { %v5376_v11 = vld [vmem:[#allocation19 + $0x80] ss:$8 sps:$4 sm:$0xff]  }
 0xf32   :  { %v5462_v23 = vpop.eup %5461 }
 0xf33   :  { %v2948_v25 = vmul.f32 %v5462_v23, %v5454_v13  ;;  %v5363_v13 = vld [vmem:[#allocation19 + $0xd4] ss:$8 sps:$4 sm:$0xff]  }
 0xf35   :  { %v2949_v26 = vpack.c.bf16 %v2948_v25, %v2947_v24 }
 0xf36   :  { %v5464_v27 = vpop.eup %5463 }
 0xf37   :  { %4950 = vmatmul.mubr.msk.bf16.vlgmr.msra.gmra.mxu1 %vm1681_vm9, %v2949_v26  ;;  %v3015_v44 = vmul.f32 %v5464_v27, %v5456_v15  ;;  %v5364_v15 = vld [vmem:[#allocation19 + $0xc0] ss:$8 sps:$4 sm:$0xff]  }
 0xf38   :  { %3408 = vmatprep.mubr.bf16.mxu1 %v5997_v0  ;;  %v5350_v0 = vld [vmem:[#allocation13 + $0x60] sm:$0xff]   ;;  %3377 = vmatpush1.bf16.msra.mxu1 %v5355_v61 }
 0xf39   :  { %3378 = vmatprep.subr.bf16.mxu1 %v5360_v37 }
 0xf3a   :  { %v5466_v28 = vpop.eup %5465 }
 0xf3b   :  { %v3016_v32 = vmul.f32 %v5466_v28, %v5458_v1  ;;  %v5367_v1 = vld [vmem:[#allocation19 + $0xb0] ss:$8 sps:$4 sm:$0xff]  }
 0xf3c   :  { %3379 = vmatpush1.bf16.msra.mxu1 %v5358_v60 }
 0xf3d   :  { %v3017_v34 = vpack.c.bf16 %v3016_v32, %v3015_v44  ;;  %3380 = vmatprep.subr.bf16.mxu1 %v5363_v13 }
 0xf3f   :  { %4944 = vmatmul.mubr.msk.bf16.vlgmr.msra.gmra.mxu0 %vm1681_vm9, %v3017_v34 }
 0xf40   :  { %4954 = vmatpush3.bf16.msra.mxu0 %v5347_v45  ;;  %4969 = vmatprep.mubr.msk.bf16.mxu0 %vm6000_vm8, %v5999_v62  ;;  %v4623_v45 = vld [vmem:[#allocation16 + $0x1] ss:$0 sm:$0xff] }
 0xf41   :  { %4955 = vmatprep.subr.bf16.mxu0 %v5999_v62 }
 0xf44   :  { %4956 = vmatpush3.bf16.msra.mxu0 %v5348_v31 }
 0xf45   :  { %4957 = vmatprep.subr.bf16.mxu0 %v5999_v62 }
 0xf48   :  { %4958 = vmatpush3.bf16.msra.mxu0 %v5349_v33 }
 0xf49   :  { %4959 = vmatprep.subr.bf16.mxu0 %v5999_v62 }
 0xf4c   :  { %4960 = vmatpush3.bf16.msra.mxu0 %v5350_v0  ;;  %v4624_v0 = vld [vmem:[#allocation17 + $0x1] ss:$0 sm:$0xff] }
 0xf4d   :  { %4961 = vmatprep.subr.bf16.mxu0 %v5999_v62 }
 0xf50   :  { %4962 = vmatpush3.bf16.msra.mxu0 %v5351_v35 }
 0xf51   :  { %4963 = vmatprep.subr.bf16.mxu0 %v5999_v62 }
 0xf54   :  { %4964 = vmatpush3.bf16.msra.mxu0 %v5352_v42 }
 0xf55   :  { %4965 = vmatprep.subr.bf16.mxu0 %v5999_v62 }
 0xf58   :  { %4966 = vmatpush3.bf16.msra.mxu0 %v5353_v43 }
 0xf59   :  { %4967 = vmatprep.subr.bf16.mxu0 %v5999_v62 }
 0xf5c   :  { %4968 = vmatpush3.bf16.msra.mxu0 %v5354_v47 }
 0xff7   :  { %v3099_v29 = vpop.f32.mrf.mxu1 }
 0xff9   :  { %v4951_v46 = vpop.f32.mrf.mxu1 }
 0xffa   :  { %v5380_v46 = vld [vmem:[#allocation20 + $0xb8] sm:$0xff]  }
 0xffb   :  { %v3102_v63 = vpop.f32.mrf.mxu1 }
 0xffd   :  { %v4952_v30 = vpop.f32.mrf.mxu1 }
 0xffe   :  { %v5382_v30 = vld [vmem:[#allocation20 + $0xb0] sm:$0xff]  }
 0xfff   :  { %v3055_v48 = vpop.f32.mrf.mxu0 }
0x1000   :  { %v3100_v5 = vadd.f32 %v3099_v29, %v3055_v48  ;;  %v5379_v29 = vld [vmem:[#allocation20 + $0xf8] sm:$0xff]   ;;  %v5383_v48 = vld [vmem:[#allocation20 + $0xe8] sm:$0xff]  }
0x1001   :  { %v4945_v4 = vpop.f32.mrf.mxu0  ;;  %4840 = vmatprep.subr.bf16.mxu0 %v5379_v29 }
0x1002   :  { %v5384_v4 = vld [vmem:[#allocation20 + $0xa8] sm:$0xff]  }
0x1003   :  { %v3058_v49 = vpop.f32.mrf.mxu0 }
0x1004   :  { %v3103_v50 = vadd.f32 %v3102_v63, %v3058_v49  ;;  %v5381_v63 = vld [vmem:[#allocation20 + $0xf0] sm:$0xff]   ;;  %v5385_v49 = vld [vmem:[#allocation20 + $0xe0] sm:$0xff]  }
0x1005   :  { %v4946_v51 = vpop.f32.mrf.mxu0 }
0x1006   :  { %v3106_v52 = vpack.c.bf16 %v3103_v50, %v3100_v5  ;;  %v5386_v5 = vld [vmem:[#allocation20 + $0xa0] sm:$0xff]   ;;  %v5387_v50 = vld [vmem:[#allocation20 + $0xd8] sm:$0xff]  }
0x1007   :  { %v5388_v51 = vld [vmem:[#allocation20 + $0x98] sm:$0xff]  }
0x1008   :  { %4970 = vmatmul.mubr.bf16.vlgmr.msra.gmra.mxu0 %v3106_v52  ;;  %v5389_v52 = vld [vmem:[#allocation20 + $0xd0] sm:$0xff]  }
0x1009   :  { %4841 = vmatpush3.bf16.msra.mxu0 %v5380_v46 }
0x100a   :  { %4842 = vmatprep.subr.bf16.mxu0 %v5381_v63 }
0x100d   :  { %4843 = vmatpush3.bf16.msra.mxu0 %v5382_v30 }
0x100e   :  { %4844 = vmatprep.subr.bf16.mxu0 %v5383_v48 }
0x1011   :  { %4845 = vmatpush3.bf16.msra.mxu0 %v5384_v4  ;;  %v4642_v4 = vld [vmem:[#allocation22 + $0x1] ss:$0 sm:$0xff] }
0x1012   :  { %4846 = vmatprep.subr.bf16.mxu0 %v5385_v49 }
0x1015   :  { %4847 = vmatpush3.bf16.msra.mxu0 %v5386_v5 }
0x1016   :  { %4848 = vmatprep.subr.bf16.mxu0 %v5387_v50 }
0x1019   :  { %4849 = vmatpush3.bf16.msra.mxu0 %v5388_v51 }
0x101a   :  { %4850 = vmatprep.subr.bf16.mxu0 %v5389_v52 }
0x10c8   :  { %v3214_v55 = vpop.f32.mrf.mxu0 }
0x10c9   :  { %v3215_v56 = vadd.f32 %v4614_v54, %v3214_v55  ;;  %v5391_v55 = vld [vmem:[#allocation20 + $0xc8] sm:$0xff]  }
0x10ca   :  { %v4971_v57 = vpop.f32.mrf.mxu0 }
0x10cb   :  { %v3221_v58 = vadd.f32 %v3215_v56, %v6383_v39  ;;  %v5392_v56 = vld [vmem:[#allocation20 + $0x88] sm:$0xff]   ;;  %v5393_v57 = vld [vmem:[#allocation20 + $0xc0] sm:$0xff]  }
0x10cc   :  { %v3217_v36 = vpop.f32.mrf.mxu0 }
0x10cd   :  { %v3218_v38 = vadd.f32 %v4614_v54, %v3217_v36  ;;  %3227 = vadd.xlane.f32.xlu1 %v3221_v58  ;;  %v5390_v54 = vld [vmem:[#allocation20 + $0x90] sm:$0xff]   ;;  %v4625_v36 = vld [vmem:[%s6577_s26 + $0x2] sm:$0x3] }
0x10ce   :  { %v4972_v41 = vpop.f32.mrf.mxu0  ;;  %4851 = vmatpush3.bf16.msra.mxu0 %v5390_v54 }
0x10cf   :  { %v3222_v59 = vadd.f32 %v3218_v38, %v6385_v40  ;;  %v5361_v40 = vld [vmem:[#allocation19 + $0xd0] ss:$8 sps:$4 sm:$0xff]   ;;  %4852 = vmatprep.subr.bf16.mxu0 %v5391_v55  ;;  %v3289_v38 = vrot.slane %v4625_v36, %v6295_v8  ;;  %v3293_v41 = vrot.slane %v4625_v36, %v6303_v20 }
0x10d0   :  { %3381 = vmatpush1.bf16.msra.mxu1 %v5361_v40 }
0x10d1   :  { %3229 = vadd.xlane.f32.xlu0 %v3222_v59  ;;  %3382 = vmatprep.subr.bf16.mxu1 %v5366_v14 }
0x10d2   :  { %4853 = vmatpush3.bf16.msra.mxu0 %v5392_v56 }
0x10d3   :  { %4854 = vmatprep.subr.bf16.mxu0 %v5393_v57 }
0x10d4   :  { %3383 = vmatpush1.bf16.msra.mxu1 %v5364_v15 }
0x10d5   :  { %3384 = vmatprep.subr.bf16.mxu1 %v5369_v16 }
0x10d8   :  { %3385 = vmatpush1.bf16.msra.mxu1 %v5367_v1 }
0x10d9   :  { %3386 = vmatprep.subr.bf16.mxu1 %v5372_v17 }
0x10dc   :  { %3387 = vmatpush1.bf16.msra.mxu1 %v5370_v18 }
0x10dd   :  { %3388 = vmatprep.subr.bf16.mxu1 %v5375_v19 }
0x10e0   :  { %3389 = vmatpush1.bf16.msra.mxu1 %v5373_v21 }
0x10e1   :  { %3390 = vmatprep.subr.bf16.mxu1 %v5378_v22 }
0x10e4   :  { %3391 = vmatpush1.bf16.msra.mxu1 %v5376_v11 }
0x10e5   :  { %4973 = vmatprep.subr.bf16.mxu1 %v5999_v62 }
0x1156   :  { %v3228_v3 = vpop.xlane.xlu1 %3227 }
0x1157   :  { %v3231_v6 = vmul.f32 0.0078125, %v3228_v3 }
0x1159   :  { %v3233_v53 = vsub.f32 %v3221_v58, %v3231_v6  ;;  %v5394_v58 = vld [vmem:[#allocation20 + $0x80] sm:$0xff]  }
0x115a   :  { %v3230_v7 = vpop.xlane.xlu0 %3229  ;;  %4855 = vmatpush3.bf16.msra.mxu0 %v5394_v58 }
0x115b   :  { %v3232_v9 = vmul.f32 0.0078125, %v3230_v7  ;;  %v3235_v10 = vmul.f32 %v3233_v53, %v3233_v53  ;;  %4993 = vmatprep.subr.bf16.mxu0 %v5999_v62 }
0x115d   :  { %v3234_v12 = vsub.f32 %v3222_v59, %v3232_v9  ;;  %3237 = vadd.xlane.f32.xlu1 %v3235_v10 }
0x115f   :  { %v3236_v39 = vmul.f32 %v3234_v12, %v3234_v12 }
0x1161   :  { %3239 = vadd.xlane.f32.xlu0 %v3236_v39 }
0x11e6   :  { %v3238_v23 = vpop.xlane.xlu1 %3237 }
0x11e7   :  { %v3241_v24 = vmul.f32 0.0078125, %v3238_v23 }
0x11e9   :  { %v3243_v25 = vadd.f32 1e-12, %v3241_v24 }
0x11ea   :  { %v3240_v26 = vpop.xlane.xlu0 %3239 }
0x11eb   :  { %5467 = vrsqrt.f32 %v3243_v25  ;;  %v3242_v27 = vmul.f32 0.0078125, %v3240_v26 }
0x11ed   :  { %v3244_v28 = vadd.f32 1e-12, %v3242_v27 }
0x11ef   :  { %5469 = vrsqrt.f32 %v3244_v28 }
0x11f8   :  { %v5468_v44 = vpop.eup %5467 }
0x11f9   :  { %v3247_v32 = vmul.f32 %v5468_v44, %v3233_v53 }
0x11fb   :  { %v3255_v33 = vmul.f32 %v4623_v45, %v3247_v32 }
0x11fc   :  { %v5470_v34 = vpop.eup %5469 }
0x11fd   :  { %v3248_v31 = vmul.f32 %v5470_v34, %v3234_v12  ;;  %v6439_v42 = vadd.f32 %v4624_v0, %v3255_v33 }
0x11ff   :  { %v3256_v35 = vmul.f32 %v4623_v45, %v3248_v31 }
0x1201   :  { %v6441_v43 = vadd.f32 %v4624_v0, %v3256_v35 }
0x1203   :  { %v3265_v47 = vpack.c.bf16 %v6441_v43, %v6439_v42 }
0x1205   :  { %3409 = vmatmul.mubr.bf16.vlgmr.msra.gmra.mxu1 %v3265_v47 }
0x1206   :  { %4989 = vmatprep.mubr.msk.bf16.mxu1 %vm6000_vm8, %v5999_v62 }
0x12c5   :  { %v3410_v59 = vpop.f32.mrf.mxu1 }
0x12c6   :  { %v3411_v61 = vadd.f32 %v3410_v59, %v3289_v38 }
0x12c7   :  { %v3412_v2 = vpop.f32.mrf.mxu1 }
0x12c8   :  { %v3419_v3 = vmul.f32 %v3411_v61, %v3411_v61  ;;  %v3413_v6 = vadd.f32 %v3412_v2, %v3293_v41 }
0x12c9   :  { %v3414_v53 = vpop.f32.mrf.mxu1 }
0x12ca   :  { %v3423_v7 = vmul.f32 %v3419_v3, %v3411_v61  ;;  %v3420_v9 = vmul.f32 %v3413_v6, %v3413_v6  ;;  %v3415_v10 = vadd.f32 %v3414_v53, %v3289_v38  ;;  %v5398_v53 = vld [vmem:[%s6578_s25 + $0x20] sm:$0xff]  }
0x12cb   :  { %v3416_v12 = vpop.f32.mrf.mxu1 }
0x12cc   :  { %v3427_v39 = vmul.f32 0.044715, %v3423_v7  ;;  %v3424_v60 = vmul.f32 %v3420_v9, %v3413_v6  ;;  %v3421_v37 = vmul.f32 %v3415_v10, %v3415_v10  ;;  %v3417_v40 = vadd.f32 %v3416_v12, %v3293_v41  ;;  %v5399_v7 = vld [vmem:[%s6578_s25 + $0x18] sm:$0xff]   ;;  %v5400_v9 = vld [vmem:[%s6578_s25 + $0x10] sm:$0xff]   ;;  %v5402_v12 = vld [vmem:[%s6578_s25] sm:$0xff]  }
0x12ce   :  { %v3431_v13 = vadd.f32 %v3427_v39, %v3411_v61  ;;  %v3428_v14 = vmul.f32 0.044715, %v3424_v60  ;;  %v3425_v15 = vmul.f32 %v3421_v37, %v3415_v10  ;;  %v3422_v8 = vmul.f32 %v3417_v40, %v3417_v40 }
0x12d0   :  { %v3435_v16 = vmul.f32 0.7978846, %v3431_v13  ;;  %v3432_v20 = vadd.f32 %v3428_v14, %v3413_v6  ;;  %v3429_v1 = vmul.f32 0.044715, %v3425_v15  ;;  %v3426_v17 = vmul.f32 %v3422_v8, %v3417_v40  ;;  %v4659_v8 = vld [vmem:[#allocation23 + $0x1] ss:$0 sm:$0xff] }
0x12d2   :  { %v3436_v18 = vmul.f32 0.7978846, %v3432_v20  ;;  %v3433_v19 = vadd.f32 %v3429_v1, %v3415_v10  ;;  %v3430_v21 = vmul.f32 0.044715, %v3426_v17  ;;  %5471 = vtanh.f32 %v3435_v16  ;;  %v4660_v20 = vld [vmem:[#allocation25 + $0x1] ss:$0 sm:$0xff] }
0x12d4   :  { %5473 = vtanh.f32 %v3436_v18  ;;  %v3437_v22 = vmul.f32 0.7978846, %v3433_v19  ;;  %v3434_v11 = vadd.f32 %v3430_v21, %v3417_v40  ;;  %v4672_v18 = vld [vmem:[#allocation28 + $0x1] ss:$0 sm:$0xff] }
0x12d6   :  { %5475 = vtanh.f32 %v3437_v22  ;;  %v3438_v23 = vmul.f32 0.7978846, %v3434_v11 }
0x12d8   :  { %5477 = vtanh.f32 %v3438_v23  ;;  %v4670_v23 = vld [vmem:[#allocation28] ss:$0 sm:$0xff] }
0x12df   :  { %v5472_v24 = vpop.eup %5471 }
0x12e0   :  { %v3443_v28 = vadd.f32 1.0, %v5472_v24 }
0x12e1   :  { %v5474_v25 = vpop.eup %5473 }
0x12e2   :  { %v3444_v26 = vadd.f32 1.0, %v5474_v25  ;;  %v3447_v33 = vmul.f32 0.5, %v3443_v28 }
0x12e3   :  { %v5476_v27 = vpop.eup %5475 }
0x12e4   :  { %v3445_v44 = vadd.f32 1.0, %v5476_v27  ;;  %v3448_v31 = vmul.f32 0.5, %v3444_v26  ;;  %v3451_v46 = vmul.f32 %v3447_v33, %v3411_v61  ;;  %v4671_v33 = vld [vmem:[%s6579_s3] ss:$0 sm:$0xff] }
0x12e5   :  { %v5478_v32 = vpop.eup %5477 }
0x12e6   :  { %v3449_v45 = vmul.f32 0.5, %v3445_v44  ;;  %v3446_v34 = vadd.f32 1.0, %v5478_v32  ;;  %v3452_v47 = vmul.f32 %v3448_v31, %v3413_v6  ;;  %v5397_v6 = vld [vmem:[%s6578_s25 + $0x28] sm:$0xff]   ;;  %v4673_v32 = vld [vmem:[%s6579_s3 + $0x1] ss:$0 sm:$0xff] }
0x12e8   :  { %v3450_v0 = vmul.f32 0.5, %v3446_v34  ;;  %v3453_v35 = vmul.f32 %v3449_v45, %v3415_v10  ;;  %v5401_v10 = vld [vmem:[%s6578_s25 + $0x8] sm:$0xff]   ;;  %v3795_v45 = vld [vmem:[%s6580_s28] sm:$0xff] }
0x12ea   :  { %v3454_v29 = vmul.f32 %v3450_v0, %v3417_v40  ;;  %v3455_v30 = vpack.c.bf16 %v3453_v35, %v3451_v46  ;;  %v3796_v35 = vld [vmem:[%s6580_s28 + $0x8] sm:$0xff] }
0x12ec   :  { %v3456_v63 = vpack.c.bf16 %v3454_v29, %v3452_v47 }
0x12ee   :  { %3626 = vmatprep.mubr.bf16.mxu0 %v3456_v63 }
0x12ef   :  { %3627 = vmatmul.mubr.bf16.vlgmr.msra.gmra.mxu0 %v3455_v30 }
0x12f0   :  { %5009 = vmatprep.mubr.msk.bf16.mxu0 %vm6000_vm8, %v5999_v62 }
0x13af   :  { %v4856_v48 = vpop.f32.mrf.mxu0 }
0x13b1   :  { %v4857_v49 = vpop.f32.mrf.mxu0 }
0x13b2   :  { %v4858_v5 = vadd.f32 %v4857_v49, %v4856_v48 }
0x13b3   :  { %v4859_v50 = vpop.f32.mrf.mxu0 }
0x13b4   :  { %v3629_v51 = vadd.f32 %v4858_v5, %v4642_v4 }
0x13b5   :  { %v4860_v52 = vpop.f32.mrf.mxu0 }
0x13b6   :  { %v4861_v54 = vadd.f32 %v4860_v52, %v4859_v50  ;;  %v3635_v55 = vadd.f32 %v3629_v51, %v6439_v42  ;;  %v5395_v42 = vld [vmem:[%s6578_s25 + $0x38] sm:$0xff]  }
0x13b7   :  { %4974 = vmatpush3.bf16.msra.mxu1 %v5395_v42 }
0x13b8   :  { %v3632_v56 = vadd.f32 %v4861_v54, %v4642_v4  ;;  %3641 = vadd.xlane.f32.xlu1 %v3635_v55  ;;  %4975 = vmatprep.subr.bf16.mxu1 %v5999_v62 }
0x13ba   :  { %v3636_v57 = vadd.f32 %v3632_v56, %v6441_v43  ;;  %v5396_v43 = vld [vmem:[%s6578_s25 + $0x30] sm:$0xff]  }
0x13bb   :  { %4976 = vmatpush3.bf16.msra.mxu1 %v5396_v43 }
0x13bc   :  { %3643 = vadd.xlane.f32.xlu0 %v3636_v57  ;;  %4977 = vmatprep.subr.bf16.mxu1 %v5999_v62 }
0x13bf   :  { %4978 = vmatpush3.bf16.msra.mxu1 %v5397_v6 }
0x13c0   :  { %4979 = vmatprep.subr.bf16.mxu1 %v5999_v62 }
0x13c3   :  { %4980 = vmatpush3.bf16.msra.mxu1 %v5398_v53 }
0x13c4   :  { %4981 = vmatprep.subr.bf16.mxu1 %v5999_v62 }
0x13c7   :  { %4982 = vmatpush3.bf16.msra.mxu1 %v5399_v7 }
0x13c8   :  { %4983 = vmatprep.subr.bf16.mxu1 %v5999_v62 }
0x13cb   :  { %4984 = vmatpush3.bf16.msra.mxu1 %v5400_v9 }
0x13cc   :  { %4985 = vmatprep.subr.bf16.mxu1 %v5999_v62 }
0x13cf   :  { %4986 = vmatpush3.bf16.msra.mxu1 %v5401_v10 }
0x13d0   :  { %4987 = vmatprep.subr.bf16.mxu1 %v5999_v62 }
0x13d3   :  { %4988 = vmatpush3.bf16.msra.mxu1 %v5402_v12 }
0x13d4   :  { %5013 = vmatprep.subr.bf16.mxu1 %v5999_v62 }
0x1441   :  { %v3642_v58 = vpop.xlane.xlu1 %3641 }
0x1442   :  { %v3645_v36 = vmul.f32 0.0078125, %v3642_v58 }
0x1444   :  { %v3647_v38 = vsub.f32 %v3635_v55, %v3645_v36 }
0x1445   :  { %v3644_v41 = vpop.xlane.xlu0 %3643 }
0x1446   :  { %v3646_v59 = vmul.f32 0.0078125, %v3644_v41  ;;  %v3649_v61 = vmul.f32 %v3647_v38, %v3647_v38 }
0x1448   :  { %v3648_v2 = vsub.f32 %v3636_v57, %v3646_v59  ;;  %3651 = vadd.xlane.f32.xlu1 %v3649_v61 }
0x144a   :  { %v3650_v3 = vmul.f32 %v3648_v2, %v3648_v2 }
0x144c   :  { %3653 = vadd.xlane.f32.xlu0 %v3650_v3 }
0x14d1   :  { %v3652_v39 = vpop.xlane.xlu1 %3651 }
0x14d2   :  { %v3655_v60 = vmul.f32 0.0078125, %v3652_v39 }
0x14d4   :  { %v3657_v37 = vadd.f32 1e-12, %v3655_v60 }
0x14d5   :  { %v3654_v40 = vpop.xlane.xlu0 %3653 }
0x14d6   :  { %5479 = vrsqrt.f32 %v3657_v37  ;;  %v3656_v13 = vmul.f32 0.0078125, %v3654_v40 }
0x14d8   :  { %v3658_v14 = vadd.f32 1e-12, %v3656_v13 }
0x14da   :  { %5481 = vrsqrt.f32 %v3658_v14 }
0x14e3   :  { %v5480_v15 = vpop.eup %5479 }
0x14e4   :  { %v3661_v16 = vmul.f32 %v5480_v15, %v3647_v38 }
0x14e6   :  { %v3669_v1 = vmul.f32 %v4659_v8, %v3661_v16 }
0x14e7   :  { %v5482_v17 = vpop.eup %5481 }
0x14e8   :  { %v3662_v19 = vmul.f32 %v5482_v17, %v3648_v2  ;;  %v6471_v21 = vadd.f32 %v4660_v20, %v3669_v1 }
0x14ea   :  { %v3822_v22 = vmul.f32 %v4672_v18, %v6471_v21  ;;  %3679 = vst [vmem:[#allocation2] sm:$0xff] %v6471_v21  ;;  %v3670_v11 = vmul.f32 %v4659_v8, %v3662_v19  ;;  %v3802_v26 = vmul.f32 %v4670_v23, %v6471_v21 }
0x14ec   :  { %3824 = vadd.xlane.f32.xlu1 %v3822_v22  ;;  %v6475_v24 = vadd.f32 %v4660_v20, %v3670_v11 }
0x14ee   :  { %v3823_v25 = vmul.f32 %v4672_v18, %v6475_v24  ;;  %3680 = vst [vmem:[#allocation2 + $0x8] sm:$0xff] %v6475_v24  ;;  %v3803_v27 = vmul.f32 %v4670_v23, %v6475_v24 }
0x14f0   :  { %3826 = vadd.xlane.f32.xlu0 %v3823_v25  ;;  %3804 = vadd.xlane.f32.xlu1 %v3802_v26 }
0x14f4   :  { %3806 = vadd.xlane.f32.xlu0 %v3803_v27 }
0x14f5   :  { %v3681_v28 = vld [vmem:[#allocation2] ss:$8 sm:$0x3] }
0x14f6   :  { %v3682_v44 = vpack.c.bf16 %v3681_v28, %v3681_v28 }
0x14f8   :  { %4990 = vmatmul.mubr.bf16.vlgmr.msra.gmra.mxu1 %v3682_v44 }
0x14f9   :  { %5021 = vmatprep.mubr.msk.bf16.mxu1 %vm6000_vm8, %v5999_v62 }
0x1575   :  { %v3825_v34 = vpop.xlane.xlu1 %3824 }
0x1576   :  { %v3833_v31 = vadd.f32 %v4673_v32, %v3825_v34 }
0x1578   :  { %v3835_v0 = vadd.f32 %v3833_v31, %v3795_v45 }
0x1579   :  { %v3827_v47 = vpop.xlane.xlu0 %3826  ;;  %v3805_v29 = vpop.xlane.xlu1 %3804 }
0x157a   :  { %v3870_v46 = vsel %vm3837_vm10, %v3835_v0, -inf  ;;  %v3834_v63 = vadd.f32 %v4673_v32, %v3827_v47  ;;  %v3813_v30 = vadd.f32 %v4671_v33, %v3805_v29 }
0x157b   :  { %v3871_v48 = vrot.slane %v3870_v46, 4 }
0x157c   :  { %v3836_v4 = vadd.f32 %v3834_v63, %v3796_v35  ;;  %v3815_v49 = vadd.f32 %v3813_v30, %v3795_v45 }
0x157d   :  { %v3872_v5 = vmax.f32 %v3870_v46, %v3871_v48  ;;  %v3807_v50 = vpop.xlane.xlu0 %3806 }
0x157e   :  { %v3934_v51 = vsel %vm3837_vm10, %v3836_v4, -inf  ;;  %v3838_v52 = vsel %vm3837_vm10, %v3815_v49, -inf  ;;  %v3814_v54 = vadd.f32 %v4671_v33, %v3807_v50 }
0x157f   :  { %v3873_v55 = vrot.slane %v3872_v5, 2  ;;  %v3935_v56 = vrot.slane %v3934_v51, 4  ;;  %v3839_v57 = vrot.slane %v3838_v52, 4 }
0x1580   :  { %v3816_v58 = vadd.f32 %v3814_v54, %v3796_v35 }
0x1581   :  { %v3874_v36 = vmax.f32 %v3872_v5, %v3873_v55  ;;  %v3936_v38 = vmax.f32 %v3934_v51, %v3935_v56  ;;  %v3840_v41 = vmax.f32 %v3838_v52, %v3839_v57 }
0x1582   :  { %v3902_v59 = vsel %vm3837_vm10, %v3816_v58, -inf }
0x1583   :  { %v3875_v61 = vrot.slane %v3874_v36, 1  ;;  %v3937_v2 = vrot.slane %v3936_v38, 2  ;;  %v3841_v3 = vrot.slane %v3840_v41, 2  ;;  %v3903_v42 = vrot.slane %v3902_v59, 4 }
0x1585   :  { %v3876_v43 = vmax.f32 %v3874_v36, %v3875_v61  ;;  %v3938_v6 = vmax.f32 %v3936_v38, %v3937_v2  ;;  %v3842_v53 = vmax.f32 %v3840_v41, %v3841_v3  ;;  %v3904_v7 = vmax.f32 %v3902_v59, %v3903_v42 }
0x1587   :  { %v3877_v9 = vsub.f32 %v3835_v0, %v3876_v43  ;;  %v3939_v10 = vrot.slane %v3938_v6, 1  ;;  %v3843_v12 = vrot.slane %v3842_v53, 1  ;;  %v3905_v39 = vrot.slane %v3904_v7, 2 }
0x1589   :  { %v3878_v60 = vmul.f32 1.442695, %v3877_v9  ;;  %v3940_v37 = vmax.f32 %v3938_v6, %v3939_v10  ;;  %v3844_v40 = vmax.f32 %v3842_v53, %v3843_v12  ;;  %v3906_v13 = vmax.f32 %v3904_v7, %v3905_v39  ;;  %v4661_v7 = vld [vmem:[#allocation26] ss:$0 sm:$0xff] }
0x158b   :  { %5483 = vpow2.f32 %v3878_v60  ;;  %v3941_v14 = vsub.f32 %v3836_v4, %v3940_v37  ;;  %v3845_v15 = vsub.f32 %v3815_v49, %v3844_v40  ;;  %v3907_v8 = vrot.slane %v3906_v13, 1 }
0x158d   :  { %v3942_v16 = vmul.f32 1.442695, %v3941_v14  ;;  %v3846_v20 = vmul.f32 1.442695, %v3845_v15  ;;  %v3908_v1 = vmax.f32 %v3906_v13, %v3907_v8 }
0x158f   :  { %5485 = vpow2.f32 %v3942_v16  ;;  %v3909_v17 = vsub.f32 %v3816_v58, %v3908_v1 }
0x1590   :  { %5487 = vpow2.f32 %v3846_v20 }
0x1591   :  { %v3910_v18 = vmul.f32 1.442695, %v3909_v17 }
0x1593   :  { %5489 = vpow2.f32 %v3910_v18 }
0x1598   :  { %v5484_v19 = vpop.eup %5483 }
0x1599   :  { %v3880_v22 = vsel %vm3837_vm10, %v5484_v19, 0.0 }
0x159a   :  { %v3881_v11 = vrot.slane %v3880_v22, 4 }
0x159c   :  { %v5486_v23 = vpop.eup %5485  ;;  %v3882_v25 = vadd.f32 %v3881_v11, %v3880_v22 }
0x159d   :  { %v5488_v26 = vpop.eup %5487  ;;  %v3944_v27 = vsel %vm3837_vm10, %v5486_v23, 0.0 }
0x159e   :  { %v3945_v28 = vrot.slane %v3944_v27, 4  ;;  %v3848_v44 = vsel %vm3837_vm10, %v5488_v26, 0.0  ;;  %v3883_v32 = vrot.slane %v3882_v25, 2 }
0x159f   :  { %v3849_v45 = vrot.slane %v3848_v44, 4 }
0x15a0   :  { %v5490_v34 = vpop.eup %5489  ;;  %v3946_v31 = vadd.f32 %v3945_v28, %v3944_v27  ;;  %v3884_v33 = vadd.f32 %v3883_v32, %v3882_v25 }
0x15a1   :  { %v3850_v0 = vadd.f32 %v3849_v45, %v3848_v44  ;;  %v3912_v35 = vsel %vm3837_vm10, %v5490_v34, 0.0 }
0x15a2   :  { %v3913_v47 = vrot.slane %v3912_v35, 4  ;;  %v3885_v29 = vrot.slane %v3884_v33, 1  ;;  %v3947_v46 = vrot.slane %v3946_v31, 2 }
0x15a3   :  { %v3851_v63 = vrot.slane %v3850_v0, 2 }
0x15a4   :  { %v3914_v30 = vadd.f32 %v3913_v47, %v3912_v35  ;;  %v3886_v48 = vadd.f32 %v3885_v29, %v3884_v33  ;;  %v3948_v4 = vadd.f32 %v3947_v46, %v3946_v31  ;;  %v4677_v35 = vld [vmem:[%s6581_s8 + $0x1] ss:$0 sm:$0xff] }
0x15a5   :  { %v3852_v49 = vadd.f32 %v3851_v63, %v3850_v0  ;;  %v4678_v47 = vld [vmem:[%s6582_s4 + $0x1] ss:$0 sm:$0xff] }
0x15a6   :  { %5491 = vrcp.f32 %v3886_v48  ;;  %v3949_v5 = vrot.slane %v3948_v4, 1  ;;  %v3915_v50 = vrot.slane %v3914_v30, 2 }
0x15a7   :  { %v3853_v51 = vrot.slane %v3852_v49, 1 }
0x15a8   :  { %v3950_v52 = vadd.f32 %v3949_v5, %v3948_v4  ;;  %v3916_v54 = vadd.f32 %v3915_v50, %v3914_v30 }
0x15a9   :  { %v3854_v55 = vadd.f32 %v3853_v51, %v3852_v49  ;;  %v4674_v51 = vld [vmem:[%s6581_s8] ss:$0 sm:$0xff] }
0x15aa   :  { %5493 = vrcp.f32 %v3950_v52  ;;  %v3917_v56 = vrot.slane %v3916_v54, 1  ;;  %v4675_v52 = vld [vmem:[%s6582_s4] ss:$0 sm:$0xff] }
0x15ab   :  { %5495 = vrcp.f32 %v3854_v55 }
0x15ac   :  { %v3918_v57 = vadd.f32 %v3917_v56, %v3916_v54 }
0x15ae   :  { %5497 = vrcp.f32 %v3918_v57 }
0x15b3   :  { %v5492_v58 = vpop.eup %5491 }
0x15b4   :  { %v3888_v36 = vmul.f32 %v5492_v58, %v5484_v19 }
0x15b6   :  { %3891 = vperm.xlu1 %5090, %v3888_v36  }
0x15b7   :  { %v5494_v38 = vpop.eup %5493 }
0x15b8   :  { %v5496_v41 = vpop.eup %5495  ;;  %v3788_v59 = vpop.f32.mrf.mxu1  ;;  %v3952_v61 = vmul.f32 %v5494_v38, %v5486_v23  ;;  %v5403_v38 = vld [vmem:[#allocation29 + $0x38] sm:$0xff]  }
0x15b9   :  { %v3856_v2 = vmul.f32 %v5496_v41, %v5488_v26  ;;  %v3789_v12 = vadd.f32 %v4661_v7, %v3788_v59  ;;  %4994 = vmatpush3.bf16.msra.mxu0 %v5403_v38  ;;  %v5404_v41 = vld [vmem:[#allocation29 + $0x30] sm:$0xff]   ;;  %v5405_v59 = vld [vmem:[#allocation29 + $0x28] sm:$0xff]  }
0x15ba   :  { %3955 = vperm.xlu0 %5089, %v3952_v61   ;;  %v4991_v3 = vpop.f32.mrf.mxu1  ;;  %4995 = vmatprep.subr.bf16.mxu0 %v5999_v62  ;;  %v5406_v61 = vld [vmem:[#allocation29 + $0x20] sm:$0xff]  }
0x15bb   :  { %v5498_v42 = vpop.eup %5497  ;;  %3859 = vperm.xlu1 %5090, %v3856_v2   ;;  %5499 = vtanh.f32 %v3789_v12  ;;  %v4679_v2 = vld [vmem:[%s6583_s2 + $0x1] ss:$0 sm:$0xff] }
0x15bc   :  { %v3791_v43 = vpop.f32.mrf.mxu1  ;;  %v3920_v6 = vmul.f32 %v5498_v42, %v5490_v34 }
0x15bd   :  { %4996 = vmatpush3.bf16.msra.mxu0 %v5404_v41 }
0x15be   :  { %v4992_v53 = vpop.f32.mrf.mxu1  ;;  %4997 = vmatprep.subr.bf16.mxu0 %v5999_v62 }
0x15bf   :  { %3923 = vperm.xlu1 %5090, %v3920_v6   ;;  %v4676_v6 = vld [vmem:[%s6583_s2] ss:$0 sm:$0xff] }
0x15c1   :  { %4998 = vmatpush3.bf16.msra.mxu0 %v5405_v59 }
0x15c2   :  { %4999 = vmatprep.subr.bf16.mxu0 %v5999_v62 }
0x15c5   :  { %5000 = vmatpush3.bf16.msra.mxu0 %v5406_v61  ;;  %v5411_v61 = vld [vmem:[%s6154_s5 + $0x18] sm:$0xff]  }
0x15c6   :  { %5001 = vmatprep.subr.bf16.mxu0 %v5999_v62  ;;  %5014 = vmatpush3.bf16.msra.mxu1 %v5411_v61 }
0x15c7   :  { %5015 = vmatprep.subr.bf16.mxu1 %v5999_v62 }
0x15c8   :  { %v6499_v33 = vpop.eup %5499 }
0x15c9   :  { %v3997_v48 = vmul.f32 %v6499_v33, %v4677_v35  ;;  %v3974_v56 = vmul.f32 %v6499_v33, %v4674_v51 }
0x1631   :  { %v3892_v9 = vpop.permute.xlu1 %3891 }
0x1632   :  { %v3894_v10 = vmul.f32 %v3892_v9, %v6471_v21 }
0x1634   :  { %v3895_v39 = vrot.slane %v3894_v10, 4 }
0x1635   :  { %v3956_v60 = vpop.permute.xlu0 %3955 }
0x1636   :  { %v3896_v37 = vadd.f32 %v3895_v39, %v3894_v10  ;;  %v3958_v40 = vmul.f32 %v3956_v60, %v6475_v24  ;;  %v3860_v13 = vpop.permute.xlu1 %3859 }
0x1637   :  { %v3862_v14 = vmul.f32 %v3860_v13, %v6471_v21  ;;  %v5407_v13 = vld [vmem:[#allocation29 + $0x18] sm:$0xff]  }
0x1638   :  { %v3897_v15 = vrot.slane %v3896_v37, 2  ;;  %v3959_v8 = vrot.slane %v3958_v40, 4  ;;  %5002 = vmatpush3.bf16.msra.mxu0 %v5407_v13 }
0x1639   :  { %v3863_v16 = vrot.slane %v3862_v14, 4  ;;  %5003 = vmatprep.subr.bf16.mxu0 %v5999_v62 }
0x163a   :  { %v3898_v20 = vadd.f32 %v3897_v15, %v3896_v37  ;;  %v3960_v1 = vadd.f32 %v3959_v8, %v3958_v40  ;;  %v3924_v17 = vpop.permute.xlu1 %3923  ;;  %v5408_v8 = vld [vmem:[#allocation29 + $0x10] sm:$0xff]  }
0x163b   :  { %v3864_v18 = vadd.f32 %v3863_v16, %v3862_v14  ;;  %v3926_v19 = vmul.f32 %v3924_v17, %v6475_v24  ;;  %v5410_v17 = vld [vmem:[#allocation29] sm:$0xff]  }
0x163c   :  { %v3899_v22 = vrot.slane %v3898_v20, 1  ;;  %v3961_v11 = vrot.slane %v3960_v1, 2  ;;  %5004 = vmatpush3.bf16.msra.mxu0 %v5408_v8 }
0x163d   :  { %v3865_v23 = vrot.slane %v3864_v18, 2  ;;  %v3927_v25 = vrot.slane %v3926_v19, 4  ;;  %5005 = vmatprep.subr.bf16.mxu0 %v5999_v62 }
0x163e   :  { %v3962_v26 = vadd.f32 %v3961_v11, %v3960_v1  ;;  %v3900_v44 = vadd.f32 %v3899_v22, %v3898_v20  ;;  %v5409_v1 = vld [vmem:[#allocation29 + $0x8] sm:$0xff]  }
0x163f   :  { %v3866_v27 = vadd.f32 %v3865_v23, %v3864_v18  ;;  %v3928_v28 = vadd.f32 %v3927_v25, %v3926_v19 }
0x1640   :  { %v3963_v21 = vrot.slane %v3962_v26, 1  ;;  %v3901_v24 = vmul.f32 0.125, %v3900_v44  ;;  %5006 = vmatpush3.bf16.msra.mxu0 %v5409_v1 }
0x1641   :  { %v3867_v32 = vrot.slane %v3866_v27, 1  ;;  %v3929_v45 = vrot.slane %v3928_v28, 2  ;;  %5007 = vmatprep.subr.bf16.mxu0 %v5999_v62 }
0x1642   :  { %v3964_v34 = vadd.f32 %v3963_v21, %v3962_v26 }
0x1643   :  { %v3930_v31 = vadd.f32 %v3929_v45, %v3928_v28  ;;  %v3868_v29 = vadd.f32 %v3867_v32, %v3866_v27 }
0x1644   :  { %v3965_v0 = vmul.f32 0.125, %v3964_v34  ;;  %5008 = vmatpush3.bf16.msra.mxu0 %v5410_v17 }
0x1645   :  { %v3931_v46 = vrot.slane %v3930_v31, 1  ;;  %v3869_v49 = vmul.f32 0.125, %v3868_v29 }
0x1646   :  { %v6504_v63 = vsel %vm3966_vm11, %v3901_v24, %v3965_v0 }
0x1647   :  { %v3932_v30 = vadd.f32 %v3931_v46, %v3930_v31  ;;  %v4003_v4 = vmul.f32 %v4678_v47, %v6504_v63 }
0x1649   :  { %v3933_v5 = vmul.f32 0.125, %v3932_v30  ;;  %v4004_v50 = vadd.f32 %v4003_v4, %v3997_v48 }
0x164b   :  { %v4005_v54 = vsel %vm3982_vm12, %v4004_v50, 0.0  ;;  %v6512_v55 = vsel %vm3966_vm11, %v3869_v49, %v3933_v5 }
0x164c   :  { %4006 = vadd.xlane.f32.xlu0 %v4005_v54  ;;  %v3980_v57 = vmul.f32 %v4675_v52, %v6512_v55 }
0x164e   :  { %v3981_v58 = vadd.f32 %v3980_v57, %v3974_v56 }
0x1650   :  { %v3983_v36 = vsel %vm3982_vm12, %v3981_v58, 0.0 }
0x1651   :  { %3984 = vadd.xlane.f32.xlu1 %v3983_v36 }
0x16d5   :  { %v4007_v3 = vpop.xlane.xlu0 %4006 }
0x16d6   :  { %v4013_v42 = vadd.f32 %v4679_v2, %v4007_v3  ;;  %v5412_v2 = vld [vmem:[%s6154_s5 + $0x10] sm:$0xff]   ;;  %v5413_v3 = vld [vmem:[%s6154_s5 + $0x8] sm:$0xff]  }
0x16d7   :  { %5016 = vmatpush3.bf16.msra.mxu1 %v5412_v2 }
0x16d8   :  { %v4020_v43 = vsub.f32 0.0, %v4013_v42  ;;  %5017 = vmatprep.subr.bf16.mxu1 %v5999_v62 }
0x16da   :  { %v4021_v53 = vmul.f32 1.442695, %v4020_v43  ;;  %v3985_v7 = vpop.xlane.xlu1 %3984 }
0x16db   :  { %v3991_v9 = vadd.f32 %v4676_v6, %v3985_v7  ;;  %5018 = vmatpush3.bf16.msra.mxu1 %v5413_v3 }
0x16dc   :  { %5501 = vpow2.f32 %v4021_v53  ;;  %5019 = vmatprep.subr.bf16.mxu1 %v5999_v62  ;;  %v5414_v53 = vld [vmem:[%s6154_s5] sm:$0xff]  }
0x16dd   :  { %v4014_v10 = vsub.f32 0.0, %v3991_v9  ;;  %v4689_v9 = vld [vmem:[#allocation31] ss:$0 sm:$0xff] }
0x16df   :  { %v4015_v12 = vmul.f32 1.442695, %v4014_v10  ;;  %5020 = vmatpush3.bf16.msra.mxu1 %v5414_v53 }
0x16e1   :  { %5503 = vpow2.f32 %v4015_v12  ;;  %v4690_v12 = vld [vmem:[#allocation32] ss:$0 sm:$0xff] }
0x16e9   :  { %v5502_v39 = vpop.eup %5501 }
0x16ea   :  { %v4023_v60 = vadd.f32 1.0, %v5502_v39 }
0x16ec   :  { %5505 = vrcp.f32 %v4023_v60 }
0x16ee   :  { %v5504_v37 = vpop.eup %5503 }
0x16ef   :  { %v4017_v40 = vadd.f32 1.0, %v5504_v37 }
0x16f1   :  { %5507 = vrcp.f32 %v4017_v40 }
0x16f9   :  { %v5506_v14 = vpop.eup %5505 }
0x16fa   :  { %4042 = vperm.xlu0 %5089, %v5506_v14   ;;  %v4046_v15 = vsub.f32 1.0, %v5506_v14 }
0x16fc   :  { %4049 = vperm.xlu1 %5090, %v4046_v15  }
0x16fe   :  { %v5508_v16 = vpop.eup %5507 }
0x16ff   :  { %4028 = vperm.xlu0 %5089, %v5508_v16   ;;  %v4032_v20 = vsub.f32 1.0, %v5508_v16 }
0x1701   :  { %4035 = vperm.xlu1 %5090, %v4032_v20  }
0x1775   :  { %v4043_v18 = vpop.permute.xlu0 %4042 }
0x1776   :  { %v4045_v11 = vmul.f32 %v4043_v18, %v6504_v63 }
0x1777   :  { %v4050_v19 = vpop.permute.xlu1 %4049 }
0x1778   :  { %v4052_v22 = vmul.f32 %v6499_v33, %v4050_v19 }
0x177a   :  { %v4029_v23 = vpop.permute.xlu0 %4028  ;;  %v4053_v25 = vadd.f32 %v4052_v22, %v4045_v11 }
0x177b   :  { %v4031_v27 = vmul.f32 %v4029_v23, %v6512_v55 }
0x177c   :  { %v4036_v26 = vpop.permute.xlu1 %4035  ;;  %v4055_v44 = vrot.slane %v4053_v25, 6  ;;  %v4060_v34 = vrot.slane %v4053_v25, 2 }
0x177d   :  { %v4038_v28 = vmul.f32 %v6499_v33, %v4036_v26 }
0x177f   :  { %v4039_v21 = vadd.f32 %v4038_v28, %v4031_v27 }
0x1781   :  { %v4058_v32 = vrot.slane %v4039_v21, 4  ;;  %v4062_v45 = vsel %vm3982_vm12, %v4039_v21, %v4055_v44 }
0x1783   :  { %v4064_v31 = vsel %vm4063_vm13, %v4062_v45, %v4058_v32 }
0x1784   :  { %v4066_v24 = vsel %vm4065_vm14, %v4064_v31, %v4060_v34 }
0x1785   :  { %v4067_v0 = vpack.c.bf16 %v4066_v24, %v4066_v24 }
0x1787   :  { %5010 = vmatmul.mubr.bf16.vlgmr.msra.gmra.mxu0 %v4067_v0 }
0x1847   :  { %v4166_v35 = vpop.f32.mrf.mxu0 }
0x1848   :  { %v4173_v47 = vmin.f32 %v4166_v35, 0.0  ;;  %vm4172_vm15 = vcmp.gt.f32.partialorder %v4166_v35, 0.0 }
0x1849   :  { %v5011_v29 = vpop.f32.mrf.mxu0 }
0x184a   :  { %v4174_v46 = vmul.f32 1.442695, %v4173_v47 }
0x184b   :  { %v4169_v63 = vpop.f32.mrf.mxu0 }
0x184c   :  { %5509 = vpow2.f32 %v4174_v46 }
0x184d   :  { %v5012_v33 = vpop.f32.mrf.mxu0 }
0x1859   :  { %v5510_v30 = vpop.eup %5509 }
0x185a   :  { %v4688_v48 = vadd.f32 -1.0, %v5510_v30 }
0x185c   :  { %v4177_v4 = vsel %vm4172_vm15, %v4166_v35, %v4688_v48 }
0x185d   :  { %4210 = vrot.lane.b32.xlu0 %v4177_v4, %s5968_s0  ;;  %v4181_v55 = vsel %vm4180_vm1, %v4177_v4, 0.0 }
0x18cf   :  { %v4211_v49 = vpop.permute.xlu0 %4210 }
0x18d0   :  { %v4214_v5 = vsel %vm4213_vm0, %v4211_v49, 0.0 }
0x18d1   :  { %4215 = vadd.xlane.f32.xlu1 %v4214_v5 }
0x195a   :  { %v4216_v50 = vpop.xlane.xlu1 %4215 }
0x195b   :  { %v4217_v51 = vmul.f32 0.015625, %v4216_v50 }
0x195d   :  { %v4218_v52 = vsub.f32 %v4177_v4, %v4217_v51 }
0x195f   :  { %v4219_v54 = vmul.f32 %v4218_v52, %v4218_v52 }
0x1961   :  { %4221 = vrot.lane.b32.xlu0 %v4219_v54, %s5968_s0 }
0x1980   :  { %4182 = vadd.xlane.f32.xlu0 %v4181_v55 }
0x19d3   :  { %v4222_v56 = vpop.permute.xlu0 %4221 }
0x19d4   :  { %v4224_v57 = vsel %vm4213_vm0, %v4222_v56, 0.0 }
0x19d5   :  { %4225 = vadd.xlane.f32.xlu1 %v4224_v57 }
0x1a09   :  { %v4183_v58 = vpop.xlane.xlu0 %4182 }
0x1a0a   :  { %v4185_v36 = vmul.f32 0.015625, %v4183_v58 }
0x1a0c   :  { %v4186_v38 = vsub.f32 %v4177_v4, %v4185_v36 }
0x1a0e   :  { %v4187_v41 = vmul.f32 %v4186_v38, %v4186_v38 }
0x1a10   :  { %v4188_v59 = vsel %vm4180_vm1, %v4187_v41, 0.0 }
0x1a11   :  { %4189 = vadd.xlane.f32.xlu0 %v4188_v59 }
0x1a5e   :  { %v4226_v42 = vpop.xlane.xlu1 %4225 }
0x1a5f   :  { %v4227_v43 = vmul.f32 0.015625, %v4226_v42 }
0x1a61   :  { %v4228_v6 = vadd.f32 1e-05, %v4227_v43 }
0x1a63   :  { %5511 = vrsqrt.f32 %v4228_v6 }
0x1a70   :  { %v5512_v7 = vpop.eup %5511 }
0x1a71   :  { %v4230_v10 = vmul.f32 %v5512_v7, %v4218_v52 }
0x1a73   :  { %v4231_v39 = vmul.f32 %v4689_v9, %v4230_v10 }
0x1a75   :  { %v4232_v60 = vadd.f32 %v4690_v12, %v4231_v39 }
0x1a77   :  { %4234 = vrot.lane.b32.xlu1 %v4232_v60, %s5968_s0  ;;  %v4240_v37 = vrot.slane %v4232_v60, 4 }
0x1a79   :  { %4241 = vrot.lane.b32.xlu0 %v4240_v37, %s5968_s0 }
0x1a9a   :  { %v4190_v40 = vpop.xlane.xlu0 %4189 }
0x1a9b   :  { %v4191_v13 = vmul.f32 0.015625, %v4190_v40 }
0x1a9d   :  { %v4192_v62 = vadd.f32 1e-05, %v4191_v13 }
0x1a9f   :  { %5513 = vrsqrt.f32 %v4192_v62 }
0x1aac   :  { %v5514_v14 = vpop.eup %5513 }
0x1aad   :  { %v4194_v15 = vmul.f32 %v5514_v14, %v4186_v38 }
0x1aaf   :  { %v4201_v8 = vmul.f32 %v4689_v9, %v4194_v15 }
0x1ab1   :  { %v4208_v16 = vadd.f32 %v4690_v12, %v4201_v8 }
0x1ab3   :  { %v4238_v1 = vrot.slane %v4208_v16, 4 }
0x1ae9   :  { %v4235_v20 = vpop.permute.xlu1 %4234 }
0x1aea   :  { %v4244_v17 = vsel %vm3982_vm12, %v4208_v16, %v4235_v20 }
0x1aeb   :  { %v4245_v18 = vsel %vm4063_vm13, %v4244_v17, %v4238_v1  ;;  %v4242_v19 = vpop.permute.xlu0 %4241 }
0x1aec   :  { %v4246_v22 = vsel %vm4065_vm14, %v4245_v18, %v4242_v19 }
0x1aed   :  { %v4247_v11 = vpack.c.bf16 %v4246_v22, %v4246_v22 }
0x1aef   :  { %5022 = vmatmul.mubr.msk.bf16.vlgmr.msra.gmra.mxu1 %vm4280_vm2, %v4247_v11 }
0x1baf   :  { %v4318_v23 = vpop.f32.mrf.mxu1 }
0x1bb0   :  { %4324 = vst [vmem:[%s6159_s6] sm:$0xff] %v4318_v23 }
0x1bb1   :  { %v5023_v25 = vpop.f32.mrf.mxu1 }
0x1bb3   :  { %v4321_v26 = vpop.f32.mrf.mxu1 }
0x1bb5   :  { %v5024_v27 = vpop.f32.mrf.mxu1 }
0x1bb6   :  { %4329 = vsyncpa [#allocation4], 1 }
0x1bb7   :  { %4330 = vsyncpa [#allocation6], 1 }
0x1bb8   :  { %4331 = vsyncpa [#allocation9], 1 }
0x1bb9   :  { %4332 = vsyncpa [#allocation12], 1 }
0x1bba   :  { %4333 = vsyncpa [#allocation15], 1 }
0x1bbb   :  { %4334 = vsyncpa [#allocation18], 1 }
0x1bbc   :  { %4335 = vsyncpa [#allocation21], 1 }
0x1bbd   :  { %4336 = vsyncpa [#allocation24], 1 }
0x1bbe   :  { %4337 = vsyncpa [#allocation27], 1 }
0x1bbf   :  { %4338 = vsyncpa [#allocation30], 1 }
0x1bc0   :  { %4339 = vsyncpa [#allocation33], 1 }

</bundles_post_ra>
